<compile_context>
chip_gen: v5e
topology: v5e:2x2
jax: 0.10.0
libtpu: 0.0.40
codegen_flags: <defaults>
</compile_context>

<pallas_src>
import functools
import math

import jax
import jax.numpy as jnp
from jax.experimental import pallas as pl
from jax.experimental.pallas import tpu as pltpu

LANE = 128  # TPU lane width; hidden dim padded (per gate) to a multiple of this.


def _round_up(x, m):
    return (x + m - 1) // m * m


def _pad_gate_cols(w, h, hp):
    """(rows, 4h) -> (rows, 4hp); each gate block padded to hp columns."""
    if hp == h:
        return w
    rows = w.shape[0]
    w4 = w.reshape(rows, 4, h)
    return jnp.pad(w4, ((0, 0), (0, 0), (0, hp - h))).reshape(rows, 4 * hp)


def _pad_rows(w, rows_p):
    rows = w.shape[0]
    if rows_p == rows:
        return w
    return jnp.pad(w, ((0, rows_p - rows), (0, 0)))


@functools.lru_cache(maxsize=1)
def _vmem_capacity_bytes():
    """Per-core VMEM capacity; conservative 64 MiB (v7x) fallback."""
    try:
        cap = int(pltpu.get_tpu_info().vmem_capacity_bytes)
        if cap > 0:
            return cap
    except Exception:
        pass
    return 64 * 1024 * 1024


def _pick_time_chunk(T, B, Hp, whh_bytes, y_itemsize, max_chunk=64):
    """Largest Tc (<= max_chunk) whose streamed blocks fit the chip's VMEM."""
    vmem_cap = _vmem_capacity_bytes()
    # Loop-invariant residents: W_hh pipeline buffers (2x allocation even though
    # it is DMA'd only once) + h/c state scratch.
    fixed = 2 * whh_bytes + 2 * B * Hp * 4
    budget = max(int(0.55 * vmem_cap) - fixed, 2 * 1024 * 1024)
    # Streamed bytes per timestep: double-buffered gx (f32) and y blocks.
    per_step = 2 * B * 4 * Hp * 4 + 2 * B * Hp * y_itemsize
    return int(max(1, min(budget // max(per_step, 1), T, max_chunk)))


# ----------------------------------------------------------------------------
# Pallas kernel: recurrent part of one LSTM layer (time-chunked grid).
# ----------------------------------------------------------------------------
def _lstm_recurrent_kernel(gx_ref, whh_ref, y_ref, h_scr, c_scr, *, unroll):
    @pl.when(pl.program_id(0) == 0)
    def _():
        h_scr[...] = jnp.zeros_like(h_scr)
        c_scr[...] = jnp.zeros_like(c_scr)

    Hp = h_scr.shape[1]
    Tc = y_ref.shape[0]

    # W_hh^T lives in a pipeline buffer with a constant block index: DMA'd once
    # (prefetched with the first gx block), then reused every grid step.
    whh = whh_ref[...]                 # (Hp, 4*Hp), matmul dtype (bf16 default)
    w_ifg = whh[:, : 3 * Hp]           # gate-aligned (128-lane) column splits,
    w_o = whh[:, 3 * Hp:]              # hoisted out of the serial loop

    def step(i, carry):
        h_prev, c_prev = carry         # f32 (B, Hp)
        h_mm = h_prev.astype(whh.dtype)
        gx = gx_ref[i]                 # (B, 4*Hp) f32 precomputed input proj.
        # Split the recurrent dot so EUP work on i/f/g and the c update start
        # while the o-gate matmul result is still draining from the MXU.
        g_ifg = gx[:, : 3 * Hp] + jnp.dot(
            h_mm, w_ifg, preferred_element_type=jnp.float32)
        g_o = gx[:, 3 * Hp:] + jnp.dot(
            h_mm, w_o, preferred_element_type=jnp.float32)
        i_g = jax.nn.sigmoid(g_ifg[:, 0 * Hp:1 * Hp])
        f_g = jax.nn.sigmoid(g_ifg[:, 1 * Hp:2 * Hp])
        g_g = jnp.tanh(g_ifg[:, 2 * Hp:3 * Hp])
        c_new = f_g * c_prev + i_g * g_g
        o_g = jax.nn.sigmoid(g_o)
        h_new = o_g * jnp.tanh(c_new)
        y_ref[i] = h_new.astype(y_ref.dtype)
        return h_new, c_new

    h_fin, c_fin = jax.lax.fori_loop(
        0, Tc, step, (h_scr[...], c_scr[...]), unroll=unroll)
    h_scr[...] = h_fin
    c_scr[...] = c_fin


def _lstm_layer_recurrence(gates_x, w_hh_t):
    """gates_x: (T, B, 4*Hp) f32 precomputed input projection -> (T, B, Hp)."""
    T, B, G = gates_x.shape
    Hp = G // 4
    out_dtype = w_hh_t.dtype           # bf16 outputs (f32 in parity mode)
    y_itemsize = w_hh_t.dtype.itemsize
    whh_bytes = Hp * G * w_hh_t.dtype.itemsize

    Tc = _pick_time_chunk(T, B, Hp, whh_bytes, y_itemsize)
    Tp = _round_up(T, Tc)              # pad time: no Tc=1 cliff for awkward T
    if Tp != T:
        gates_x = jnp.pad(gates_x, ((0, Tp - T), (0, 0), (0, 0)))

    # Unroll cap: full unroll with (B, 4*Hp) f32 gates live per step can spill
    # vregs for large Hp; key the factor on the live-register bytes.
    live_bytes = B * G * 4
    if live_bytes <= 32 * 1024:
        unroll = 8
    elif live_bytes <= 128 * 1024:
        unroll = 4
    else:
        unroll = 2
    unroll = max(1, min(unroll, Tc))

    vmem_cap = _vmem_capacity_bytes()
    vmem_est = (
        2 * Tc * B * G * 4             # gx blocks (double-buffered, f32)
        + 2 * Tc * B * Hp * y_itemsize # y blocks (double-buffered)
        + 2 * whh_bytes                # W_hh pipeline buffers
        + 2 * B * Hp * 4               # h/c scratch
    )
    vmem_limit = int(min(max(2 * vmem_est, 4 * 1024 * 1024),
                         int(0.9 * vmem_cap)))

    y = pl.pallas_call(
        functools.partial(_lstm_recurrent_kernel, unroll=unroll),
        out_shape=jax.ShapeDtypeStruct((Tp, B, Hp), out_dtype),
        grid_spec=pltpu.PrefetchScalarGridSpec(
            num_scalar_prefetch=0,
            grid=(Tp // Tc,),
            in_specs=[
                # Gate inputs streamed per time chunk.
                pl.BlockSpec((Tc, B, G), lambda t: (t, 0, 0)),
                # W_hh^T: constant block index -> DMA'd once by the pipeline,
                # prefetched with the first gx block (no exposed stall).
                pl.BlockSpec((Hp, G), lambda t: (0, 0)),
            ],
            out_specs=pl.BlockSpec((Tc, B, Hp), lambda t: (t, 0, 0)),
            scratch_shapes=[
                pltpu.VMEM((B, Hp), jnp.float32),   # h state (carried)
                pltpu.VMEM((B, Hp), jnp.float32),   # c state (carried)
            ],
        ),
        compiler_params=pltpu.CompilerParams(
            dimension_semantics=("arbitrary",),     # time is a carried loop
            vmem_limit_bytes=vmem_limit,
        ),
    )(gates_x, w_hh_t)
    return y if Tp == T else y[:T]


def _input_projection(x_tbf, w_ih_t, bias):
    """All-timestep input projection: (T,B,F) @ (F,4Hp) + bias -> (T,B,4Hp) f32."""
    T, B, F = x_tbf.shape
    x2d = x_tbf.reshape(T * B, F).astype(w_ih_t.dtype)
    g = jnp.dot(x2d, w_ih_t, preferred_element_type=jnp.float32) + bias
    return g.reshape(T, B, -1)


# ----------------------------------------------------------------------------
# Parameter init (PyTorch nn.LSTM default U(-1/sqrt(H), 1/sqrt(H)), gate order
# i, f, g, o; b_ih + b_hh folded).  Weights stored pre-transposed, gate-padded
# to 128-lane boundaries, and cast to the matmul dtype.
# matmul_dtype=jnp.float32 is the documented exact-parity mode (bf16 default
# casts the carried h to bf16 per step and drifts slightly over long T).
# ----------------------------------------------------------------------------
def init_lstm_params(key, input_dim, hidden_dim, num_layers,
                     matmul_dtype=jnp.bfloat16):
    hp = _round_up(hidden_dim, LANE)
    bound = 1.0 / math.sqrt(hidden_dim)
    layers = []
    for layer in range(num_layers):
        d_in = input_dim if layer == 0 else hidden_dim
        key, k1, k2, k3, k4 = jax.random.split(key, 5)
        w_ih = jax.random.uniform(k1, (4 * hidden_dim, d_in), jnp.float32, -bound, bound)
        w_hh = jax.random.uniform(k2, (4 * hidden_dim, hidden_dim), jnp.float32, -bound, bound)
        b_ih = jax.random.uniform(k3, (4 * hidden_dim,), jnp.float32, -bound, bound)
        b_hh = jax.random.uniform(k4, (4 * hidden_dim,), jnp.float32, -bound, bound)

        w_ih_t = _pad_gate_cols(w_ih.T, hidden_dim, hp)                 # (d_in, 4Hp)
        if layer > 0:
            w_ih_t = _pad_rows(w_ih_t, hp)                              # (Hp, 4Hp)
        w_hh_t = _pad_rows(_pad_gate_cols(w_hh.T, hidden_dim, hp), hp)  # (Hp, 4Hp)
        bias = _pad_gate_cols((b_ih + b_hh).reshape(1, -1), hidden_dim, hp)

        layers.append({
            "w_ih_t": w_ih_t.astype(matmul_dtype),
            "w_hh_t": w_hh_t.astype(matmul_dtype),
            "bias": bias,                                               # f32
        })
    return layers


# ----------------------------------------------------------------------------
# Module wrapper: LSTM.forward(x) -> lstm_out   (batch, seq, hidden)
# ----------------------------------------------------------------------------
@functools.partial(jax.jit, static_argnames=("hidden_dim",))
def lstm_forward(x_bsd, layers, *, hidden_dim):
    # (B, T, D) -> (T, B, D); stay time-major across layers (no extra transposes).
    h = jnp.transpose(x_bsd, (1, 0, 2))
    for p in layers:
        gx = _input_projection(h, p["w_ih_t"], p["bias"])   # hoisted projection
        h = _lstm_layer_recurrence(gx, p["w_hh_t"])         # Pallas recurrence
        # TODO(synk): nn.LSTM inter-layer dropout (train-only, p=0.3) not applied.
    # Drop the (exactly-zero) padded lanes; return f32 like the PyTorch module.
    y = h[:, :, :hidden_dim].astype(jnp.float32)
    return jnp.transpose(y, (1, 0, 2))                       # back to batch_first


if __name__ == "__main__":
    B, T = 2, 8
    INPUT_DIM, HIDDEN_DIM, NUM_LAYERS = 16, 32, 2

    key = jax.random.PRNGKey(0)
    key, kx = jax.random.split(key)
    x = jax.random.normal(kx, (B, T, INPUT_DIM), dtype=jnp.float32)

    layers = init_lstm_params(key, INPUT_DIM, HIDDEN_DIM, NUM_LAYERS)

    out = lstm_forward(x, layers, hidden_dim=HIDDEN_DIM)
    out = jax.block_until_ready(out)

    assert out.shape == (B, T, HIDDEN_DIM), out.shape
    assert bool(jnp.all(jnp.isfinite(out)))
    print("KERNEL_OK")
</pallas_src>

<mosaic_0001>
module attributes {stable_mosaic.version = 11 : i64} {
  func.func @_lstm_recurrent_kernel(%arg0: i32, %arg1: memref<8x2x512xf32, #tpu.memory_space<vmem>>, %arg2: memref<128x512xbf16, #tpu.memory_space<vmem>>, %arg3: memref<8x2x128xbf16, #tpu.memory_space<vmem>>, %arg4: memref<2x128xf32, #tpu.memory_space<vmem>>, %arg5: memref<2x128xf32, #tpu.memory_space<vmem>>) attributes {dimension_semantics = [#tpu.dimension_semantics<arbitrary>], iteration_bounds = array<i64: 1>, scalar_prefetch = 0 : i64, scratch_operands = 2 : i64, tpu.core_type = #tpu.core_type<tc>, window_params = [{transform_indices = @transform_0, window_bounds = array<i64: 8, 2, 512>}, {pipeline_mode = #tpu.pipeline_mode<synchronous>, transform_indices = @transform_1, window_bounds = array<i64: 128, 512>}, {transform_indices = @transform_2, window_bounds = array<i64: 8, 2, 128>}]} {
    %c0_i32 = arith.constant 0 : i32
    %0 = arith.cmpi eq, %arg0, %c0_i32 : i32
    %1 = arith.extui %0 : i1 to i32
    %c0_i32_0 = arith.constant 0 : i32
    %2 = arith.cmpi ne, %1, %c0_i32_0 : i32
    scf.if %2 {
      %cst_82 = arith.constant 0.000000e+00 : f32
      %322 = vector.broadcast %cst_82 : f32 to vector<2x128xf32>
      %c0_83 = arith.constant 0 : index
      %c0_84 = arith.constant 0 : index
      %323 = vector.load %arg4[%c0_83, %c0_84] : memref<2x128xf32, #tpu.memory_space<vmem>>, vector<2x128xf32>
      tpu.vector_store %arg4[%c0_83, %c0_84], %322 {strides = array<i32>} : memref<2x128xf32, #tpu.memory_space<vmem>>, vector<2x128xf32>,
      %cst_85 = arith.constant 0.000000e+00 : f32
      %324 = vector.broadcast %cst_85 : f32 to vector<2x128xf32>
      %c0_86 = arith.constant 0 : index
      %c0_87 = arith.constant 0 : index
      %325 = vector.load %arg5[%c0_86, %c0_87] : memref<2x128xf32, #tpu.memory_space<vmem>>, vector<2x128xf32>
      tpu.vector_store %arg5[%c0_86, %c0_87], %324 {strides = array<i32>} : memref<2x128xf32, #tpu.memory_space<vmem>>, vector<2x128xf32>,
    } else {
    }
    %c0 = arith.constant 0 : index
    %c0_1 = arith.constant 0 : index
    %3 = vector.load %arg2[%c0, %c0_1] : memref<128x512xbf16, #tpu.memory_space<vmem>>, vector<128x512xbf16>
    %4 = vector.extract_strided_slice %3 {offsets = [0, 0], sizes = [128, 384], strides = [1, 1]} : vector<128x512xbf16> to vector<128x384xbf16>
    %5 = vector.extract_strided_slice %3 {offsets = [0, 384], sizes = [128, 128], strides = [1, 1]} : vector<128x512xbf16> to vector<128x128xbf16>
    %c0_2 = arith.constant 0 : index
    %c0_3 = arith.constant 0 : index
    %6 = vector.load %arg4[%c0_2, %c0_3] : memref<2x128xf32, #tpu.memory_space<vmem>>, vector<2x128xf32>
    %c0_4 = arith.constant 0 : index
    %c0_5 = arith.constant 0 : index
    %7 = vector.load %arg5[%c0_4, %c0_5] : memref<2x128xf32, #tpu.memory_space<vmem>>, vector<2x128xf32>
    %c0_i32_6 = arith.constant 0 : i32
    %8 = arith.truncf %6 : vector<2x128xf32> to vector<2x128xbf16>
    %9 = arith.index_cast %c0_i32_6 : i32 to index
    %c0_7 = arith.constant 0 : index
    %c0_8 = arith.constant 0 : index
    %10 = vector.load %arg1[%9, %c0_7, %c0_8] : memref<8x2x512xf32, #tpu.memory_space<vmem>>, vector<1x2x512xf32>
    %11 = vector.shape_cast %10 : vector<1x2x512xf32> to vector<2x512xf32>
    %12 = vector.extract_strided_slice %11 {offsets = [0, 0], sizes = [2, 384], strides = [1, 1]} : vector<2x512xf32> to vector<2x384xf32>
    %cst = arith.constant dense<0.000000e+00> : vector<2x384xf32>
    %13 = tpu.matmul %8, %4, %cst {dimension_numbers = #tpu.dot_dimension_numbers<[1], [0], [0], [1], [0, 0, 1, 1], [], []>} : vector<2x128xbf16>, vector<128x384xbf16>, vector<2x384xf32> -> vector<2x384xf32>
    %14 = arith.addf %12, %13 : vector<2x384xf32>
    %15 = vector.extract_strided_slice %11 {offsets = [0, 384], sizes = [2, 128], strides = [1, 1]} : vector<2x512xf32> to vector<2x128xf32>
    %cst_9 = arith.constant dense<0.000000e+00> : vector<2x128xf32>
    %16 = tpu.matmul %8, %5, %cst_9 {dimension_numbers = #tpu.dot_dimension_numbers<[1], [0], [0], [1], [0, 0, 1, 1], [], []>} : vector<2x128xbf16>, vector<128x128xbf16>, vector<2x128xf32> -> vector<2x128xf32>
    %17 = arith.addf %15, %16 : vector<2x128xf32>
    %18 = vector.extract_strided_slice %14 {offsets = [0, 0], sizes = [2, 128], strides = [1, 1]} : vector<2x384xf32> to vector<2x128xf32>
    %19 = arith.negf %18 : vector<2x128xf32>
    %20 = math.exp %19 : vector<2x128xf32>
    %cst_10 = arith.constant 1.000000e+00 : f32
    %21 = vector.broadcast %cst_10 : f32 to vector<2x128xf32>
    %22 = arith.addf %21, %20 : vector<2x128xf32>
    %23 = arith.divf %21, %22 : vector<2x128xf32>
    %24 = vector.extract_strided_slice %14 {offsets = [0, 128], sizes = [2, 128], strides = [1, 1]} : vector<2x384xf32> to vector<2x128xf32>
    %25 = arith.negf %24 : vector<2x128xf32>
    %26 = math.exp %25 : vector<2x128xf32>
    %cst_11 = arith.constant 1.000000e+00 : f32
    %27 = vector.broadcast %cst_11 : f32 to vector<2x128xf32>
    %28 = arith.addf %27, %26 : vector<2x128xf32>
    %29 = arith.divf %27, %28 : vector<2x128xf32>
    %30 = vector.extract_strided_slice %14 {offsets = [0, 256], sizes = [2, 128], strides = [1, 1]} : vector<2x384xf32> to vector<2x128xf32>
    %31 = math.tanh %30 : vector<2x128xf32>
    %32 = arith.mulf %29, %7 : vector<2x128xf32>
    %33 = arith.mulf %23, %31 : vector<2x128xf32>
    %34 = arith.addf %32, %33 : vector<2x128xf32>
    %35 = arith.negf %17 : vector<2x128xf32>
    %36 = math.exp %35 : vector<2x128xf32>
    %cst_12 = arith.constant 1.000000e+00 : f32
    %37 = vector.broadcast %cst_12 : f32 to vector<2x128xf32>
    %38 = arith.addf %37, %36 : vector<2x128xf32>
    %39 = arith.divf %37, %38 : vector<2x128xf32>
    %40 = math.tanh %34 : vector<2x128xf32>
    %41 = arith.mulf %39, %40 : vector<2x128xf32>
    %42 = arith.truncf %41 : vector<2x128xf32> to vector<2x128xbf16>
    %43 = arith.index_cast %c0_i32_6 : i32 to index
    %c0_13 = arith.constant 0 : index
    %c0_14 = arith.constant 0 : index
    %44 = vector.load %arg3[%43, %c0_13, %c0_14] : memref<8x2x128xbf16, #tpu.memory_space<vmem>>, vector<1x2x128xbf16>
    %45 = vector.shape_cast %44 : vector<1x2x128xbf16> to vector<2x128xbf16>
    %46 = vector.shape_cast %42 : vector<2x128xbf16> to vector<1x2x128xbf16>
    tpu.vector_store %arg3[%43, %c0_13, %c0_14], %46 {strides = array<i32>} : memref<8x2x128xbf16, #tpu.memory_space<vmem>>, vector<1x2x128xbf16>,
    %c1_i32 = arith.constant 1 : i32
    %47 = arith.truncf %41 : vector<2x128xf32> to vector<2x128xbf16>
    %48 = arith.index_cast %c1_i32 : i32 to index
    %c0_15 = arith.constant 0 : index
    %c0_16 = arith.constant 0 : index
    %49 = vector.load %arg1[%48, %c0_15, %c0_16] : memref<8x2x512xf32, #tpu.memory_space<vmem>>, vector<1x2x512xf32>
    %50 = vector.shape_cast %49 : vector<1x2x512xf32> to vector<2x512xf32>
    %51 = vector.extract_strided_slice %50 {offsets = [0, 0], sizes = [2, 384], strides = [1, 1]} : vector<2x512xf32> to vector<2x384xf32>
    %cst_17 = arith.constant dense<0.000000e+00> : vector<2x384xf32>
    %52 = tpu.matmul %47, %4, %cst_17 {dimension_numbers = #tpu.dot_dimension_numbers<[1], [0], [0], [1], [0, 0, 1, 1], [], []>} : vector<2x128xbf16>, vector<128x384xbf16>, vector<2x384xf32> -> vector<2x384xf32>
    %53 = arith.addf %51, %52 : vector<2x384xf32>
    %54 = vector.extract_strided_slice %50 {offsets = [0, 384], sizes = [2, 128], strides = [1, 1]} : vector<2x512xf32> to vector<2x128xf32>
    %cst_18 = arith.constant dense<0.000000e+00> : vector<2x128xf32>
    %55 = tpu.matmul %47, %5, %cst_18 {dimension_numbers = #tpu.dot_dimension_numbers<[1], [0], [0], [1], [0, 0, 1, 1], [], []>} : vector<2x128xbf16>, vector<128x128xbf16>, vector<2x128xf32> -> vector<2x128xf32>
    %56 = arith.addf %54, %55 : vector<2x128xf32>
    %57 = vector.extract_strided_slice %53 {offsets = [0, 0], sizes = [2, 128], strides = [1, 1]} : vector<2x384xf32> to vector<2x128xf32>
    %58 = arith.negf %57 : vector<2x128xf32>
    %59 = math.exp %58 : vector<2x128xf32>
    %cst_19 = arith.constant 1.000000e+00 : f32
    %60 = vector.broadcast %cst_19 : f32 to vector<2x128xf32>
    %61 = arith.addf %60, %59 : vector<2x128xf32>
    %62 = arith.divf %60, %61 : vector<2x128xf32>
    %63 = vector.extract_strided_slice %53 {offsets = [0, 128], sizes = [2, 128], strides = [1, 1]} : vector<2x384xf32> to vector<2x128xf32>
    %64 = arith.negf %63 : vector<2x128xf32>
    %65 = math.exp %64 : vector<2x128xf32>
    %cst_20 = arith.constant 1.000000e+00 : f32
    %66 = vector.broadcast %cst_20 : f32 to vector<2x128xf32>
    %67 = arith.addf %66, %65 : vector<2x128xf32>
    %68 = arith.divf %66, %67 : vector<2x128xf32>
    %69 = vector.extract_strided_slice %53 {offsets = [0, 256], sizes = [2, 128], strides = [1, 1]} : vector<2x384xf32> to vector<2x128xf32>
    %70 = math.tanh %69 : vector<2x128xf32>
    %71 = arith.mulf %68, %34 : vector<2x128xf32>
    %72 = arith.mulf %62, %70 : vector<2x128xf32>
    %73 = arith.addf %71, %72 : vector<2x128xf32>
    %74 = arith.negf %56 : vector<2x128xf32>
    %75 = math.exp %74 : vector<2x128xf32>
    %cst_21 = arith.constant 1.000000e+00 : f32
    %76 = vector.broadcast %cst_21 : f32 to vector<2x128xf32>
    %77 = arith.addf %76, %75 : vector<2x128xf32>
    %78 = arith.divf %76, %77 : vector<2x128xf32>
    %79 = math.tanh %73 : vector<2x128xf32>
    %80 = arith.mulf %78, %79 : vector<2x128xf32>
    %81 = arith.truncf %80 : vector<2x128xf32> to vector<2x128xbf16>
    %82 = arith.index_cast %c1_i32 : i32 to index
    %c0_22 = arith.constant 0 : index
    %c0_23 = arith.constant 0 : index
    %83 = vector.load %arg3[%82, %c0_22, %c0_23] : memref<8x2x128xbf16, #tpu.memory_space<vmem>>, vector<1x2x128xbf16>
    %84 = vector.shape_cast %83 : vector<1x2x128xbf16> to vector<2x128xbf16>
    %85 = vector.shape_cast %81 : vector<2x128xbf16> to vector<1x2x128xbf16>
    tpu.vector_store %arg3[%82, %c0_22, %c0_23], %85 {strides = array<i32>} : memref<8x2x128xbf16, #tpu.memory_space<vmem>>, vector<1x2x128xbf16>,
    %c2_i32 = arith.constant 2 : i32
    %86 = arith.truncf %80 : vector<2x128xf32> to vector<2x128xbf16>
    %87 = arith.index_cast %c2_i32 : i32 to index
    %c0_24 = arith.constant 0 : index
    %c0_25 = arith.constant 0 : index
    %88 = vector.load %arg1[%87, %c0_24, %c0_25] : memref<8x2x512xf32, #tpu.memory_space<vmem>>, vector<1x2x512xf32>
    %89 = vector.shape_cast %88 : vector<1x2x512xf32> to vector<2x512xf32>
    %90 = vector.extract_strided_slice %89 {offsets = [0, 0], sizes = [2, 384], strides = [1, 1]} : vector<2x512xf32> to vector<2x384xf32>
    %cst_26 = arith.constant dense<0.000000e+00> : vector<2x384xf32>
    %91 = tpu.matmul %86, %4, %cst_26 {dimension_numbers = #tpu.dot_dimension_numbers<[1], [0], [0], [1], [0, 0, 1, 1], [], []>} : vector<2x128xbf16>, vector<128x384xbf16>, vector<2x384xf32> -> vector<2x384xf32>
    %92 = arith.addf %90, %91 : vector<2x384xf32>
    %93 = vector.extract_strided_slice %89 {offsets = [0, 384], sizes = [2, 128], strides = [1, 1]} : vector<2x512xf32> to vector<2x128xf32>
    %cst_27 = arith.constant dense<0.000000e+00> : vector<2x128xf32>
    %94 = tpu.matmul %86, %5, %cst_27 {dimension_numbers = #tpu.dot_dimension_numbers<[1], [0], [0], [1], [0, 0, 1, 1], [], []>} : vector<2x128xbf16>, vector<128x128xbf16>, vector<2x128xf32> -> vector<2x128xf32>
    %95 = arith.addf %93, %94 : vector<2x128xf32>
    %96 = vector.extract_strided_slice %92 {offsets = [0, 0], sizes = [2, 128], strides = [1, 1]} : vector<2x384xf32> to vector<2x128xf32>
    %97 = arith.negf %96 : vector<2x128xf32>
    %98 = math.exp %97 : vector<2x128xf32>
    %cst_28 = arith.constant 1.000000e+00 : f32
    %99 = vector.broadcast %cst_28 : f32 to vector<2x128xf32>
    %100 = arith.addf %99, %98 : vector<2x128xf32>
    %101 = arith.divf %99, %100 : vector<2x128xf32>
    %102 = vector.extract_strided_slice %92 {offsets = [0, 128], sizes = [2, 128], strides = [1, 1]} : vector<2x384xf32> to vector<2x128xf32>
    %103 = arith.negf %102 : vector<2x128xf32>
    %104 = math.exp %103 : vector<2x128xf32>
    %cst_29 = arith.constant 1.000000e+00 : f32
    %105 = vector.broadcast %cst_29 : f32 to vector<2x128xf32>
    %106 = arith.addf %105, %104 : vector<2x128xf32>
    %107 = arith.divf %105, %106 : vector<2x128xf32>
    %108 = vector.extract_strided_slice %92 {offsets = [0, 256], sizes = [2, 128], strides = [1, 1]} : vector<2x384xf32> to vector<2x128xf32>
    %109 = math.tanh %108 : vector<2x128xf32>
    %110 = arith.mulf %107, %73 : vector<2x128xf32>
    %111 = arith.mulf %101, %109 : vector<2x128xf32>
    %112 = arith.addf %110, %111 : vector<2x128xf32>
    %113 = arith.negf %95 : vector<2x128xf32>
    %114 = math.exp %113 : vector<2x128xf32>
    %cst_30 = arith.constant 1.000000e+00 : f32
    %115 = vector.broadcast %cst_30 : f32 to vector<2x128xf32>
    %116 = arith.addf %115, %114 : vector<2x128xf32>
    %117 = arith.divf %115, %116 : vector<2x128xf32>
    %118 = math.tanh %112 : vector<2x128xf32>
    %119 = arith.mulf %117, %118 : vector<2x128xf32>
    %120 = arith.truncf %119 : vector<2x128xf32> to vector<2x128xbf16>
    %121 = arith.index_cast %c2_i32 : i32 to index
    %c0_31 = arith.constant 0 : index
    %c0_32 = arith.constant 0 : index
    %122 = vector.load %arg3[%121, %c0_31, %c0_32] : memref<8x2x128xbf16, #tpu.memory_space<vmem>>, vector<1x2x128xbf16>
    %123 = vector.shape_cast %122 : vector<1x2x128xbf16> to vector<2x128xbf16>
    %124 = vector.shape_cast %120 : vector<2x128xbf16> to vector<1x2x128xbf16>
    tpu.vector_store %arg3[%121, %c0_31, %c0_32], %124 {strides = array<i32>} : memref<8x2x128xbf16, #tpu.memory_space<vmem>>, vector<1x2x128xbf16>,
    %c3_i32 = arith.constant 3 : i32
    %125 = arith.truncf %119 : vector<2x128xf32> to vector<2x128xbf16>
    %126 = arith.index_cast %c3_i32 : i32 to index
    %c0_33 = arith.constant 0 : index
    %c0_34 = arith.constant 0 : index
    %127 = vector.load %arg1[%126, %c0_33, %c0_34] : memref<8x2x512xf32, #tpu.memory_space<vmem>>, vector<1x2x512xf32>
    %128 = vector.shape_cast %127 : vector<1x2x512xf32> to vector<2x512xf32>
    %129 = vector.extract_strided_slice %128 {offsets = [0, 0], sizes = [2, 384], strides = [1, 1]} : vector<2x512xf32> to vector<2x384xf32>
    %cst_35 = arith.constant dense<0.000000e+00> : vector<2x384xf32>
    %130 = tpu.matmul %125, %4, %cst_35 {dimension_numbers = #tpu.dot_dimension_numbers<[1], [0], [0], [1], [0, 0, 1, 1], [], []>} : vector<2x128xbf16>, vector<128x384xbf16>, vector<2x384xf32> -> vector<2x384xf32>
    %131 = arith.addf %129, %130 : vector<2x384xf32>
    %132 = vector.extract_strided_slice %128 {offsets = [0, 384], sizes = [2, 128], strides = [1, 1]} : vector<2x512xf32> to vector<2x128xf32>
    %cst_36 = arith.constant dense<0.000000e+00> : vector<2x128xf32>
    %133 = tpu.matmul %125, %5, %cst_36 {dimension_numbers = #tpu.dot_dimension_numbers<[1], [0], [0], [1], [0, 0, 1, 1], [], []>} : vector<2x128xbf16>, vector<128x128xbf16>, vector<2x128xf32> -> vector<2x128xf32>
    %134 = arith.addf %132, %133 : vector<2x128xf32>
    %135 = vector.extract_strided_slice %131 {offsets = [0, 0], sizes = [2, 128], strides = [1, 1]} : vector<2x384xf32> to vector<2x128xf32>
    %136 = arith.negf %135 : vector<2x128xf32>
    %137 = math.exp %136 : vector<2x128xf32>
    %cst_37 = arith.constant 1.000000e+00 : f32
    %138 = vector.broadcast %cst_37 : f32 to vector<2x128xf32>
    %139 = arith.addf %138, %137 : vector<2x128xf32>
    %140 = arith.divf %138, %139 : vector<2x128xf32>
    %141 = vector.extract_strided_slice %131 {offsets = [0, 128], sizes = [2, 128], strides = [1, 1]} : vector<2x384xf32> to vector<2x128xf32>
    %142 = arith.negf %141 : vector<2x128xf32>
    %143 = math.exp %142 : vector<2x128xf32>
    %cst_38 = arith.constant 1.000000e+00 : f32
    %144 = vector.broadcast %cst_38 : f32 to vector<2x128xf32>
    %145 = arith.addf %144, %143 : vector<2x128xf32>
    %146 = arith.divf %144, %145 : vector<2x128xf32>
    %147 = vector.extract_strided_slice %131 {offsets = [0, 256], sizes = [2, 128], strides = [1, 1]} : vector<2x384xf32> to vector<2x128xf32>
    %148 = math.tanh %147 : vector<2x128xf32>
    %149 = arith.mulf %146, %112 : vector<2x128xf32>
    %150 = arith.mulf %140, %148 : vector<2x128xf32>
    %151 = arith.addf %149, %150 : vector<2x128xf32>
    %152 = arith.negf %134 : vector<2x128xf32>
    %153 = math.exp %152 : vector<2x128xf32>
    %cst_39 = arith.constant 1.000000e+00 : f32
    %154 = vector.broadcast %cst_39 : f32 to vector<2x128xf32>
    %155 = arith.addf %154, %153 : vector<2x128xf32>
    %156 = arith.divf %154, %155 : vector<2x128xf32>
    %157 = math.tanh %151 : vector<2x128xf32>
    %158 = arith.mulf %156, %157 : vector<2x128xf32>
    %159 = arith.truncf %158 : vector<2x128xf32> to vector<2x128xbf16>
    %160 = arith.index_cast %c3_i32 : i32 to index
    %c0_40 = arith.constant 0 : index
    %c0_41 = arith.constant 0 : index
    %161 = vector.load %arg3[%160, %c0_40, %c0_41] : memref<8x2x128xbf16, #tpu.memory_space<vmem>>, vector<1x2x128xbf16>
    %162 = vector.shape_cast %161 : vector<1x2x128xbf16> to vector<2x128xbf16>
    %163 = vector.shape_cast %159 : vector<2x128xbf16> to vector<1x2x128xbf16>
    tpu.vector_store %arg3[%160, %c0_40, %c0_41], %163 {strides = array<i32>} : memref<8x2x128xbf16, #tpu.memory_space<vmem>>, vector<1x2x128xbf16>,
    %c4_i32 = arith.constant 4 : i32
    %164 = arith.truncf %158 : vector<2x128xf32> to vector<2x128xbf16>
    %165 = arith.index_cast %c4_i32 : i32 to index
    %c0_42 = arith.constant 0 : index
    %c0_43 = arith.constant 0 : index
    %166 = vector.load %arg1[%165, %c0_42, %c0_43] : memref<8x2x512xf32, #tpu.memory_space<vmem>>, vector<1x2x512xf32>
    %167 = vector.shape_cast %166 : vector<1x2x512xf32> to vector<2x512xf32>
    %168 = vector.extract_strided_slice %167 {offsets = [0, 0], sizes = [2, 384], strides = [1, 1]} : vector<2x512xf32> to vector<2x384xf32>
    %cst_44 = arith.constant dense<0.000000e+00> : vector<2x384xf32>
    %169 = tpu.matmul %164, %4, %cst_44 {dimension_numbers = #tpu.dot_dimension_numbers<[1], [0], [0], [1], [0, 0, 1, 1], [], []>} : vector<2x128xbf16>, vector<128x384xbf16>, vector<2x384xf32> -> vector<2x384xf32>
    %170 = arith.addf %168, %169 : vector<2x384xf32>
    %171 = vector.extract_strided_slice %167 {offsets = [0, 384], sizes = [2, 128], strides = [1, 1]} : vector<2x512xf32> to vector<2x128xf32>
    %cst_45 = arith.constant dense<0.000000e+00> : vector<2x128xf32>
    %172 = tpu.matmul %164, %5, %cst_45 {dimension_numbers = #tpu.dot_dimension_numbers<[1], [0], [0], [1], [0, 0, 1, 1], [], []>} : vector<2x128xbf16>, vector<128x128xbf16>, vector<2x128xf32> -> vector<2x128xf32>
    %173 = arith.addf %171, %172 : vector<2x128xf32>
    %174 = vector.extract_strided_slice %170 {offsets = [0, 0], sizes = [2, 128], strides = [1, 1]} : vector<2x384xf32> to vector<2x128xf32>
    %175 = arith.negf %174 : vector<2x128xf32>
    %176 = math.exp %175 : vector<2x128xf32>
    %cst_46 = arith.constant 1.000000e+00 : f32
    %177 = vector.broadcast %cst_46 : f32 to vector<2x128xf32>
    %178 = arith.addf %177, %176 : vector<2x128xf32>
    %179 = arith.divf %177, %178 : vector<2x128xf32>
    %180 = vector.extract_strided_slice %170 {offsets = [0, 128], sizes = [2, 128], strides = [1, 1]} : vector<2x384xf32> to vector<2x128xf32>
    %181 = arith.negf %180 : vector<2x128xf32>
    %182 = math.exp %181 : vector<2x128xf32>
    %cst_47 = arith.constant 1.000000e+00 : f32
    %183 = vector.broadcast %cst_47 : f32 to vector<2x128xf32>
    %184 = arith.addf %183, %182 : vector<2x128xf32>
    %185 = arith.divf %183, %184 : vector<2x128xf32>
    %186 = vector.extract_strided_slice %170 {offsets = [0, 256], sizes = [2, 128], strides = [1, 1]} : vector<2x384xf32> to vector<2x128xf32>
    %187 = math.tanh %186 : vector<2x128xf32>
    %188 = arith.mulf %185, %151 : vector<2x128xf32>
    %189 = arith.mulf %179, %187 : vector<2x128xf32>
    %190 = arith.addf %188, %189 : vector<2x128xf32>
    %191 = arith.negf %173 : vector<2x128xf32>
    %192 = math.exp %191 : vector<2x128xf32>
    %cst_48 = arith.constant 1.000000e+00 : f32
    %193 = vector.broadcast %cst_48 : f32 to vector<2x128xf32>
    %194 = arith.addf %193, %192 : vector<2x128xf32>
    %195 = arith.divf %193, %194 : vector<2x128xf32>
    %196 = math.tanh %190 : vector<2x128xf32>
    %197 = arith.mulf %195, %196 : vector<2x128xf32>
    %198 = arith.truncf %197 : vector<2x128xf32> to vector<2x128xbf16>
    %199 = arith.index_cast %c4_i32 : i32 to index
    %c0_49 = arith.constant 0 : index
    %c0_50 = arith.constant 0 : index
    %200 = vector.load %arg3[%199, %c0_49, %c0_50] : memref<8x2x128xbf16, #tpu.memory_space<vmem>>, vector<1x2x128xbf16>
    %201 = vector.shape_cast %200 : vector<1x2x128xbf16> to vector<2x128xbf16>
    %202 = vector.shape_cast %198 : vector<2x128xbf16> to vector<1x2x128xbf16>
    tpu.vector_store %arg3[%199, %c0_49, %c0_50], %202 {strides = array<i32>} : memref<8x2x128xbf16, #tpu.memory_space<vmem>>, vector<1x2x128xbf16>,
    %c5_i32 = arith.constant 5 : i32
    %203 = arith.truncf %197 : vector<2x128xf32> to vector<2x128xbf16>
    %204 = arith.index_cast %c5_i32 : i32 to index
    %c0_51 = arith.constant 0 : index
    %c0_52 = arith.constant 0 : index
    %205 = vector.load %arg1[%204, %c0_51, %c0_52] : memref<8x2x512xf32, #tpu.memory_space<vmem>>, vector<1x2x512xf32>
    %206 = vector.shape_cast %205 : vector<1x2x512xf32> to vector<2x512xf32>
    %207 = vector.extract_strided_slice %206 {offsets = [0, 0], sizes = [2, 384], strides = [1, 1]} : vector<2x512xf32> to vector<2x384xf32>
    %cst_53 = arith.constant dense<0.000000e+00> : vector<2x384xf32>
    %208 = tpu.matmul %203, %4, %cst_53 {dimension_numbers = #tpu.dot_dimension_numbers<[1], [0], [0], [1], [0, 0, 1, 1], [], []>} : vector<2x128xbf16>, vector<128x384xbf16>, vector<2x384xf32> -> vector<2x384xf32>
    %209 = arith.addf %207, %208 : vector<2x384xf32>
    %210 = vector.extract_strided_slice %206 {offsets = [0, 384], sizes = [2, 128], strides = [1, 1]} : vector<2x512xf32> to vector<2x128xf32>
    %cst_54 = arith.constant dense<0.000000e+00> : vector<2x128xf32>
    %211 = tpu.matmul %203, %5, %cst_54 {dimension_numbers = #tpu.dot_dimension_numbers<[1], [0], [0], [1], [0, 0, 1, 1], [], []>} : vector<2x128xbf16>, vector<128x128xbf16>, vector<2x128xf32> -> vector<2x128xf32>
    %212 = arith.addf %210, %211 : vector<2x128xf32>
    %213 = vector.extract_strided_slice %209 {offsets = [0, 0], sizes = [2, 128], strides = [1, 1]} : vector<2x384xf32> to vector<2x128xf32>
    %214 = arith.negf %213 : vector<2x128xf32>
    %215 = math.exp %214 : vector<2x128xf32>
    %cst_55 = arith.constant 1.000000e+00 : f32
    %216 = vector.broadcast %cst_55 : f32 to vector<2x128xf32>
    %217 = arith.addf %216, %215 : vector<2x128xf32>
    %218 = arith.divf %216, %217 : vector<2x128xf32>
    %219 = vector.extract_strided_slice %209 {offsets = [0, 128], sizes = [2, 128], strides = [1, 1]} : vector<2x384xf32> to vector<2x128xf32>
    %220 = arith.negf %219 : vector<2x128xf32>
    %221 = math.exp %220 : vector<2x128xf32>
    %cst_56 = arith.constant 1.000000e+00 : f32
    %222 = vector.broadcast %cst_56 : f32 to vector<2x128xf32>
    %223 = arith.addf %222, %221 : vector<2x128xf32>
    %224 = arith.divf %222, %223 : vector<2x128xf32>
    %225 = vector.extract_strided_slice %209 {offsets = [0, 256], sizes = [2, 128], strides = [1, 1]} : vector<2x384xf32> to vector<2x128xf32>
    %226 = math.tanh %225 : vector<2x128xf32>
    %227 = arith.mulf %224, %190 : vector<2x128xf32>
    %228 = arith.mulf %218, %226 : vector<2x128xf32>
    %229 = arith.addf %227, %228 : vector<2x128xf32>
    %230 = arith.negf %212 : vector<2x128xf32>
    %231 = math.exp %230 : vector<2x128xf32>
    %cst_57 = arith.constant 1.000000e+00 : f32
    %232 = vector.broadcast %cst_57 : f32 to vector<2x128xf32>
    %233 = arith.addf %232, %231 : vector<2x128xf32>
    %234 = arith.divf %232, %233 : vector<2x128xf32>
    %235 = math.tanh %229 : vector<2x128xf32>
    %236 = arith.mulf %234, %235 : vector<2x128xf32>
    %237 = arith.truncf %236 : vector<2x128xf32> to vector<2x128xbf16>
    %238 = arith.index_cast %c5_i32 : i32 to index
    %c0_58 = arith.constant 0 : index
    %c0_59 = arith.constant 0 : index
    %239 = vector.load %arg3[%238, %c0_58, %c0_59] : memref<8x2x128xbf16, #tpu.memory_space<vmem>>, vector<1x2x128xbf16>
    %240 = vector.shape_cast %239 : vector<1x2x128xbf16> to vector<2x128xbf16>
    %241 = vector.shape_cast %237 : vector<2x128xbf16> to vector<1x2x128xbf16>
    tpu.vector_store %arg3[%238, %c0_58, %c0_59], %241 {strides = array<i32>} : memref<8x2x128xbf16, #tpu.memory_space<vmem>>, vector<1x2x128xbf16>,
    %c6_i32 = arith.constant 6 : i32
    %242 = arith.truncf %236 : vector<2x128xf32> to vector<2x128xbf16>
    %243 = arith.index_cast %c6_i32 : i32 to index
    %c0_60 = arith.constant 0 : index
    %c0_61 = arith.constant 0 : index
    %244 = vector.load %arg1[%243, %c0_60, %c0_61] : memref<8x2x512xf32, #tpu.memory_space<vmem>>, vector<1x2x512xf32>
    %245 = vector.shape_cast %244 : vector<1x2x512xf32> to vector<2x512xf32>
    %246 = vector.extract_strided_slice %245 {offsets = [0, 0], sizes = [2, 384], strides = [1, 1]} : vector<2x512xf32> to vector<2x384xf32>
    %cst_62 = arith.constant dense<0.000000e+00> : vector<2x384xf32>
    %247 = tpu.matmul %242, %4, %cst_62 {dimension_numbers = #tpu.dot_dimension_numbers<[1], [0], [0], [1], [0, 0, 1, 1], [], []>} : vector<2x128xbf16>, vector<128x384xbf16>, vector<2x384xf32> -> vector<2x384xf32>
    %248 = arith.addf %246, %247 : vector<2x384xf32>
    %249 = vector.extract_strided_slice %245 {offsets = [0, 384], sizes = [2, 128], strides = [1, 1]} : vector<2x512xf32> to vector<2x128xf32>
    %cst_63 = arith.constant dense<0.000000e+00> : vector<2x128xf32>
    %250 = tpu.matmul %242, %5, %cst_63 {dimension_numbers = #tpu.dot_dimension_numbers<[1], [0], [0], [1], [0, 0, 1, 1], [], []>} : vector<2x128xbf16>, vector<128x128xbf16>, vector<2x128xf32> -> vector<2x128xf32>
    %251 = arith.addf %249, %250 : vector<2x128xf32>
    %252 = vector.extract_strided_slice %248 {offsets = [0, 0], sizes = [2, 128], strides = [1, 1]} : vector<2x384xf32> to vector<2x128xf32>
    %253 = arith.negf %252 : vector<2x128xf32>
    %254 = math.exp %253 : vector<2x128xf32>
    %cst_64 = arith.constant 1.000000e+00 : f32
    %255 = vector.broadcast %cst_64 : f32 to vector<2x128xf32>
    %256 = arith.addf %255, %254 : vector<2x128xf32>
    %257 = arith.divf %255, %256 : vector<2x128xf32>
    %258 = vector.extract_strided_slice %248 {offsets = [0, 128], sizes = [2, 128], strides = [1, 1]} : vector<2x384xf32> to vector<2x128xf32>
    %259 = arith.negf %258 : vector<2x128xf32>
    %260 = math.exp %259 : vector<2x128xf32>
    %cst_65 = arith.constant 1.000000e+00 : f32
    %261 = vector.broadcast %cst_65 : f32 to vector<2x128xf32>
    %262 = arith.addf %261, %260 : vector<2x128xf32>
    %263 = arith.divf %261, %262 : vector<2x128xf32>
    %264 = vector.extract_strided_slice %248 {offsets = [0, 256], sizes = [2, 128], strides = [1, 1]} : vector<2x384xf32> to vector<2x128xf32>
    %265 = math.tanh %264 : vector<2x128xf32>
    %266 = arith.mulf %263, %229 : vector<2x128xf32>
    %267 = arith.mulf %257, %265 : vector<2x128xf32>
    %268 = arith.addf %266, %267 : vector<2x128xf32>
    %269 = arith.negf %251 : vector<2x128xf32>
    %270 = math.exp %269 : vector<2x128xf32>
    %cst_66 = arith.constant 1.000000e+00 : f32
    %271 = vector.broadcast %cst_66 : f32 to vector<2x128xf32>
    %272 = arith.addf %271, %270 : vector<2x128xf32>
    %273 = arith.divf %271, %272 : vector<2x128xf32>
    %274 = math.tanh %268 : vector<2x128xf32>
    %275 = arith.mulf %273, %274 : vector<2x128xf32>
    %276 = arith.truncf %275 : vector<2x128xf32> to vector<2x128xbf16>
    %277 = arith.index_cast %c6_i32 : i32 to index
    %c0_67 = arith.constant 0 : index
    %c0_68 = arith.constant 0 : index
    %278 = vector.load %arg3[%277, %c0_67, %c0_68] : memref<8x2x128xbf16, #tpu.memory_space<vmem>>, vector<1x2x128xbf16>
    %279 = vector.shape_cast %278 : vector<1x2x128xbf16> to vector<2x128xbf16>
    %280 = vector.shape_cast %276 : vector<2x128xbf16> to vector<1x2x128xbf16>
    tpu.vector_store %arg3[%277, %c0_67, %c0_68], %280 {strides = array<i32>} : memref<8x2x128xbf16, #tpu.memory_space<vmem>>, vector<1x2x128xbf16>,
    %c7_i32 = arith.constant 7 : i32
    %281 = arith.truncf %275 : vector<2x128xf32> to vector<2x128xbf16>
    %282 = arith.index_cast %c7_i32 : i32 to index
    %c0_69 = arith.constant 0 : index
    %c0_70 = arith.constant 0 : index
    %283 = vector.load %arg1[%282, %c0_69, %c0_70] : memref<8x2x512xf32, #tpu.memory_space<vmem>>, vector<1x2x512xf32>
    %284 = vector.shape_cast %283 : vector<1x2x512xf32> to vector<2x512xf32>
    %285 = vector.extract_strided_slice %284 {offsets = [0, 0], sizes = [2, 384], strides = [1, 1]} : vector<2x512xf32> to vector<2x384xf32>
    %cst_71 = arith.constant dense<0.000000e+00> : vector<2x384xf32>
    %286 = tpu.matmul %281, %4, %cst_71 {dimension_numbers = #tpu.dot_dimension_numbers<[1], [0], [0], [1], [0, 0, 1, 1], [], []>} : vector<2x128xbf16>, vector<128x384xbf16>, vector<2x384xf32> -> vector<2x384xf32>
    %287 = arith.addf %285, %286 : vector<2x384xf32>
    %288 = vector.extract_strided_slice %284 {offsets = [0, 384], sizes = [2, 128], strides = [1, 1]} : vector<2x512xf32> to vector<2x128xf32>
    %cst_72 = arith.constant dense<0.000000e+00> : vector<2x128xf32>
    %289 = tpu.matmul %281, %5, %cst_72 {dimension_numbers = #tpu.dot_dimension_numbers<[1], [0], [0], [1], [0, 0, 1, 1], [], []>} : vector<2x128xbf16>, vector<128x128xbf16>, vector<2x128xf32> -> vector<2x128xf32>
    %290 = arith.addf %288, %289 : vector<2x128xf32>
    %291 = vector.extract_strided_slice %287 {offsets = [0, 0], sizes = [2, 128], strides = [1, 1]} : vector<2x384xf32> to vector<2x128xf32>
    %292 = arith.negf %291 : vector<2x128xf32>
    %293 = math.exp %292 : vector<2x128xf32>
    %cst_73 = arith.constant 1.000000e+00 : f32
    %294 = vector.broadcast %cst_73 : f32 to vector<2x128xf32>
    %295 = arith.addf %294, %293 : vector<2x128xf32>
    %296 = arith.divf %294, %295 : vector<2x128xf32>
    %297 = vector.extract_strided_slice %287 {offsets = [0, 128], sizes = [2, 128], strides = [1, 1]} : vector<2x384xf32> to vector<2x128xf32>
    %298 = arith.negf %297 : vector<2x128xf32>
    %299 = math.exp %298 : vector<2x128xf32>
    %cst_74 = arith.constant 1.000000e+00 : f32
    %300 = vector.broadcast %cst_74 : f32 to vector<2x128xf32>
    %301 = arith.addf %300, %299 : vector<2x128xf32>
    %302 = arith.divf %300, %301 : vector<2x128xf32>
    %303 = vector.extract_strided_slice %287 {offsets = [0, 256], sizes = [2, 128], strides = [1, 1]} : vector<2x384xf32> to vector<2x128xf32>
    %304 = math.tanh %303 : vector<2x128xf32>
    %305 = arith.mulf %302, %268 : vector<2x128xf32>
    %306 = arith.mulf %296, %304 : vector<2x128xf32>
    %307 = arith.addf %305, %306 : vector<2x128xf32>
    %308 = arith.negf %290 : vector<2x128xf32>
    %309 = math.exp %308 : vector<2x128xf32>
    %cst_75 = arith.constant 1.000000e+00 : f32
    %310 = vector.broadcast %cst_75 : f32 to vector<2x128xf32>
    %311 = arith.addf %310, %309 : vector<2x128xf32>
    %312 = arith.divf %310, %311 : vector<2x128xf32>
    %313 = math.tanh %307 : vector<2x128xf32>
    %314 = arith.mulf %312, %313 : vector<2x128xf32>
    %315 = arith.truncf %314 : vector<2x128xf32> to vector<2x128xbf16>
    %316 = arith.index_cast %c7_i32 : i32 to index
    %c0_76 = arith.constant 0 : index
    %c0_77 = arith.constant 0 : index
    %317 = vector.load %arg3[%316, %c0_76, %c0_77] : memref<8x2x128xbf16, #tpu.memory_space<vmem>>, vector<1x2x128xbf16>
    %318 = vector.shape_cast %317 : vector<1x2x128xbf16> to vector<2x128xbf16>
    %319 = vector.shape_cast %315 : vector<2x128xbf16> to vector<1x2x128xbf16>
    tpu.vector_store %arg3[%316, %c0_76, %c0_77], %319 {strides = array<i32>} : memref<8x2x128xbf16, #tpu.memory_space<vmem>>, vector<1x2x128xbf16>,
    %c8_i32 = arith.constant 8 : i32
    %c0_78 = arith.constant 0 : index
    %c0_79 = arith.constant 0 : index
    %320 = vector.load %arg4[%c0_78, %c0_79] : memref<2x128xf32, #tpu.memory_space<vmem>>, vector<2x128xf32>
    tpu.vector_store %arg4[%c0_78, %c0_79], %314 {strides = array<i32>} : memref<2x128xf32, #tpu.memory_space<vmem>>, vector<2x128xf32>,
    %c0_80 = arith.constant 0 : index
    %c0_81 = arith.constant 0 : index
    %321 = vector.load %arg5[%c0_80, %c0_81] : memref<2x128xf32, #tpu.memory_space<vmem>>, vector<2x128xf32>
    tpu.vector_store %arg5[%c0_80, %c0_81], %307 {strides = array<i32>} : memref<2x128xf32, #tpu.memory_space<vmem>>, vector<2x128xf32>,
    return
  }
  func.func @transform_0(%arg0: i32) -> (i32, i32, i32) {
    %c0_i32 = arith.constant 0 : i32
    %c0_i32_0 = arith.constant 0 : i32
    %c0_i32_1 = arith.constant 0 : i32
    return %arg0, %c0_i32, %c0_i32_0 : i32, i32, i32
  }
  func.func @transform_1(%arg0: i32) -> (i32, i32) {
    %c0_i32 = arith.constant 0 : i32
    %c0_i32_0 = arith.constant 0 : i32
    %c0_i32_1 = arith.constant 0 : i32
    return %c0_i32, %c0_i32_0 : i32, i32
  }
  func.func @transform_2(%arg0: i32) -> (i32, i32, i32) {
    %c0_i32 = arith.constant 0 : i32
    %c0_i32_0 = arith.constant 0 : i32
    %c0_i32_1 = arith.constant 0 : i32
    return %arg0, %c0_i32, %c0_i32_0 : i32, i32, i32
  }
}

module attributes {stable_mosaic.version = 11 : i64} {
  func.func @_lstm_recurrent_kernel(%arg0: i32, %arg1: memref<8x2x512xf32, #tpu.memory_space<vmem>>, %arg2: memref<128x512xbf16, #tpu.memory_space<vmem>>, %arg3: memref<8x2x128xbf16, #tpu.memory_space<vmem>>, %arg4: memref<2x128xf32, #tpu.memory_space<vmem>>, %arg5: memref<2x128xf32, #tpu.memory_space<vmem>>) attributes {dimension_semantics = [#tpu.dimension_semantics<arbitrary>], iteration_bounds = array<i64: 1>, scalar_prefetch = 0 : i64, scratch_operands = 2 : i64, tpu.core_type = #tpu.core_type<tc>, window_params = [{transform_indices = @transform_0, window_bounds = array<i64: 8, 2, 512>}, {pipeline_mode = #tpu.pipeline_mode<synchronous>, transform_indices = @transform_1, window_bounds = array<i64: 128, 512>}, {transform_indices = @transform_2, window_bounds = array<i64: 8, 2, 128>}]} {
    %c0_i32 = arith.constant 0 : i32
    %0 = arith.cmpi eq, %arg0, %c0_i32 : i32
    %1 = arith.extui %0 : i1 to i32
    %c0_i32_0 = arith.constant 0 : i32
    %2 = arith.cmpi ne, %1, %c0_i32_0 : i32
    scf.if %2 {
      %cst_82 = arith.constant 0.000000e+00 : f32
      %322 = vector.broadcast %cst_82 : f32 to vector<2x128xf32>
      %c0_83 = arith.constant 0 : index
      %c0_84 = arith.constant 0 : index
      %323 = vector.load %arg4[%c0_83, %c0_84] : memref<2x128xf32, #tpu.memory_space<vmem>>, vector<2x128xf32>
      tpu.vector_store %arg4[%c0_83, %c0_84], %322 {strides = array<i32>} : memref<2x128xf32, #tpu.memory_space<vmem>>, vector<2x128xf32>,
      %cst_85 = arith.constant 0.000000e+00 : f32
      %324 = vector.broadcast %cst_85 : f32 to vector<2x128xf32>
      %c0_86 = arith.constant 0 : index
      %c0_87 = arith.constant 0 : index
      %325 = vector.load %arg5[%c0_86, %c0_87] : memref<2x128xf32, #tpu.memory_space<vmem>>, vector<2x128xf32>
      tpu.vector_store %arg5[%c0_86, %c0_87], %324 {strides = array<i32>} : memref<2x128xf32, #tpu.memory_space<vmem>>, vector<2x128xf32>,
    } else {
    }
    %c0 = arith.constant 0 : index
    %c0_1 = arith.constant 0 : index
    %3 = vector.load %arg2[%c0, %c0_1] : memref<128x512xbf16, #tpu.memory_space<vmem>>, vector<128x512xbf16>
    %4 = vector.extract_strided_slice %3 {offsets = [0, 0], sizes = [128, 384], strides = [1, 1]} : vector<128x512xbf16> to vector<128x384xbf16>
    %5 = vector.extract_strided_slice %3 {offsets = [0, 384], sizes = [128, 128], strides = [1, 1]} : vector<128x512xbf16> to vector<128x128xbf16>
    %c0_2 = arith.constant 0 : index
    %c0_3 = arith.constant 0 : index
    %6 = vector.load %arg4[%c0_2, %c0_3] : memref<2x128xf32, #tpu.memory_space<vmem>>, vector<2x128xf32>
    %c0_4 = arith.constant 0 : index
    %c0_5 = arith.constant 0 : index
    %7 = vector.load %arg5[%c0_4, %c0_5] : memref<2x128xf32, #tpu.memory_space<vmem>>, vector<2x128xf32>
    %c0_i32_6 = arith.constant 0 : i32
    %8 = arith.truncf %6 : vector<2x128xf32> to vector<2x128xbf16>
    %9 = arith.index_cast %c0_i32_6 : i32 to index
    %c0_7 = arith.constant 0 : index
    %c0_8 = arith.constant 0 : index
    %10 = vector.load %arg1[%9, %c0_7, %c0_8] : memref<8x2x512xf32, #tpu.memory_space<vmem>>, vector<1x2x512xf32>
    %11 = vector.shape_cast %10 : vector<1x2x512xf32> to vector<2x512xf32>
    %12 = vector.extract_strided_slice %11 {offsets = [0, 0], sizes = [2, 384], strides = [1, 1]} : vector<2x512xf32> to vector<2x384xf32>
    %cst = arith.constant dense<0.000000e+00> : vector<2x384xf32>
    %13 = tpu.matmul %8, %4, %cst {dimension_numbers = #tpu.dot_dimension_numbers<[1], [0], [0], [1], [0, 0, 1, 1], [], []>} : vector<2x128xbf16>, vector<128x384xbf16>, vector<2x384xf32> -> vector<2x384xf32>
    %14 = arith.addf %12, %13 : vector<2x384xf32>
    %15 = vector.extract_strided_slice %11 {offsets = [0, 384], sizes = [2, 128], strides = [1, 1]} : vector<2x512xf32> to vector<2x128xf32>
    %cst_9 = arith.constant dense<0.000000e+00> : vector<2x128xf32>
    %16 = tpu.matmul %8, %5, %cst_9 {dimension_numbers = #tpu.dot_dimension_numbers<[1], [0], [0], [1], [0, 0, 1, 1], [], []>} : vector<2x128xbf16>, vector<128x128xbf16>, vector<2x128xf32> -> vector<2x128xf32>
    %17 = arith.addf %15, %16 : vector<2x128xf32>
    %18 = vector.extract_strided_slice %14 {offsets = [0, 0], sizes = [2, 128], strides = [1, 1]} : vector<2x384xf32> to vector<2x128xf32>
    %19 = arith.negf %18 : vector<2x128xf32>
    %20 = math.exp %19 : vector<2x128xf32>
    %cst_10 = arith.constant 1.000000e+00 : f32
    %21 = vector.broadcast %cst_10 : f32 to vector<2x128xf32>
    %22 = arith.addf %21, %20 : vector<2x128xf32>
    %23 = arith.divf %21, %22 : vector<2x128xf32>
    %24 = vector.extract_strided_slice %14 {offsets = [0, 128], sizes = [2, 128], strides = [1, 1]} : vector<2x384xf32> to vector<2x128xf32>
    %25 = arith.negf %24 : vector<2x128xf32>
    %26 = math.exp %25 : vector<2x128xf32>
    %cst_11 = arith.constant 1.000000e+00 : f32
    %27 = vector.broadcast %cst_11 : f32 to vector<2x128xf32>
    %28 = arith.addf %27, %26 : vector<2x128xf32>
    %29 = arith.divf %27, %28 : vector<2x128xf32>
    %30 = vector.extract_strided_slice %14 {offsets = [0, 256], sizes = [2, 128], strides = [1, 1]} : vector<2x384xf32> to vector<2x128xf32>
    %31 = math.tanh %30 : vector<2x128xf32>
    %32 = arith.mulf %29, %7 : vector<2x128xf32>
    %33 = arith.mulf %23, %31 : vector<2x128xf32>
    %34 = arith.addf %32, %33 : vector<2x128xf32>
    %35 = arith.negf %17 : vector<2x128xf32>
    %36 = math.exp %35 : vector<2x128xf32>
    %cst_12 = arith.constant 1.000000e+00 : f32
    %37 = vector.broadcast %cst_12 : f32 to vector<2x128xf32>
    %38 = arith.addf %37, %36 : vector<2x128xf32>
    %39 = arith.divf %37, %38 : vector<2x128xf32>
    %40 = math.tanh %34 : vector<2x128xf32>
    %41 = arith.mulf %39, %40 : vector<2x128xf32>
    %42 = arith.truncf %41 : vector<2x128xf32> to vector<2x128xbf16>
    %43 = arith.index_cast %c0_i32_6 : i32 to index
    %c0_13 = arith.constant 0 : index
    %c0_14 = arith.constant 0 : index
    %44 = vector.load %arg3[%43, %c0_13, %c0_14] : memref<8x2x128xbf16, #tpu.memory_space<vmem>>, vector<1x2x128xbf16>
    %45 = vector.shape_cast %44 : vector<1x2x128xbf16> to vector<2x128xbf16>
    %46 = vector.shape_cast %42 : vector<2x128xbf16> to vector<1x2x128xbf16>
    tpu.vector_store %arg3[%43, %c0_13, %c0_14], %46 {strides = array<i32>} : memref<8x2x128xbf16, #tpu.memory_space<vmem>>, vector<1x2x128xbf16>,
    %c1_i32 = arith.constant 1 : i32
    %47 = arith.truncf %41 : vector<2x128xf32> to vector<2x128xbf16>
    %48 = arith.index_cast %c1_i32 : i32 to index
    %c0_15 = arith.constant 0 : index
    %c0_16 = arith.constant 0 : index
    %49 = vector.load %arg1[%48, %c0_15, %c0_16] : memref<8x2x512xf32, #tpu.memory_space<vmem>>, vector<1x2x512xf32>
    %50 = vector.shape_cast %49 : vector<1x2x512xf32> to vector<2x512xf32>
    %51 = vector.extract_strided_slice %50 {offsets = [0, 0], sizes = [2, 384], strides = [1, 1]} : vector<2x512xf32> to vector<2x384xf32>
    %cst_17 = arith.constant dense<0.000000e+00> : vector<2x384xf32>
    %52 = tpu.matmul %47, %4, %cst_17 {dimension_numbers = #tpu.dot_dimension_numbers<[1], [0], [0], [1], [0, 0, 1, 1], [], []>} : vector<2x128xbf16>, vector<128x384xbf16>, vector<2x384xf32> -> vector<2x384xf32>
    %53 = arith.addf %51, %52 : vector<2x384xf32>
    %54 = vector.extract_strided_slice %50 {offsets = [0, 384], sizes = [2, 128], strides = [1, 1]} : vector<2x512xf32> to vector<2x128xf32>
    %cst_18 = arith.constant dense<0.000000e+00> : vector<2x128xf32>
    %55 = tpu.matmul %47, %5, %cst_18 {dimension_numbers = #tpu.dot_dimension_numbers<[1], [0], [0], [1], [0, 0, 1, 1], [], []>} : vector<2x128xbf16>, vector<128x128xbf16>, vector<2x128xf32> -> vector<2x128xf32>
    %56 = arith.addf %54, %55 : vector<2x128xf32>
    %57 = vector.extract_strided_slice %53 {offsets = [0, 0], sizes = [2, 128], strides = [1, 1]} : vector<2x384xf32> to vector<2x128xf32>
    %58 = arith.negf %57 : vector<2x128xf32>
    %59 = math.exp %58 : vector<2x128xf32>
    %cst_19 = arith.constant 1.000000e+00 : f32
    %60 = vector.broadcast %cst_19 : f32 to vector<2x128xf32>
    %61 = arith.addf %60, %59 : vector<2x128xf32>
    %62 = arith.divf %60, %61 : vector<2x128xf32>
    %63 = vector.extract_strided_slice %53 {offsets = [0, 128], sizes = [2, 128], strides = [1, 1]} : vector<2x384xf32> to vector<2x128xf32>
    %64 = arith.negf %63 : vector<2x128xf32>
    %65 = math.exp %64 : vector<2x128xf32>
    %cst_20 = arith.constant 1.000000e+00 : f32
    %66 = vector.broadcast %cst_20 : f32 to vector<2x128xf32>
    %67 = arith.addf %66, %65 : vector<2x128xf32>
    %68 = arith.divf %66, %67 : vector<2x128xf32>
    %69 = vector.extract_strided_slice %53 {offsets = [0, 256], sizes = [2, 128], strides = [1, 1]} : vector<2x384xf32> to vector<2x128xf32>
    %70 = math.tanh %69 : vector<2x128xf32>
    %71 = arith.mulf %68, %34 : vector<2x128xf32>
    %72 = arith.mulf %62, %70 : vector<2x128xf32>
    %73 = arith.addf %71, %72 : vector<2x128xf32>
    %74 = arith.negf %56 : vector<2x128xf32>
    %75 = math.exp %74 : vector<2x128xf32>
    %cst_21 = arith.constant 1.000000e+00 : f32
    %76 = vector.broadcast %cst_21 : f32 to vector<2x128xf32>
    %77 = arith.addf %76, %75 : vector<2x128xf32>
    %78 = arith.divf %76, %77 : vector<2x128xf32>
    %79 = math.tanh %73 : vector<2x128xf32>
    %80 = arith.mulf %78, %79 : vector<2x128xf32>
    %81 = arith.truncf %80 : vector<2x128xf32> to vector<2x128xbf16>
    %82 = arith.index_cast %c1_i32 : i32 to index
    %c0_22 = arith.constant 0 : index
    %c0_23 = arith.constant 0 : index
    %83 = vector.load %arg3[%82, %c0_22, %c0_23] : memref<8x2x128xbf16, #tpu.memory_space<vmem>>, vector<1x2x128xbf16>
    %84 = vector.shape_cast %83 : vector<1x2x128xbf16> to vector<2x128xbf16>
    %85 = vector.shape_cast %81 : vector<2x128xbf16> to vector<1x2x128xbf16>
    tpu.vector_store %arg3[%82, %c0_22, %c0_23], %85 {strides = array<i32>} : memref<8x2x128xbf16, #tpu.memory_space<vmem>>, vector<1x2x128xbf16>,
    %c2_i32 = arith.constant 2 : i32
    %86 = arith.truncf %80 : vector<2x128xf32> to vector<2x128xbf16>
    %87 = arith.index_cast %c2_i32 : i32 to index
    %c0_24 = arith.constant 0 : index
    %c0_25 = arith.constant 0 : index
    %88 = vector.load %arg1[%87, %c0_24, %c0_25] : memref<8x2x512xf32, #tpu.memory_space<vmem>>, vector<1x2x512xf32>
    %89 = vector.shape_cast %88 : vector<1x2x512xf32> to vector<2x512xf32>
    %90 = vector.extract_strided_slice %89 {offsets = [0, 0], sizes = [2, 384], strides = [1, 1]} : vector<2x512xf32> to vector<2x384xf32>
    %cst_26 = arith.constant dense<0.000000e+00> : vector<2x384xf32>
    %91 = tpu.matmul %86, %4, %cst_26 {dimension_numbers = #tpu.dot_dimension_numbers<[1], [0], [0], [1], [0, 0, 1, 1], [], []>} : vector<2x128xbf16>, vector<128x384xbf16>, vector<2x384xf32> -> vector<2x384xf32>
    %92 = arith.addf %90, %91 : vector<2x384xf32>
    %93 = vector.extract_strided_slice %89 {offsets = [0, 384], sizes = [2, 128], strides = [1, 1]} : vector<2x512xf32> to vector<2x128xf32>
    %cst_27 = arith.constant dense<0.000000e+00> : vector<2x128xf32>
    %94 = tpu.matmul %86, %5, %cst_27 {dimension_numbers = #tpu.dot_dimension_numbers<[1], [0], [0], [1], [0, 0, 1, 1], [], []>} : vector<2x128xbf16>, vector<128x128xbf16>, vector<2x128xf32> -> vector<2x128xf32>
    %95 = arith.addf %93, %94 : vector<2x128xf32>
    %96 = vector.extract_strided_slice %92 {offsets = [0, 0], sizes = [2, 128], strides = [1, 1]} : vector<2x384xf32> to vector<2x128xf32>
    %97 = arith.negf %96 : vector<2x128xf32>
    %98 = math.exp %97 : vector<2x128xf32>
    %cst_28 = arith.constant 1.000000e+00 : f32
    %99 = vector.broadcast %cst_28 : f32 to vector<2x128xf32>
    %100 = arith.addf %99, %98 : vector<2x128xf32>
    %101 = arith.divf %99, %100 : vector<2x128xf32>
    %102 = vector.extract_strided_slice %92 {offsets = [0, 128], sizes = [2, 128], strides = [1, 1]} : vector<2x384xf32> to vector<2x128xf32>
    %103 = arith.negf %102 : vector<2x128xf32>
    %104 = math.exp %103 : vector<2x128xf32>
    %cst_29 = arith.constant 1.000000e+00 : f32
    %105 = vector.broadcast %cst_29 : f32 to vector<2x128xf32>
    %106 = arith.addf %105, %104 : vector<2x128xf32>
    %107 = arith.divf %105, %106 : vector<2x128xf32>
    %108 = vector.extract_strided_slice %92 {offsets = [0, 256], sizes = [2, 128], strides = [1, 1]} : vector<2x384xf32> to vector<2x128xf32>
    %109 = math.tanh %108 : vector<2x128xf32>
    %110 = arith.mulf %107, %73 : vector<2x128xf32>
    %111 = arith.mulf %101, %109 : vector<2x128xf32>
    %112 = arith.addf %110, %111 : vector<2x128xf32>
    %113 = arith.negf %95 : vector<2x128xf32>
    %114 = math.exp %113 : vector<2x128xf32>
    %cst_30 = arith.constant 1.000000e+00 : f32
    %115 = vector.broadcast %cst_30 : f32 to vector<2x128xf32>
    %116 = arith.addf %115, %114 : vector<2x128xf32>
    %117 = arith.divf %115, %116 : vector<2x128xf32>
    %118 = math.tanh %112 : vector<2x128xf32>
    %119 = arith.mulf %117, %118 : vector<2x128xf32>
    %120 = arith.truncf %119 : vector<2x128xf32> to vector<2x128xbf16>
    %121 = arith.index_cast %c2_i32 : i32 to index
    %c0_31 = arith.constant 0 : index
    %c0_32 = arith.constant 0 : index
    %122 = vector.load %arg3[%121, %c0_31, %c0_32] : memref<8x2x128xbf16, #tpu.memory_space<vmem>>, vector<1x2x128xbf16>
    %123 = vector.shape_cast %122 : vector<1x2x128xbf16> to vector<2x128xbf16>
    %124 = vector.shape_cast %120 : vector<2x128xbf16> to vector<1x2x128xbf16>
    tpu.vector_store %arg3[%121, %c0_31, %c0_32], %124 {strides = array<i32>} : memref<8x2x128xbf16, #tpu.memory_space<vmem>>, vector<1x2x128xbf16>,
    %c3_i32 = arith.constant 3 : i32
    %125 = arith.truncf %119 : vector<2x128xf32> to vector<2x128xbf16>
    %126 = arith.index_cast %c3_i32 : i32 to index
    %c0_33 = arith.constant 0 : index
    %c0_34 = arith.constant 0 : index
    %127 = vector.load %arg1[%126, %c0_33, %c0_34] : memref<8x2x512xf32, #tpu.memory_space<vmem>>, vector<1x2x512xf32>
    %128 = vector.shape_cast %127 : vector<1x2x512xf32> to vector<2x512xf32>
    %129 = vector.extract_strided_slice %128 {offsets = [0, 0], sizes = [2, 384], strides = [1, 1]} : vector<2x512xf32> to vector<2x384xf32>
    %cst_35 = arith.constant dense<0.000000e+00> : vector<2x384xf32>
    %130 = tpu.matmul %125, %4, %cst_35 {dimension_numbers = #tpu.dot_dimension_numbers<[1], [0], [0], [1], [0, 0, 1, 1], [], []>} : vector<2x128xbf16>, vector<128x384xbf16>, vector<2x384xf32> -> vector<2x384xf32>
    %131 = arith.addf %129, %130 : vector<2x384xf32>
    %132 = vector.extract_strided_slice %128 {offsets = [0, 384], sizes = [2, 128], strides = [1, 1]} : vector<2x512xf32> to vector<2x128xf32>
    %cst_36 = arith.constant dense<0.000000e+00> : vector<2x128xf32>
    %133 = tpu.matmul %125, %5, %cst_36 {dimension_numbers = #tpu.dot_dimension_numbers<[1], [0], [0], [1], [0, 0, 1, 1], [], []>} : vector<2x128xbf16>, vector<128x128xbf16>, vector<2x128xf32> -> vector<2x128xf32>
    %134 = arith.addf %132, %133 : vector<2x128xf32>
    %135 = vector.extract_strided_slice %131 {offsets = [0, 0], sizes = [2, 128], strides = [1, 1]} : vector<2x384xf32> to vector<2x128xf32>
    %136 = arith.negf %135 : vector<2x128xf32>
    %137 = math.exp %136 : vector<2x128xf32>
    %cst_37 = arith.constant 1.000000e+00 : f32
    %138 = vector.broadcast %cst_37 : f32 to vector<2x128xf32>
    %139 = arith.addf %138, %137 : vector<2x128xf32>
    %140 = arith.divf %138, %139 : vector<2x128xf32>
    %141 = vector.extract_strided_slice %131 {offsets = [0, 128], sizes = [2, 128], strides = [1, 1]} : vector<2x384xf32> to vector<2x128xf32>
    %142 = arith.negf %141 : vector<2x128xf32>
    %143 = math.exp %142 : vector<2x128xf32>
    %cst_38 = arith.constant 1.000000e+00 : f32
    %144 = vector.broadcast %cst_38 : f32 to vector<2x128xf32>
    %145 = arith.addf %144, %143 : vector<2x128xf32>
    %146 = arith.divf %144, %145 : vector<2x128xf32>
    %147 = vector.extract_strided_slice %131 {offsets = [0, 256], sizes = [2, 128], strides = [1, 1]} : vector<2x384xf32> to vector<2x128xf32>
    %148 = math.tanh %147 : vector<2x128xf32>
    %149 = arith.mulf %146, %112 : vector<2x128xf32>
    %150 = arith.mulf %140, %148 : vector<2x128xf32>
    %151 = arith.addf %149, %150 : vector<2x128xf32>
    %152 = arith.negf %134 : vector<2x128xf32>
    %153 = math.exp %152 : vector<2x128xf32>
    %cst_39 = arith.constant 1.000000e+00 : f32
    %154 = vector.broadcast %cst_39 : f32 to vector<2x128xf32>
    %155 = arith.addf %154, %153 : vector<2x128xf32>
    %156 = arith.divf %154, %155 : vector<2x128xf32>
    %157 = math.tanh %151 : vector<2x128xf32>
    %158 = arith.mulf %156, %157 : vector<2x128xf32>
    %159 = arith.truncf %158 : vector<2x128xf32> to vector<2x128xbf16>
    %160 = arith.index_cast %c3_i32 : i32 to index
    %c0_40 = arith.constant 0 : index
    %c0_41 = arith.constant 0 : index
    %161 = vector.load %arg3[%160, %c0_40, %c0_41] : memref<8x2x128xbf16, #tpu.memory_space<vmem>>, vector<1x2x128xbf16>
    %162 = vector.shape_cast %161 : vector<1x2x128xbf16> to vector<2x128xbf16>
    %163 = vector.shape_cast %159 : vector<2x128xbf16> to vector<1x2x128xbf16>
    tpu.vector_store %arg3[%160, %c0_40, %c0_41], %163 {strides = array<i32>} : memref<8x2x128xbf16, #tpu.memory_space<vmem>>, vector<1x2x128xbf16>,
    %c4_i32 = arith.constant 4 : i32
    %164 = arith.truncf %158 : vector<2x128xf32> to vector<2x128xbf16>
    %165 = arith.index_cast %c4_i32 : i32 to index
    %c0_42 = arith.constant 0 : index
    %c0_43 = arith.constant 0 : index
    %166 = vector.load %arg1[%165, %c0_42, %c0_43] : memref<8x2x512xf32, #tpu.memory_space<vmem>>, vector<1x2x512xf32>
    %167 = vector.shape_cast %166 : vector<1x2x512xf32> to vector<2x512xf32>
    %168 = vector.extract_strided_slice %167 {offsets = [0, 0], sizes = [2, 384], strides = [1, 1]} : vector<2x512xf32> to vector<2x384xf32>
    %cst_44 = arith.constant dense<0.000000e+00> : vector<2x384xf32>
    %169 = tpu.matmul %164, %4, %cst_44 {dimension_numbers = #tpu.dot_dimension_numbers<[1], [0], [0], [1], [0, 0, 1, 1], [], []>} : vector<2x128xbf16>, vector<128x384xbf16>, vector<2x384xf32> -> vector<2x384xf32>
    %170 = arith.addf %168, %169 : vector<2x384xf32>
    %171 = vector.extract_strided_slice %167 {offsets = [0, 384], sizes = [2, 128], strides = [1, 1]} : vector<2x512xf32> to vector<2x128xf32>
    %cst_45 = arith.constant dense<0.000000e+00> : vector<2x128xf32>
    %172 = tpu.matmul %164, %5, %cst_45 {dimension_numbers = #tpu.dot_dimension_numbers<[1], [0], [0], [1], [0, 0, 1, 1], [], []>} : vector<2x128xbf16>, vector<128x128xbf16>, vector<2x128xf32> -> vector<2x128xf32>
    %173 = arith.addf %171, %172 : vector<2x128xf32>
    %174 = vector.extract_strided_slice %170 {offsets = [0, 0], sizes = [2, 128], strides = [1, 1]} : vector<2x384xf32> to vector<2x128xf32>
    %175 = arith.negf %174 : vector<2x128xf32>
    %176 = math.exp %175 : vector<2x128xf32>
    %cst_46 = arith.constant 1.000000e+00 : f32
    %177 = vector.broadcast %cst_46 : f32 to vector<2x128xf32>
    %178 = arith.addf %177, %176 : vector<2x128xf32>
    %179 = arith.divf %177, %178 : vector<2x128xf32>
    %180 = vector.extract_strided_slice %170 {offsets = [0, 128], sizes = [2, 128], strides = [1, 1]} : vector<2x384xf32> to vector<2x128xf32>
    %181 = arith.negf %180 : vector<2x128xf32>
    %182 = math.exp %181 : vector<2x128xf32>
    %cst_47 = arith.constant 1.000000e+00 : f32
    %183 = vector.broadcast %cst_47 : f32 to vector<2x128xf32>
    %184 = arith.addf %183, %182 : vector<2x128xf32>
    %185 = arith.divf %183, %184 : vector<2x128xf32>
    %186 = vector.extract_strided_slice %170 {offsets = [0, 256], sizes = [2, 128], strides = [1, 1]} : vector<2x384xf32> to vector<2x128xf32>
    %187 = math.tanh %186 : vector<2x128xf32>
    %188 = arith.mulf %185, %151 : vector<2x128xf32>
    %189 = arith.mulf %179, %187 : vector<2x128xf32>
    %190 = arith.addf %188, %189 : vector<2x128xf32>
    %191 = arith.negf %173 : vector<2x128xf32>
    %192 = math.exp %191 : vector<2x128xf32>
    %cst_48 = arith.constant 1.000000e+00 : f32
    %193 = vector.broadcast %cst_48 : f32 to vector<2x128xf32>
    %194 = arith.addf %193, %192 : vector<2x128xf32>
    %195 = arith.divf %193, %194 : vector<2x128xf32>
    %196 = math.tanh %190 : vector<2x128xf32>
    %197 = arith.mulf %195, %196 : vector<2x128xf32>
    %198 = arith.truncf %197 : vector<2x128xf32> to vector<2x128xbf16>
    %199 = arith.index_cast %c4_i32 : i32 to index
    %c0_49 = arith.constant 0 : index
    %c0_50 = arith.constant 0 : index
    %200 = vector.load %arg3[%199, %c0_49, %c0_50] : memref<8x2x128xbf16, #tpu.memory_space<vmem>>, vector<1x2x128xbf16>
    %201 = vector.shape_cast %200 : vector<1x2x128xbf16> to vector<2x128xbf16>
    %202 = vector.shape_cast %198 : vector<2x128xbf16> to vector<1x2x128xbf16>
    tpu.vector_store %arg3[%199, %c0_49, %c0_50], %202 {strides = array<i32>} : memref<8x2x128xbf16, #tpu.memory_space<vmem>>, vector<1x2x128xbf16>,
    %c5_i32 = arith.constant 5 : i32
    %203 = arith.truncf %197 : vector<2x128xf32> to vector<2x128xbf16>
    %204 = arith.index_cast %c5_i32 : i32 to index
    %c0_51 = arith.constant 0 : index
    %c0_52 = arith.constant 0 : index
    %205 = vector.load %arg1[%204, %c0_51, %c0_52] : memref<8x2x512xf32, #tpu.memory_space<vmem>>, vector<1x2x512xf32>
    %206 = vector.shape_cast %205 : vector<1x2x512xf32> to vector<2x512xf32>
    %207 = vector.extract_strided_slice %206 {offsets = [0, 0], sizes = [2, 384], strides = [1, 1]} : vector<2x512xf32> to vector<2x384xf32>
    %cst_53 = arith.constant dense<0.000000e+00> : vector<2x384xf32>
    %208 = tpu.matmul %203, %4, %cst_53 {dimension_numbers = #tpu.dot_dimension_numbers<[1], [0], [0], [1], [0, 0, 1, 1], [], []>} : vector<2x128xbf16>, vector<128x384xbf16>, vector<2x384xf32> -> vector<2x384xf32>
    %209 = arith.addf %207, %208 : vector<2x384xf32>
    %210 = vector.extract_strided_slice %206 {offsets = [0, 384], sizes = [2, 128], strides = [1, 1]} : vector<2x512xf32> to vector<2x128xf32>
    %cst_54 = arith.constant dense<0.000000e+00> : vector<2x128xf32>
    %211 = tpu.matmul %203, %5, %cst_54 {dimension_numbers = #tpu.dot_dimension_numbers<[1], [0], [0], [1], [0, 0, 1, 1], [], []>} : vector<2x128xbf16>, vector<128x128xbf16>, vector<2x128xf32> -> vector<2x128xf32>
    %212 = arith.addf %210, %211 : vector<2x128xf32>
    %213 = vector.extract_strided_slice %209 {offsets = [0, 0], sizes = [2, 128], strides = [1, 1]} : vector<2x384xf32> to vector<2x128xf32>
    %214 = arith.negf %213 : vector<2x128xf32>
    %215 = math.exp %214 : vector<2x128xf32>
    %cst_55 = arith.constant 1.000000e+00 : f32
    %216 = vector.broadcast %cst_55 : f32 to vector<2x128xf32>
    %217 = arith.addf %216, %215 : vector<2x128xf32>
    %218 = arith.divf %216, %217 : vector<2x128xf32>
    %219 = vector.extract_strided_slice %209 {offsets = [0, 128], sizes = [2, 128], strides = [1, 1]} : vector<2x384xf32> to vector<2x128xf32>
    %220 = arith.negf %219 : vector<2x128xf32>
    %221 = math.exp %220 : vector<2x128xf32>
    %cst_56 = arith.constant 1.000000e+00 : f32
    %222 = vector.broadcast %cst_56 : f32 to vector<2x128xf32>
    %223 = arith.addf %222, %221 : vector<2x128xf32>
    %224 = arith.divf %222, %223 : vector<2x128xf32>
    %225 = vector.extract_strided_slice %209 {offsets = [0, 256], sizes = [2, 128], strides = [1, 1]} : vector<2x384xf32> to vector<2x128xf32>
    %226 = math.tanh %225 : vector<2x128xf32>
    %227 = arith.mulf %224, %190 : vector<2x128xf32>
    %228 = arith.mulf %218, %226 : vector<2x128xf32>
    %229 = arith.addf %227, %228 : vector<2x128xf32>
    %230 = arith.negf %212 : vector<2x128xf32>
    %231 = math.exp %230 : vector<2x128xf32>
    %cst_57 = arith.constant 1.000000e+00 : f32
    %232 = vector.broadcast %cst_57 : f32 to vector<2x128xf32>
    %233 = arith.addf %232, %231 : vector<2x128xf32>
    %234 = arith.divf %232, %233 : vector<2x128xf32>
    %235 = math.tanh %229 : vector<2x128xf32>
    %236 = arith.mulf %234, %235 : vector<2x128xf32>
    %237 = arith.truncf %236 : vector<2x128xf32> to vector<2x128xbf16>
    %238 = arith.index_cast %c5_i32 : i32 to index
    %c0_58 = arith.constant 0 : index
    %c0_59 = arith.constant 0 : index
    %239 = vector.load %arg3[%238, %c0_58, %c0_59] : memref<8x2x128xbf16, #tpu.memory_space<vmem>>, vector<1x2x128xbf16>
    %240 = vector.shape_cast %239 : vector<1x2x128xbf16> to vector<2x128xbf16>
    %241 = vector.shape_cast %237 : vector<2x128xbf16> to vector<1x2x128xbf16>
    tpu.vector_store %arg3[%238, %c0_58, %c0_59], %241 {strides = array<i32>} : memref<8x2x128xbf16, #tpu.memory_space<vmem>>, vector<1x2x128xbf16>,
    %c6_i32 = arith.constant 6 : i32
    %242 = arith.truncf %236 : vector<2x128xf32> to vector<2x128xbf16>
    %243 = arith.index_cast %c6_i32 : i32 to index
    %c0_60 = arith.constant 0 : index
    %c0_61 = arith.constant 0 : index
    %244 = vector.load %arg1[%243, %c0_60, %c0_61] : memref<8x2x512xf32, #tpu.memory_space<vmem>>, vector<1x2x512xf32>
    %245 = vector.shape_cast %244 : vector<1x2x512xf32> to vector<2x512xf32>
    %246 = vector.extract_strided_slice %245 {offsets = [0, 0], sizes = [2, 384], strides = [1, 1]} : vector<2x512xf32> to vector<2x384xf32>
    %cst_62 = arith.constant dense<0.000000e+00> : vector<2x384xf32>
    %247 = tpu.matmul %242, %4, %cst_62 {dimension_numbers = #tpu.dot_dimension_numbers<[1], [0], [0], [1], [0, 0, 1, 1], [], []>} : vector<2x128xbf16>, vector<128x384xbf16>, vector<2x384xf32> -> vector<2x384xf32>
    %248 = arith.addf %246, %247 : vector<2x384xf32>
    %249 = vector.extract_strided_slice %245 {offsets = [0, 384], sizes = [2, 128], strides = [1, 1]} : vector<2x512xf32> to vector<2x128xf32>
    %cst_63 = arith.constant dense<0.000000e+00> : vector<2x128xf32>
    %250 = tpu.matmul %242, %5, %cst_63 {dimension_numbers = #tpu.dot_dimension_numbers<[1], [0], [0], [1], [0, 0, 1, 1], [], []>} : vector<2x128xbf16>, vector<128x128xbf16>, vector<2x128xf32> -> vector<2x128xf32>
    %251 = arith.addf %249, %250 : vector<2x128xf32>
    %252 = vector.extract_strided_slice %248 {offsets = [0, 0], sizes = [2, 128], strides = [1, 1]} : vector<2x384xf32> to vector<2x128xf32>
    %253 = arith.negf %252 : vector<2x128xf32>
    %254 = math.exp %253 : vector<2x128xf32>
    %cst_64 = arith.constant 1.000000e+00 : f32
    %255 = vector.broadcast %cst_64 : f32 to vector<2x128xf32>
    %256 = arith.addf %255, %254 : vector<2x128xf32>
    %257 = arith.divf %255, %256 : vector<2x128xf32>
    %258 = vector.extract_strided_slice %248 {offsets = [0, 128], sizes = [2, 128], strides = [1, 1]} : vector<2x384xf32> to vector<2x128xf32>
    %259 = arith.negf %258 : vector<2x128xf32>
    %260 = math.exp %259 : vector<2x128xf32>
    %cst_65 = arith.constant 1.000000e+00 : f32
    %261 = vector.broadcast %cst_65 : f32 to vector<2x128xf32>
    %262 = arith.addf %261, %260 : vector<2x128xf32>
    %263 = arith.divf %261, %262 : vector<2x128xf32>
    %264 = vector.extract_strided_slice %248 {offsets = [0, 256], sizes = [2, 128], strides = [1, 1]} : vector<2x384xf32> to vector<2x128xf32>
    %265 = math.tanh %264 : vector<2x128xf32>
    %266 = arith.mulf %263, %229 : vector<2x128xf32>
    %267 = arith.mulf %257, %265 : vector<2x128xf32>
    %268 = arith.addf %266, %267 : vector<2x128xf32>
    %269 = arith.negf %251 : vector<2x128xf32>
    %270 = math.exp %269 : vector<2x128xf32>
    %cst_66 = arith.constant 1.000000e+00 : f32
    %271 = vector.broadcast %cst_66 : f32 to vector<2x128xf32>
    %272 = arith.addf %271, %270 : vector<2x128xf32>
    %273 = arith.divf %271, %272 : vector<2x128xf32>
    %274 = math.tanh %268 : vector<2x128xf32>
    %275 = arith.mulf %273, %274 : vector<2x128xf32>
    %276 = arith.truncf %275 : vector<2x128xf32> to vector<2x128xbf16>
    %277 = arith.index_cast %c6_i32 : i32 to index
    %c0_67 = arith.constant 0 : index
    %c0_68 = arith.constant 0 : index
    %278 = vector.load %arg3[%277, %c0_67, %c0_68] : memref<8x2x128xbf16, #tpu.memory_space<vmem>>, vector<1x2x128xbf16>
    %279 = vector.shape_cast %278 : vector<1x2x128xbf16> to vector<2x128xbf16>
    %280 = vector.shape_cast %276 : vector<2x128xbf16> to vector<1x2x128xbf16>
    tpu.vector_store %arg3[%277, %c0_67, %c0_68], %280 {strides = array<i32>} : memref<8x2x128xbf16, #tpu.memory_space<vmem>>, vector<1x2x128xbf16>,
    %c7_i32 = arith.constant 7 : i32
    %281 = arith.truncf %275 : vector<2x128xf32> to vector<2x128xbf16>
    %282 = arith.index_cast %c7_i32 : i32 to index
    %c0_69 = arith.constant 0 : index
    %c0_70 = arith.constant 0 : index
    %283 = vector.load %arg1[%282, %c0_69, %c0_70] : memref<8x2x512xf32, #tpu.memory_space<vmem>>, vector<1x2x512xf32>
    %284 = vector.shape_cast %283 : vector<1x2x512xf32> to vector<2x512xf32>
    %285 = vector.extract_strided_slice %284 {offsets = [0, 0], sizes = [2, 384], strides = [1, 1]} : vector<2x512xf32> to vector<2x384xf32>
    %cst_71 = arith.constant dense<0.000000e+00> : vector<2x384xf32>
    %286 = tpu.matmul %281, %4, %cst_71 {dimension_numbers = #tpu.dot_dimension_numbers<[1], [0], [0], [1], [0, 0, 1, 1], [], []>} : vector<2x128xbf16>, vector<128x384xbf16>, vector<2x384xf32> -> vector<2x384xf32>
    %287 = arith.addf %285, %286 : vector<2x384xf32>
    %288 = vector.extract_strided_slice %284 {offsets = [0, 384], sizes = [2, 128], strides = [1, 1]} : vector<2x512xf32> to vector<2x128xf32>
    %cst_72 = arith.constant dense<0.000000e+00> : vector<2x128xf32>
    %289 = tpu.matmul %281, %5, %cst_72 {dimension_numbers = #tpu.dot_dimension_numbers<[1], [0], [0], [1], [0, 0, 1, 1], [], []>} : vector<2x128xbf16>, vector<128x128xbf16>, vector<2x128xf32> -> vector<2x128xf32>
    %290 = arith.addf %288, %289 : vector<2x128xf32>
    %291 = vector.extract_strided_slice %287 {offsets = [0, 0], sizes = [2, 128], strides = [1, 1]} : vector<2x384xf32> to vector<2x128xf32>
    %292 = arith.negf %291 : vector<2x128xf32>
    %293 = math.exp %292 : vector<2x128xf32>
    %cst_73 = arith.constant 1.000000e+00 : f32
    %294 = vector.broadcast %cst_73 : f32 to vector<2x128xf32>
    %295 = arith.addf %294, %293 : vector<2x128xf32>
    %296 = arith.divf %294, %295 : vector<2x128xf32>
    %297 = vector.extract_strided_slice %287 {offsets = [0, 128], sizes = [2, 128], strides = [1, 1]} : vector<2x384xf32> to vector<2x128xf32>
    %298 = arith.negf %297 : vector<2x128xf32>
    %299 = math.exp %298 : vector<2x128xf32>
    %cst_74 = arith.constant 1.000000e+00 : f32
    %300 = vector.broadcast %cst_74 : f32 to vector<2x128xf32>
    %301 = arith.addf %300, %299 : vector<2x128xf32>
    %302 = arith.divf %300, %301 : vector<2x128xf32>
    %303 = vector.extract_strided_slice %287 {offsets = [0, 256], sizes = [2, 128], strides = [1, 1]} : vector<2x384xf32> to vector<2x128xf32>
    %304 = math.tanh %303 : vector<2x128xf32>
    %305 = arith.mulf %302, %268 : vector<2x128xf32>
    %306 = arith.mulf %296, %304 : vector<2x128xf32>
    %307 = arith.addf %305, %306 : vector<2x128xf32>
    %308 = arith.negf %290 : vector<2x128xf32>
    %309 = math.exp %308 : vector<2x128xf32>
    %cst_75 = arith.constant 1.000000e+00 : f32
    %310 = vector.broadcast %cst_75 : f32 to vector<2x128xf32>
    %311 = arith.addf %310, %309 : vector<2x128xf32>
    %312 = arith.divf %310, %311 : vector<2x128xf32>
    %313 = math.tanh %307 : vector<2x128xf32>
    %314 = arith.mulf %312, %313 : vector<2x128xf32>
    %315 = arith.truncf %314 : vector<2x128xf32> to vector<2x128xbf16>
    %316 = arith.index_cast %c7_i32 : i32 to index
    %c0_76 = arith.constant 0 : index
    %c0_77 = arith.constant 0 : index
    %317 = vector.load %arg3[%316, %c0_76, %c0_77] : memref<8x2x128xbf16, #tpu.memory_space<vmem>>, vector<1x2x128xbf16>
    %318 = vector.shape_cast %317 : vector<1x2x128xbf16> to vector<2x128xbf16>
    %319 = vector.shape_cast %315 : vector<2x128xbf16> to vector<1x2x128xbf16>
    tpu.vector_store %arg3[%316, %c0_76, %c0_77], %319 {strides = array<i32>} : memref<8x2x128xbf16, #tpu.memory_space<vmem>>, vector<1x2x128xbf16>,
    %c8_i32 = arith.constant 8 : i32
    %c0_78 = arith.constant 0 : index
    %c0_79 = arith.constant 0 : index
    %320 = vector.load %arg4[%c0_78, %c0_79] : memref<2x128xf32, #tpu.memory_space<vmem>>, vector<2x128xf32>
    tpu.vector_store %arg4[%c0_78, %c0_79], %314 {strides = array<i32>} : memref<2x128xf32, #tpu.memory_space<vmem>>, vector<2x128xf32>,
    %c0_80 = arith.constant 0 : index
    %c0_81 = arith.constant 0 : index
    %321 = vector.load %arg5[%c0_80, %c0_81] : memref<2x128xf32, #tpu.memory_space<vmem>>, vector<2x128xf32>
    tpu.vector_store %arg5[%c0_80, %c0_81], %307 {strides = array<i32>} : memref<2x128xf32, #tpu.memory_space<vmem>>, vector<2x128xf32>,
    return
  }
  func.func @transform_0(%arg0: i32) -> (i32, i32, i32) {
    %c0_i32 = arith.constant 0 : i32
    %c0_i32_0 = arith.constant 0 : i32
    %c0_i32_1 = arith.constant 0 : i32
    return %arg0, %c0_i32, %c0_i32_0 : i32, i32, i32
  }
  func.func @transform_1(%arg0: i32) -> (i32, i32) {
    %c0_i32 = arith.constant 0 : i32
    %c0_i32_0 = arith.constant 0 : i32
    %c0_i32_1 = arith.constant 0 : i32
    return %c0_i32, %c0_i32_0 : i32, i32
  }
  func.func @transform_2(%arg0: i32) -> (i32, i32, i32) {
    %c0_i32 = arith.constant 0 : i32
    %c0_i32_0 = arith.constant 0 : i32
    %c0_i32_1 = arith.constant 0 : i32
    return %arg0, %c0_i32, %c0_i32_0 : i32, i32, i32
  }
}

</mosaic_0001>

<bundles_post_ra>
// kernel: lstm_forward.3
= control target key start
LH: loop header
LB: loop body
LE: loop exit
PB: predicated region body
PF: predicated region fallthrough
CT: control target
= control target key end

     0   :  { %vm225_vm0 = vcmask 1041408   ;;  %vm227_vm1 = vcmask 1043456   ;;  %s2269_s1 = inlined_call_operand.vmem [shape: bf16[128,512], index: 1, kind: input, shape index: {}]   ;;  %s2270_s0 = inlined_call_operand.vmem [shape: f32[8,2,512], index: 0, kind: input, shape index: {}]   ;;  %s2271_s2 = inlined_call_operand.vmem [shape: bf16[8,2,128], index: 2, kind: output, shape index: {}]  }
   0x1   :  { %v1408_v0 = vld [vmem:[%s2269_s1 + $0xe0] sm:$0xf]  ;;  %v1518_v1 = vld [vmem:[%s2269_s1 + $0xec] sm:$0xf0]  ;;  %v1516_v2 = vld [vmem:[%s2269_s1 + $0xe4] sm:$0xf] }
   0x2   :  { %v1674_v3 = vor.u32 %v1518_v1, %v1408_v0  ;;  %v1410_v4 = vld [vmem:[%s2269_s1 + $0xf0] sm:$0xf0]  ;;  %v1416_v5 = vld [vmem:[%s2269_s1 + $0xe8] sm:$0xf]  ;;  %v1519_v6 = vld [vmem:[%s2269_s1 + $0xf4] sm:$0xf0] }
   0x3   :  { %v1685_v7 = vor.u32 %v1516_v2, %v1410_v4  ;;  %v1687_v8 = vor.u32 %v1519_v6, %v1416_v5  ;;  %v1517_v9 = vld [vmem:[%s2269_s1 + $0xec] sm:$0xf]  ;;  %v1446_v10 = vld [vmem:[%s2269_s1 + $0xf8] sm:$0xf0]  ;;  %v1396_v11 = vld [vmem:[%s2269_s1 + $0xc0] sm:$0xf] }
   0x4   :  { %181 = vmatpush.bf16.msra.mxu0 %v1674_v3  ;;  %v1699_v12 = vor.u32 %v1517_v9, %v1446_v10  ;;  %v1514_v13 = vld [vmem:[%s2269_s1 + $0xcc] sm:$0xf0]  ;;  %v1512_v14 = vld [vmem:[%s2269_s1 + $0xc4] sm:$0xf]  ;;  %v1398_v15 = vld [vmem:[%s2269_s1 + $0xd0] sm:$0xf0] }
   0x5   :  { %194 = vmatpush.bf16.msra.mxu1 %v1685_v7  ;;  %207 = vmatpush.bf16.msra.mxu2 %v1687_v8  ;;  %v1712_v16 = vor.u32 %v1514_v13, %v1396_v11  ;;  %v1714_v17 = vor.u32 %v1512_v14, %v1398_v15  ;;  %v1404_v18 = vld [vmem:[%s2269_s1 + $0xc8] sm:$0xf]  ;;  %v1515_v19 = vld [vmem:[%s2269_s1 + $0xd4] sm:$0xf0]  ;;  %v1513_v20 = vld [vmem:[%s2269_s1 + $0xcc] sm:$0xf] }
   0x6   :  { %263 = vmatpush.bf16.msra.mxu3 %v1699_v12  ;;  %v1726_v21 = vor.u32 %v1515_v19, %v1404_v18  ;;  %v1442_v22 = vld [vmem:[%s2269_s1 + $0xd8] sm:$0xf0]  ;;  %v1384_v23 = vld [vmem:[%s2269_s1 + $0xa0] sm:$0xf]  ;;  %v1510_v24 = vld [vmem:[%s2269_s1 + $0xac] sm:$0xf0] }
   0x7   :  { %v1737_v25 = vor.u32 %v1513_v20, %v1442_v22  ;;  %v1508_v26 = vld [vmem:[%s2269_s1 + $0xa4] sm:$0xf]  ;;  %v1386_v27 = vld [vmem:[%s2269_s1 + $0xb0] sm:$0xf0]  ;;  %v1392_v28 = vld [vmem:[%s2269_s1 + $0xa8] sm:$0xf]  ;;  %v1749_v29 = vor.u32 %v1510_v24, %v1384_v23 }
   0x8   :  { %182 = vmatpush.bf16.msra.mxu0 %v1712_v16  ;;  %v1511_v30 = vld [vmem:[%s2269_s1 + $0xb4] sm:$0xf0]  ;;  %v1509_v31 = vld [vmem:[%s2269_s1 + $0xac] sm:$0xf]  ;;  %v1438_v32 = vld [vmem:[%s2269_s1 + $0xb8] sm:$0xf0]  ;;  %v1762_v33 = vor.u32 %v1508_v26, %v1386_v27 }
   0x9   :  { %195 = vmatpush.bf16.msra.mxu1 %v1714_v17  ;;  %208 = vmatpush.bf16.msra.mxu2 %v1726_v21  ;;  %v1764_v34 = vor.u32 %v1511_v30, %v1392_v28  ;;  %v1372_v35 = vld [vmem:[%s2269_s1 + $0x80] sm:$0xf]  ;;  %v1506_v36 = vld [vmem:[%s2269_s1 + $0x8c] sm:$0xf0]  ;;  %v1504_v37 = vld [vmem:[%s2269_s1 + $0x84] sm:$0xf]  ;;  %v1776_v38 = vor.u32 %v1509_v31, %v1438_v32 }
   0xa   :  { %264 = vmatpush.bf16.msra.mxu3 %v1737_v25  ;;  %v1374_v39 = vld [vmem:[%s2269_s1 + $0x90] sm:$0xf0]  ;;  %v1380_v40 = vld [vmem:[%s2269_s1 + $0x88] sm:$0xf]  ;;  %v1507_v41 = vld [vmem:[%s2269_s1 + $0x94] sm:$0xf0]  ;;  %v1794_v44 = vor.u32 %v1506_v36, %v1372_v35 }
   0xb   :  { %v1505_v42 = vld [vmem:[%s2269_s1 + $0x8c] sm:$0xf]  ;;  %v1434_v43 = vld [vmem:[%s2269_s1 + $0x98] sm:$0xf0]  ;;  %v1798_v45 = vor.u32 %v1504_v37, %v1374_v39  ;;  %v1800_v46 = vor.u32 %v1507_v41, %v1380_v40  ;;  %v1360_v47 = vld [vmem:[%s2269_s1 + $0x60] sm:$0xf] }
   0xc   :  { %183 = vmatpush.bf16.msra.mxu0 %v1749_v29  ;;  %v1502_v48 = vld [vmem:[%s2269_s1 + $0x6c] sm:$0xf0]  ;;  %v1500_v49 = vld [vmem:[%s2269_s1 + $0x64] sm:$0xf]  ;;  %v1812_v50 = vor.u32 %v1505_v42, %v1434_v43  ;;  %v1362_v51 = vld [vmem:[%s2269_s1 + $0x70] sm:$0xf0] }
   0xd   :  { %196 = vmatpush.bf16.msra.mxu1 %v1762_v33  ;;  %209 = vmatpush.bf16.msra.mxu2 %v1764_v34  ;;  %v1368_v52 = vld [vmem:[%s2269_s1 + $0x68] sm:$0xf]  ;;  %v1503_v53 = vld [vmem:[%s2269_s1 + $0x74] sm:$0xf0]  ;;  %v1501_v54 = vld [vmem:[%s2269_s1 + $0x6c] sm:$0xf]  ;;  %v1830_v56 = vor.u32 %v1502_v48, %v1360_v47  ;;  %v1834_v57 = vor.u32 %v1500_v49, %v1362_v51 }
   0xe   :  { %265 = vmatpush.bf16.msra.mxu3 %v1776_v38  ;;  %v1430_v55 = vld [vmem:[%s2269_s1 + $0x78] sm:$0xf0]  ;;  %v1836_v58 = vor.u32 %v1503_v53, %v1368_v52  ;;  %v1348_v59 = vld [vmem:[%s2269_s1 + $0x40] sm:$0xf]  ;;  %v1498_v60 = vld [vmem:[%s2269_s1 + $0x4c] sm:$0xf0] }
   0xf   :  { %v1496_v61 = vld [vmem:[%s2269_s1 + $0x44] sm:$0xf]  ;;  %v1848_v62 = vor.u32 %v1501_v54, %v1430_v55  ;;  %v1350_v63 = vld [vmem:[%s2269_s1 + $0x50] sm:$0xf0]  ;;  %v1356_v0 = vld [vmem:[%s2269_s1 + $0x48] sm:$0xf]  ;;  %v1866_v5 = vor.u32 %v1498_v60, %v1348_v59 }
  0x10   :  { %184 = vmatpush.bf16.msra.mxu0 %v1794_v44  ;;  %v1499_v1 = vld [vmem:[%s2269_s1 + $0x54] sm:$0xf0]  ;;  %v1497_v2 = vld [vmem:[%s2269_s1 + $0x4c] sm:$0xf]  ;;  %v1426_v4 = vld [vmem:[%s2269_s1 + $0x58] sm:$0xf0]  ;;  %v1876_v10 = vor.u32 %v1496_v61, %v1350_v63 }
  0x11   :  { %197 = vmatpush.bf16.msra.mxu1 %v1798_v45  ;;  %210 = vmatpush.bf16.msra.mxu2 %v1800_v46  ;;  %v1336_v6 = vld [vmem:[%s2269_s1 + $0x20] sm:$0xf]  ;;  %v1494_v9 = vld [vmem:[%s2269_s1 + $0x2c] sm:$0xf0]  ;;  %v1878_v11 = vor.u32 %v1499_v1, %v1356_v0  ;;  %v1492_v13 = vld [vmem:[%s2269_s1 + $0x24] sm:$0xf]  ;;  %v1887_v18 = vor.u32 %v1497_v2, %v1426_v4 }
  0x12   :  { %266 = vmatpush.bf16.msra.mxu3 %v1812_v50  ;;  %v1338_v14 = vld [vmem:[%s2269_s1 + $0x30] sm:$0xf0]  ;;  %v1649_v15 = vmov 0.0   ;;  %v1344_v19 = vld [vmem:[%s2269_s1 + $0x28] sm:$0xf]  ;;  %v1902_v24 = vor.u32 %v1494_v9, %v1336_v6  ;;  %v52_v53 = vld [vmem:[%s2270_s0] sm:$0xff] }
  0x13   :  { %15 = vst [vmem:[#allocation2] sm:$0x3] %v1649_v15  ;;  %v1495_v20 = vld [vmem:[%s2269_s1 + $0x34] sm:$0xf0]  ;;  %v1493_v22 = vld [vmem:[%s2269_s1 + $0x2c] sm:$0xf]  ;;  %v1906_v26 = vor.u32 %v1492_v13, %v1338_v14 }
  0x14   :  { %185 = vmatpush.bf16.msra.mxu0 %v1830_v56  ;;  %16 = vst [vmem:[#allocation3] sm:$0x3] %v1649_v15  ;;  %v1422_v23 = vld [vmem:[%s2269_s1 + $0x38] sm:$0xf0]  ;;  %v1908_v27 = vor.u32 %v1495_v20, %v1344_v19  ;;  %v1324_v28 = vld [vmem:[%s2269_s1] sm:$0xf] }
  0x15   :  { %198 = vmatpush.bf16.msra.mxu1 %v1834_v57  ;;  %211 = vmatpush.bf16.msra.mxu2 %v1836_v58  ;;  %v1490_v30 = vld [vmem:[%s2269_s1 + $0xc] sm:$0xf0]  ;;  %v1488_v31 = vld [vmem:[%s2269_s1 + $0x4] sm:$0xf]  ;;  %v1920_v32 = vor.u32 %v1493_v22, %v1422_v23  ;;  %v1326_v35 = vld [vmem:[%s2269_s1 + $0x10] sm:$0xf0] }
  0x16   :  { %267 = vmatpush.bf16.msra.mxu3 %v1848_v62  ;;  %v1332_v36 = vld [vmem:[%s2269_s1 + $0x8] sm:$0xf]  ;;  %v1491_v37 = vld [vmem:[%s2269_s1 + $0x14] sm:$0xf0]  ;;  %v1489_v39 = vld [vmem:[%s2269_s1 + $0xc] sm:$0xf]  ;;  %v1938_v41 = vor.u32 %v1490_v30, %v1324_v28  ;;  %v1942_v43 = vor.u32 %v1488_v31, %v1326_v35 }
  0x17   :  { %v1418_v40 = vld [vmem:[%s2269_s1 + $0x18] sm:$0xf0]  ;;  %v1944_v47 = vor.u32 %v1491_v37, %v1332_v36  ;;  %v277_v55 = vrot.slane %v52_v53, 6 }
  0x18   :  { %186 = vmatpush.bf16.msra.mxu0 %v1866_v5  ;;  %v1947_v48 = vor.u32 %v1489_v39, %v1418_v40 }
  0x19   :  { %199 = vmatpush.bf16.msra.mxu1 %v1876_v10  ;;  %212 = vmatpush.bf16.msra.mxu2 %v1878_v11 }
  0x1a   :  { %268 = vmatpush.bf16.msra.mxu3 %v1887_v18  ;;  %v49_v42 = vld [vmem:[#allocation2] sm:$0x3] }
  0x1b   :  { %v51_v49 = vpack.c.bf16 %v49_v42, %v49_v42 }
  0x1c   :  { %187 = vmatpush.bf16.msra.mxu0 %v1902_v24 }
  0x1d   :  { %200 = vmatpush.bf16.msra.mxu1 %v1906_v26  ;;  %213 = vmatpush.bf16.msra.mxu2 %v1908_v27 }
  0x1e   :  { %269 = vmatpush.bf16.msra.mxu3 %v1920_v32 }
  0x20   :  { %188 = vmatpush.bf16.msra.mxu0 %v1938_v41 }
  0x21   :  { %201 = vmatpush.bf16.msra.mxu1 %v1942_v43  ;;  %214 = vmatpush.bf16.msra.mxu2 %v1944_v47 }
  0x22   :  { %270 = vmatpush.bf16.msra.mxu3 %v1947_v48 }
  0x23   :  { %189 = vmatmul.bf16.vlgmr.msra.gmra.mxu0 %v51_v49 }
  0x24   :  { %352 = vmatpush.bf16.msrb.mxu0 %v1674_v3  ;;  %202 = vmatmul.bf16.vlgmr.msra.gmra.mxu1 %v51_v49 }
  0x25   :  { %365 = vmatpush.bf16.msrb.mxu1 %v1685_v7  ;;  %215 = vmatmul.bf16.vlgmr.msra.gmra.mxu2 %v51_v49 }
  0x26   :  { %271 = vmatmul.bf16.vlgmr.msra.gmra.mxu3 %v51_v49  ;;  %378 = vmatpush.bf16.msrb.mxu2 %v1687_v8 }
  0x27   :  { %400 = vmatpush.bf16.msrb.mxu3 %v1699_v12 }
  0x28   :  { %353 = vmatpush.bf16.msrb.mxu0 %v1712_v16 }
  0x29   :  { %366 = vmatpush.bf16.msrb.mxu1 %v1714_v17 }
  0x2a   :  { %379 = vmatpush.bf16.msrb.mxu2 %v1726_v21 }
  0x2b   :  { %401 = vmatpush.bf16.msrb.mxu3 %v1737_v25 }
  0x2c   :  { %354 = vmatpush.bf16.msrb.mxu0 %v1749_v29 }
  0x2d   :  { %367 = vmatpush.bf16.msrb.mxu1 %v1762_v33 }
  0x2e   :  { %380 = vmatpush.bf16.msrb.mxu2 %v1764_v34 }
  0x2f   :  { %402 = vmatpush.bf16.msrb.mxu3 %v1776_v38 }
  0x30   :  { %355 = vmatpush.bf16.msrb.mxu0 %v1794_v44 }
  0x31   :  { %368 = vmatpush.bf16.msrb.mxu1 %v1798_v45 }
  0x32   :  { %381 = vmatpush.bf16.msrb.mxu2 %v1800_v46 }
  0x33   :  { %403 = vmatpush.bf16.msrb.mxu3 %v1812_v50 }
  0x34   :  { %356 = vmatpush.bf16.msrb.mxu0 %v1830_v56 }
  0x35   :  { %369 = vmatpush.bf16.msrb.mxu1 %v1834_v57 }
  0x36   :  { %382 = vmatpush.bf16.msrb.mxu2 %v1836_v58 }
  0x37   :  { %404 = vmatpush.bf16.msrb.mxu3 %v1848_v62 }
  0x38   :  { %357 = vmatpush.bf16.msrb.mxu0 %v1866_v5 }
  0x39   :  { %370 = vmatpush.bf16.msrb.mxu1 %v1876_v10 }
  0x3a   :  { %383 = vmatpush.bf16.msrb.mxu2 %v1878_v11 }
  0x3b   :  { %405 = vmatpush.bf16.msrb.mxu3 %v1887_v18 }
  0x3c   :  { %358 = vmatpush.bf16.msrb.mxu0 %v1902_v24 }
  0x3d   :  { %371 = vmatpush.bf16.msrb.mxu1 %v1906_v26 }
  0x3e   :  { %384 = vmatpush.bf16.msrb.mxu2 %v1908_v27 }
  0x3f   :  { %406 = vmatpush.bf16.msrb.mxu3 %v1920_v32 }
  0x40   :  { %359 = vmatpush.bf16.msrb.mxu0 %v1938_v41 }
  0x41   :  { %372 = vmatpush.bf16.msrb.mxu1 %v1942_v43 }
  0x42   :  { %385 = vmatpush.bf16.msrb.mxu2 %v1944_v47 }
  0x43   :  { %407 = vmatpush.bf16.msrb.mxu3 %v1947_v48 }
  0x44   :  { %490 = vmatpush.bf16.msra.mxu0 %v1674_v3 }
  0x45   :  { %503 = vmatpush.bf16.msra.mxu1 %v1685_v7 }
  0x46   :  { %516 = vmatpush.bf16.msra.mxu2 %v1687_v8 }
  0x47   :  { %538 = vmatpush.bf16.msra.mxu3 %v1699_v12 }
  0x48   :  { %491 = vmatpush.bf16.msra.mxu0 %v1712_v16 }
  0x49   :  { %504 = vmatpush.bf16.msra.mxu1 %v1714_v17 }
  0x4a   :  { %517 = vmatpush.bf16.msra.mxu2 %v1726_v21 }
  0x4b   :  { %539 = vmatpush.bf16.msra.mxu3 %v1737_v25 }
  0x4c   :  { %492 = vmatpush.bf16.msra.mxu0 %v1749_v29 }
  0x4d   :  { %505 = vmatpush.bf16.msra.mxu1 %v1762_v33 }
  0x4e   :  { %518 = vmatpush.bf16.msra.mxu2 %v1764_v34 }
  0x4f   :  { %540 = vmatpush.bf16.msra.mxu3 %v1776_v38 }
  0x50   :  { %493 = vmatpush.bf16.msra.mxu0 %v1794_v44 }
  0x51   :  { %506 = vmatpush.bf16.msra.mxu1 %v1798_v45 }
  0x52   :  { %519 = vmatpush.bf16.msra.mxu2 %v1800_v46 }
  0x53   :  { %541 = vmatpush.bf16.msra.mxu3 %v1812_v50 }
  0x54   :  { %494 = vmatpush.bf16.msra.mxu0 %v1830_v56 }
  0x55   :  { %507 = vmatpush.bf16.msra.mxu1 %v1834_v57 }
  0x56   :  { %520 = vmatpush.bf16.msra.mxu2 %v1836_v58 }
  0x57   :  { %542 = vmatpush.bf16.msra.mxu3 %v1848_v62 }
  0x58   :  { %495 = vmatpush.bf16.msra.mxu0 %v1866_v5 }
  0x59   :  { %508 = vmatpush.bf16.msra.mxu1 %v1876_v10 }
  0x5a   :  { %521 = vmatpush.bf16.msra.mxu2 %v1878_v11 }
  0x5b   :  { %543 = vmatpush.bf16.msra.mxu3 %v1887_v18 }
  0x5c   :  { %496 = vmatpush.bf16.msra.mxu0 %v1902_v24 }
  0x5d   :  { %509 = vmatpush.bf16.msra.mxu1 %v1906_v26 }
  0x5e   :  { %522 = vmatpush.bf16.msra.mxu2 %v1908_v27 }
  0x5f   :  { %544 = vmatpush.bf16.msra.mxu3 %v1920_v32 }
  0x60   :  { %497 = vmatpush.bf16.msra.mxu0 %v1938_v41 }
  0x61   :  { %510 = vmatpush.bf16.msra.mxu1 %v1942_v43 }
  0x62   :  { %523 = vmatpush.bf16.msra.mxu2 %v1944_v47 }
  0x63   :  { %545 = vmatpush.bf16.msra.mxu3 %v1947_v48 }
  0xa0   :  { %v190_v51 = vpop.f32.mrf.mxu0 }
  0xa1   :  { %v203_v52 = vpop.f32.mrf.mxu1 }
  0xa2   :  { %v223_v54 = vrot.slane %v203_v52, 6 }
  0xa4   :  { %v226_v59 = vsel %vm225_vm0, %v190_v51, %v223_v54 }
  0xa8   :  { %v216_v60 = vpop.f32.mrf.mxu2  ;;  %v192_v63 = vpop.f32.mrf.mxu0 }
  0xa9   :  { %v224_v61 = vrot.slane %v216_v60, 4  ;;  %v272_v0 = vpop.f32.mrf.mxu3  ;;  %v205_v1 = vpop.f32.mrf.mxu1 }
  0xaa   :  { %v279_v2 = vadd.f32 %v277_v55, %v272_v0 }
  0xab   :  { %v228_v4 = vsel %vm227_vm1, %v226_v59, %v224_v61 }
  0xac   :  { %v230_v6 = vadd.f32 %v228_v4, %v52_v53  ;;  %v1452_v9 = vmul.f32 -1.442695, %v279_v2 }
  0xae   :  { %v1450_v13 = vmul.f32 -1.442695, %v230_v6  ;;  %v300_v14 = vrot.slane %v230_v6, 2  ;;  %1521 = vpow2.f32 %v1452_v9  ;;  %v321_v49 = vrot.slane %v230_v6, 4  ;;  %v50_v9 = vld [vmem:[#allocation3] sm:$0x3] }
  0xb0   :  { %1523 = vpow2.f32 %v1450_v13  ;;  %v1451_v15 = vmul.f32 -1.442695, %v300_v14  ;;  %v218_v19 = vpop.f32.mrf.mxu2 }
  0xb1   :  { %v274_v20 = vpop.f32.mrf.mxu3 }
  0xb2   :  { %1525 = vpow2.f32 %v1451_v15 }
  0xb4   :  { %v1522_v22 = vpop.eup %1521 }
  0xb5   :  { %v330_v30 = vadd.f32 1.0, %v1522_v22 }
  0xb6   :  { %v1524_v23 = vpop.eup %1523 }
  0xb7   :  { %v283_v28 = vadd.f32 1.0, %v1524_v23  ;;  %vm336_vm10 = vweird.f32 %v330_v30 }
  0xb8   :  { %v1526_v31 = vpop.eup %1525 }
  0xb9   :  { %1527 = vrcp.f32 %v283_v28  ;;  %v305_v35 = vadd.f32 1.0, %v1526_v31  ;;  %v295_v53 = vand.u32 2147483648, %v283_v28  ;;  %v293_v55 = vand.u32 2147483647, %v283_v28 }
  0xba   :  { %1529 = vrcp.f32 %v330_v30  ;;  %vm289_vm3 = vweird.f32 %v283_v28 }
  0xbb   :  { %1531 = vrcp.f32 %v305_v35  ;;  %v317_v61 = vand.u32 2147483648, %v305_v35  ;;  %v315_v0 = vand.u32 2147483647, %v305_v35  ;;  %v296_v2 = vor.u32 1.1754944e-38, %v295_v53 }
  0xbc   :  { %1533 = vtanh.f32 %v321_v49  ;;  %vm294_vm6 = vcmp.eq.f32.partialorder %v293_v55, 8.507059e+37  ;;  %vm311_vm7 = vweird.f32 %v305_v35 }
  0xbd   :  { %v318_v14 = vor.u32 1.1754944e-38, %v317_v61  ;;  %vm316_vm9 = vcmp.eq.f32.partialorder %v315_v0, 8.507059e+37 }
  0xbf   :  { %v1528_v36 = vpop.eup %1527 }
  0xc0   :  { %v285_v37 = vmul.f32 %v1528_v36, %v283_v28  ;;  %v1530_v39 = vpop.eup %1529  ;;  %vm290_vm2 = vweird.f32 %v1528_v36 }
  0xc1   :  { %v1532_v40 = vpop.eup %1531  ;;  %v332_v54 = vmul.f32 %v1530_v39, %v330_v30  ;;  %vm291_vm4 = vmor %vm289_vm3, %vm290_vm2  ;;  %vm337_vm11 = vweird.f32 %v1530_v39 }
  0xc2   :  { %v286_v42 = vsub.f32 1.0, %v285_v37  ;;  %v307_v51 = vmul.f32 %v1532_v40, %v305_v35  ;;  %vm312_vm5 = vweird.f32 %v1532_v40  ;;  %v1534_v19 = vpop.eup %1533  ;;  %v340_v37 = vand.u32 2147483647, %v330_v30  ;;  %vm338_vm12 = vmor %vm336_vm10, %vm337_vm11 }
  0xc3   :  { %v333_v4 = vsub.f32 1.0, %v332_v54  ;;  %vm313_vm8 = vmor %vm311_vm7, %vm312_vm5  ;;  %v1453_v54 = vld [vmem:[%s2270_s0 + $0x8] sm:$0xff] }
  0xc4   :  { %v287_v52 = vmul.f32 %v1528_v36, %v286_v42  ;;  %v308_v59 = vsub.f32 1.0, %v307_v51  ;;  %vm341_vm13 = vcmp.eq.f32.partialorder %v340_v37, 8.507059e+37  ;;  %v414_v55 = vrot.slane %v1453_v54, 6 }
  0xc5   :  { %v334_v22 = vmul.f32 %v1530_v39, %v333_v4 }
  0xc6   :  { %v288_v60 = vadd.f32 %v1528_v36, %v287_v52  ;;  %v309_v63 = vmul.f32 %v1532_v40, %v308_v59 }
  0xc7   :  { %v335_v42 = vadd.f32 %v1530_v39, %v334_v22 }
  0xc8   :  { %v292_v1 = vsel %vm291_vm4, %v1528_v36, %v288_v60  ;;  %v310_v6 = vadd.f32 %v1532_v40, %v309_v63  ;;  %v342_v36 = vand.u32 2147483648, %v330_v30 }
  0xc9   :  { %v297_v13 = vsel %vm294_vm6, %v296_v2, %v292_v1  ;;  %v339_v49 = vsel %vm338_vm12, %v1530_v39, %v335_v42 }
  0xca   :  { %v314_v15 = vsel %vm313_vm8, %v1532_v40, %v310_v6  ;;  %v325_v28 = vmul.f32 %v1534_v19, %v297_v13  ;;  %v343_v35 = vor.u32 1.1754944e-38, %v342_v36 }
  0xcb   :  { %v319_v20 = vsel %vm316_vm9, %v318_v14, %v314_v15 }
  0xcc   :  { %v324_v23 = vmul.f32 %v319_v20, %v50_v9  ;;  %v344_v51 = vsel %vm341_vm13, %v343_v35, %v339_v49 }
  0xce   :  { %v2022_v31 = vadd.f32 %v325_v28, %v324_v23 }
  0xd0   :  { %1535 = vtanh.f32 %v2022_v31 }
  0xd6   :  { %v1536_v40 = vpop.eup %1535 }
  0xd7   :  { %v347_v52 = vmul.f32 %v1536_v40, %v344_v51 }
  0xd9   :  { %v348_v53 = vpack.c.bf16 %v347_v52, %v347_v52 }
  0xdb   :  { %349 = vst [vmem:[%s2271_s2] sm:$0x1] %v348_v53  ;;  %360 = vmatmul.bf16.vlgmr.msrb.gmra.mxu0 %v348_v53  ;;  %373 = vmatmul.bf16.vlgmr.msrb.gmra.mxu1 %v348_v53 }
  0xdc   :  { %386 = vmatmul.bf16.vlgmr.msrb.gmra.mxu2 %v348_v53  ;;  %408 = vmatmul.bf16.vlgmr.msrb.gmra.mxu3 %v348_v53 }
  0xdd   :  { %628 = vmatpush.bf16.msrb.mxu0 %v1674_v3  ;;  %641 = vmatpush.bf16.msrb.mxu1 %v1685_v7 }
  0xde   :  { %654 = vmatpush.bf16.msrb.mxu2 %v1687_v8  ;;  %676 = vmatpush.bf16.msrb.mxu3 %v1699_v12 }
  0xe1   :  { %629 = vmatpush.bf16.msrb.mxu0 %v1712_v16  ;;  %642 = vmatpush.bf16.msrb.mxu1 %v1714_v17 }
  0xe2   :  { %655 = vmatpush.bf16.msrb.mxu2 %v1726_v21  ;;  %677 = vmatpush.bf16.msrb.mxu3 %v1737_v25 }
  0xe5   :  { %630 = vmatpush.bf16.msrb.mxu0 %v1749_v29  ;;  %643 = vmatpush.bf16.msrb.mxu1 %v1762_v33 }
  0xe6   :  { %656 = vmatpush.bf16.msrb.mxu2 %v1764_v34  ;;  %678 = vmatpush.bf16.msrb.mxu3 %v1776_v38 }
  0xe9   :  { %631 = vmatpush.bf16.msrb.mxu0 %v1794_v44  ;;  %644 = vmatpush.bf16.msrb.mxu1 %v1798_v45 }
  0xea   :  { %657 = vmatpush.bf16.msrb.mxu2 %v1800_v46  ;;  %679 = vmatpush.bf16.msrb.mxu3 %v1812_v50 }
  0xed   :  { %632 = vmatpush.bf16.msrb.mxu0 %v1830_v56  ;;  %645 = vmatpush.bf16.msrb.mxu1 %v1834_v57 }
  0xee   :  { %658 = vmatpush.bf16.msrb.mxu2 %v1836_v58  ;;  %680 = vmatpush.bf16.msrb.mxu3 %v1848_v62 }
  0xf1   :  { %633 = vmatpush.bf16.msrb.mxu0 %v1866_v5  ;;  %646 = vmatpush.bf16.msrb.mxu1 %v1876_v10 }
  0xf2   :  { %659 = vmatpush.bf16.msrb.mxu2 %v1878_v11  ;;  %681 = vmatpush.bf16.msrb.mxu3 %v1887_v18 }
  0xf5   :  { %634 = vmatpush.bf16.msrb.mxu0 %v1902_v24  ;;  %647 = vmatpush.bf16.msrb.mxu1 %v1906_v26 }
  0xf6   :  { %660 = vmatpush.bf16.msrb.mxu2 %v1908_v27  ;;  %682 = vmatpush.bf16.msrb.mxu3 %v1920_v32 }
  0xf9   :  { %635 = vmatpush.bf16.msrb.mxu0 %v1938_v41  ;;  %648 = vmatpush.bf16.msrb.mxu1 %v1942_v43 }
  0xfa   :  { %661 = vmatpush.bf16.msrb.mxu2 %v1944_v47  ;;  %683 = vmatpush.bf16.msrb.mxu3 %v1947_v48 }
 0x158   :  { %v361_v30 = vpop.f32.mrf.mxu0  ;;  %v374_v39 = vpop.f32.mrf.mxu1 }
 0x159   :  { %v394_v59 = vrot.slane %v374_v39, 6 }
 0x15b   :  { %v396_v4 = vsel %vm225_vm0, %v361_v30, %v394_v59 }
 0x15f   :  { %v387_v60 = vpop.f32.mrf.mxu2  ;;  %v409_v61 = vpop.f32.mrf.mxu3 }
 0x160   :  { %v395_v63 = vrot.slane %v387_v60, 4  ;;  %v416_v0 = vadd.f32 %v414_v55, %v409_v61  ;;  %v363_v1 = vpop.f32.mrf.mxu0  ;;  %v376_v2 = vpop.f32.mrf.mxu1 }
 0x162   :  { %v397_v6 = vsel %vm227_vm1, %v396_v4, %v395_v63  ;;  %v1456_v9 = vmul.f32 -1.442695, %v416_v0 }
 0x163   :  { %v399_v13 = vadd.f32 %v1453_v54, %v397_v6 }
 0x164   :  { %1537 = vpow2.f32 %v1456_v9 }
 0x165   :  { %v1454_v14 = vmul.f32 -1.442695, %v399_v13  ;;  %v437_v15 = vrot.slane %v399_v13, 2  ;;  %v458_v30 = vrot.slane %v399_v13, 4 }
 0x167   :  { %1539 = vpow2.f32 %v1454_v14  ;;  %v1455_v19 = vmul.f32 -1.442695, %v437_v15  ;;  %v389_v20 = vpop.f32.mrf.mxu2  ;;  %v411_v22 = vpop.f32.mrf.mxu3 }
 0x169   :  { %1541 = vpow2.f32 %v1455_v19 }
 0x16a   :  { %v1538_v23 = vpop.eup %1537 }
 0x16b   :  { %v467_v37 = vadd.f32 1.0, %v1538_v23 }
 0x16d   :  { %v1540_v28 = vpop.eup %1539  ;;  %vm473_vm9 = vweird.f32 %v467_v37 }
 0x16e   :  { %v420_v36 = vadd.f32 1.0, %v1540_v28 }
 0x16f   :  { %v1542_v42 = vpop.eup %1541 }
 0x170   :  { %1543 = vrcp.f32 %v420_v36  ;;  %v442_v35 = vadd.f32 1.0, %v1542_v42  ;;  %v432_v55 = vand.u32 2147483648, %v420_v36  ;;  %v430_v60 = vand.u32 2147483647, %v420_v36 }
 0x171   :  { %1545 = vrcp.f32 %v467_v37  ;;  %vm426_vm15 = vweird.f32 %v420_v36 }
 0x172   :  { %1547 = vrcp.f32 %v442_v35  ;;  %v454_v0 = vand.u32 2147483648, %v442_v35  ;;  %v452_v2 = vand.u32 2147483647, %v442_v35  ;;  %v433_v6 = vor.u32 1.1754944e-38, %v432_v55 }
 0x173   :  { %1549 = vtanh.f32 %v458_v30  ;;  %vm431_vm4 = vcmp.eq.f32.partialorder %v430_v60, 8.507059e+37  ;;  %vm448_vm5 = vweird.f32 %v442_v35 }
 0x174   :  { %v455_v15 = vor.u32 1.1754944e-38, %v454_v0  ;;  %vm453_vm7 = vcmp.eq.f32.partialorder %v452_v2, 8.507059e+37 }
 0x176   :  { %v1544_v49 = vpop.eup %1543 }
 0x177   :  { %v422_v40 = vmul.f32 %v1544_v49, %v420_v36  ;;  %v1546_v51 = vpop.eup %1545  ;;  %vm427_vm14 = vweird.f32 %v1544_v49 }
 0x178   :  { %v1548_v52 = vpop.eup %1547  ;;  %v469_v59 = vmul.f32 %v1546_v51, %v467_v37  ;;  %vm428_vm2 = vmor %vm426_vm15, %vm427_vm14  ;;  %vm474_vm8 = vweird.f32 %v1546_v51 }
 0x179   :  { %v423_v53 = vsub.f32 1.0, %v422_v40  ;;  %v444_v39 = vmul.f32 %v1548_v52, %v442_v35  ;;  %vm449_vm3 = vweird.f32 %v1548_v52  ;;  %v1550_v20 = vpop.eup %1549  ;;  %v479_v40 = vand.u32 2147483648, %v467_v37  ;;  %vm475_vm10 = vmor %vm473_vm9, %vm474_vm8 }
 0x17a   :  { %v470_v9 = vsub.f32 1.0, %v469_v59  ;;  %vm450_vm6 = vmor %vm448_vm5, %vm449_vm3  ;;  %v477_v35 = vand.u32 2147483647, %v467_v37 }
 0x17b   :  { %v424_v54 = vmul.f32 %v1544_v49, %v423_v53  ;;  %v445_v61 = vsub.f32 1.0, %v444_v39  ;;  %v480_v30 = vor.u32 1.1754944e-38, %v479_v40 }
 0x17c   :  { %v471_v23 = vmul.f32 %v1546_v51, %v470_v9  ;;  %vm478_vm11 = vcmp.eq.f32.partialorder %v477_v35, 8.507059e+37 }
 0x17d   :  { %v425_v63 = vadd.f32 %v1544_v49, %v424_v54  ;;  %v446_v1 = vmul.f32 %v1548_v52, %v445_v61 }
 0x17f   :  { %v429_v4 = vsel %vm428_vm2, %v1544_v49, %v425_v63  ;;  %v447_v13 = vadd.f32 %v1548_v52, %v446_v1  ;;  %v472_v49 = vadd.f32 %v1546_v51, %v471_v23 }
 0x180   :  { %v434_v14 = vsel %vm431_vm4, %v433_v6, %v429_v4 }
 0x181   :  { %v451_v19 = vsel %vm450_vm6, %v1548_v52, %v447_v13  ;;  %v462_v36 = vmul.f32 %v1550_v20, %v434_v14  ;;  %v476_v53 = vsel %vm475_vm10, %v1546_v51, %v472_v49  ;;  %v1458_v51 = vld [vmem:[%s2270_s0 + $0x10] sm:$0xff] }
 0x182   :  { %v456_v22 = vsel %vm453_vm7, %v455_v15, %v451_v19  ;;  %v481_v39 = vsel %vm478_vm11, %v480_v30, %v476_v53  ;;  %v552_v59 = vrot.slane %v1458_v51, 6 }
 0x183   :  { %v461_v28 = vmul.f32 %v456_v22, %v2022_v31 }
 0x185   :  { %v2066_v42 = vadd.f32 %v462_v36, %v461_v28 }
 0x187   :  { %1551 = vtanh.f32 %v2066_v42 }
 0x18d   :  { %v1552_v52 = vpop.eup %1551 }
 0x18e   :  { %v484_v54 = vmul.f32 %v1552_v52, %v481_v39 }
 0x190   :  { %v485_v55 = vpack.c.bf16 %v484_v54, %v484_v54 }
 0x192   :  { %1457 = vst [vmem:[%s2271_s2 + $0x1] sm:$0x1] %v485_v55  ;;  %498 = vmatmul.bf16.vlgmr.msra.gmra.mxu0 %v485_v55  ;;  %511 = vmatmul.bf16.vlgmr.msra.gmra.mxu1 %v485_v55 }
 0x193   :  { %524 = vmatmul.bf16.vlgmr.msra.gmra.mxu2 %v485_v55  ;;  %546 = vmatmul.bf16.vlgmr.msra.gmra.mxu3 %v485_v55 }
 0x194   :  { %766 = vmatpush.bf16.msra.mxu0 %v1674_v3  ;;  %779 = vmatpush.bf16.msra.mxu1 %v1685_v7 }
 0x195   :  { %792 = vmatpush.bf16.msra.mxu2 %v1687_v8  ;;  %814 = vmatpush.bf16.msra.mxu3 %v1699_v12 }
 0x198   :  { %767 = vmatpush.bf16.msra.mxu0 %v1712_v16  ;;  %780 = vmatpush.bf16.msra.mxu1 %v1714_v17 }
 0x199   :  { %793 = vmatpush.bf16.msra.mxu2 %v1726_v21  ;;  %815 = vmatpush.bf16.msra.mxu3 %v1737_v25 }
 0x19c   :  { %768 = vmatpush.bf16.msra.mxu0 %v1749_v29  ;;  %781 = vmatpush.bf16.msra.mxu1 %v1762_v33 }
 0x19d   :  { %794 = vmatpush.bf16.msra.mxu2 %v1764_v34  ;;  %816 = vmatpush.bf16.msra.mxu3 %v1776_v38 }
 0x1a0   :  { %769 = vmatpush.bf16.msra.mxu0 %v1794_v44  ;;  %782 = vmatpush.bf16.msra.mxu1 %v1798_v45 }
 0x1a1   :  { %795 = vmatpush.bf16.msra.mxu2 %v1800_v46  ;;  %817 = vmatpush.bf16.msra.mxu3 %v1812_v50 }
 0x1a4   :  { %770 = vmatpush.bf16.msra.mxu0 %v1830_v56  ;;  %783 = vmatpush.bf16.msra.mxu1 %v1834_v57 }
 0x1a5   :  { %796 = vmatpush.bf16.msra.mxu2 %v1836_v58  ;;  %818 = vmatpush.bf16.msra.mxu3 %v1848_v62 }
 0x1a8   :  { %771 = vmatpush.bf16.msra.mxu0 %v1866_v5  ;;  %784 = vmatpush.bf16.msra.mxu1 %v1876_v10 }
 0x1a9   :  { %797 = vmatpush.bf16.msra.mxu2 %v1878_v11  ;;  %819 = vmatpush.bf16.msra.mxu3 %v1887_v18 }
 0x1ac   :  { %772 = vmatpush.bf16.msra.mxu0 %v1902_v24  ;;  %785 = vmatpush.bf16.msra.mxu1 %v1906_v26 }
 0x1ad   :  { %798 = vmatpush.bf16.msra.mxu2 %v1908_v27  ;;  %820 = vmatpush.bf16.msra.mxu3 %v1920_v32 }
 0x1b0   :  { %773 = vmatpush.bf16.msra.mxu0 %v1938_v41  ;;  %786 = vmatpush.bf16.msra.mxu1 %v1942_v43 }
 0x1b1   :  { %799 = vmatpush.bf16.msra.mxu2 %v1944_v47  ;;  %821 = vmatpush.bf16.msra.mxu3 %v1947_v48 }
 0x20f   :  { %v499_v31 = vpop.f32.mrf.mxu0  ;;  %v512_v37 = vpop.f32.mrf.mxu1 }
 0x210   :  { %v532_v60 = vrot.slane %v512_v37, 6 }
 0x212   :  { %v534_v6 = vsel %vm225_vm0, %v499_v31, %v532_v60 }
 0x216   :  { %v525_v61 = vpop.f32.mrf.mxu2  ;;  %v547_v63 = vpop.f32.mrf.mxu3 }
 0x217   :  { %v533_v0 = vrot.slane %v525_v61, 4  ;;  %v554_v1 = vadd.f32 %v552_v59, %v547_v63  ;;  %v501_v2 = vpop.f32.mrf.mxu0  ;;  %v514_v4 = vpop.f32.mrf.mxu1 }
 0x219   :  { %v535_v9 = vsel %vm227_vm1, %v534_v6, %v533_v0  ;;  %v1461_v13 = vmul.f32 -1.442695, %v554_v1 }
 0x21a   :  { %v537_v14 = vadd.f32 %v1458_v51, %v535_v9 }
 0x21b   :  { %1553 = vpow2.f32 %v1461_v13 }
 0x21c   :  { %v1459_v15 = vmul.f32 -1.442695, %v537_v14  ;;  %v575_v19 = vrot.slane %v537_v14, 2  ;;  %v596_v31 = vrot.slane %v537_v14, 4 }
 0x21e   :  { %1555 = vpow2.f32 %v1459_v15  ;;  %v1460_v20 = vmul.f32 -1.442695, %v575_v19  ;;  %v527_v22 = vpop.f32.mrf.mxu2  ;;  %v549_v23 = vpop.f32.mrf.mxu3 }
 0x220   :  { %1557 = vpow2.f32 %v1460_v20 }
 0x221   :  { %v1554_v28 = vpop.eup %1553 }
 0x222   :  { %v605_v40 = vadd.f32 1.0, %v1554_v28 }
 0x224   :  { %v1556_v36 = vpop.eup %1555  ;;  %vm611_vm7 = vweird.f32 %v605_v40 }
 0x225   :  { %v558_v49 = vadd.f32 1.0, %v1556_v36 }
 0x226   :  { %v1558_v35 = vpop.eup %1557 }
 0x227   :  { %1559 = vrcp.f32 %v558_v49  ;;  %v580_v53 = vadd.f32 1.0, %v1558_v35  ;;  %v570_v59 = vand.u32 2147483648, %v558_v49  ;;  %v568_v61 = vand.u32 2147483647, %v558_v49 }
 0x228   :  { %1561 = vrcp.f32 %v605_v40  ;;  %vm564_vm13 = vweird.f32 %v558_v49 }
 0x229   :  { %1563 = vrcp.f32 %v580_v53  ;;  %v592_v1 = vand.u32 2147483648, %v580_v53  ;;  %v590_v4 = vand.u32 2147483647, %v580_v53  ;;  %v571_v9 = vor.u32 1.1754944e-38, %v570_v59 }
 0x22a   :  { %1565 = vtanh.f32 %v596_v31  ;;  %vm569_vm2 = vcmp.eq.f32.partialorder %v568_v61, 8.507059e+37  ;;  %vm586_vm3 = vweird.f32 %v580_v53 }
 0x22b   :  { %v593_v19 = vor.u32 1.1754944e-38, %v592_v1  ;;  %vm591_vm5 = vcmp.eq.f32.partialorder %v590_v4, 8.507059e+37 }
 0x22d   :  { %v1560_v30 = vpop.eup %1559 }
 0x22e   :  { %v560_v52 = vmul.f32 %v1560_v30, %v558_v49  ;;  %v1562_v39 = vpop.eup %1561  ;;  %vm565_vm12 = vweird.f32 %v1560_v30 }
 0x22f   :  { %v1564_v54 = vpop.eup %1563  ;;  %v607_v60 = vmul.f32 %v1562_v39, %v605_v40  ;;  %vm566_vm14 = vmor %vm564_vm13, %vm565_vm12  ;;  %vm612_vm6 = vweird.f32 %v1562_v39 }
 0x230   :  { %v561_v55 = vsub.f32 1.0, %v560_v52  ;;  %v582_v37 = vmul.f32 %v1564_v54, %v580_v53  ;;  %vm587_vm15 = vweird.f32 %v1564_v54  ;;  %v1566_v22 = vpop.eup %1565  ;;  %v617_v52 = vand.u32 2147483648, %v605_v40  ;;  %vm613_vm8 = vmor %vm611_vm7, %vm612_vm6 }
 0x231   :  { %v608_v13 = vsub.f32 1.0, %v607_v60  ;;  %vm588_vm4 = vmor %vm586_vm3, %vm587_vm15  ;;  %v615_v53 = vand.u32 2147483647, %v605_v40 }
 0x232   :  { %v562_v51 = vmul.f32 %v1560_v30, %v561_v55  ;;  %v583_v63 = vsub.f32 1.0, %v582_v37  ;;  %v618_v31 = vor.u32 1.1754944e-38, %v617_v52 }
 0x233   :  { %v609_v28 = vmul.f32 %v1562_v39, %v608_v13  ;;  %vm616_vm9 = vcmp.eq.f32.partialorder %v615_v53, 8.507059e+37 }
 0x234   :  { %v563_v0 = vadd.f32 %v1560_v30, %v562_v51  ;;  %v584_v2 = vmul.f32 %v1564_v54, %v583_v63 }
 0x236   :  { %v567_v6 = vsel %vm566_vm14, %v1560_v30, %v563_v0  ;;  %v585_v14 = vadd.f32 %v1564_v54, %v584_v2  ;;  %v610_v30 = vadd.f32 %v1562_v39, %v609_v28 }
 0x237   :  { %v572_v15 = vsel %vm569_vm2, %v571_v9, %v567_v6 }
 0x238   :  { %v589_v20 = vsel %vm588_vm4, %v1564_v54, %v585_v14  ;;  %v600_v49 = vmul.f32 %v1566_v22, %v572_v15  ;;  %v614_v55 = vsel %vm613_vm8, %v1562_v39, %v610_v30  ;;  %v1463_v39 = vld [vmem:[%s2270_s0 + $0x18] sm:$0xff] }
 0x239   :  { %v594_v23 = vsel %vm591_vm5, %v593_v19, %v589_v20  ;;  %v619_v37 = vsel %vm616_vm9, %v618_v31, %v614_v55  ;;  %v690_v60 = vrot.slane %v1463_v39, 6 }
 0x23a   :  { %v599_v36 = vmul.f32 %v594_v23, %v2066_v42 }
 0x23c   :  { %v2110_v35 = vadd.f32 %v600_v49, %v599_v36 }
 0x23e   :  { %1567 = vtanh.f32 %v2110_v35 }
 0x244   :  { %v1568_v54 = vpop.eup %1567 }
 0x245   :  { %v622_v51 = vmul.f32 %v1568_v54, %v619_v37 }
 0x247   :  { %v623_v59 = vpack.c.bf16 %v622_v51, %v622_v51 }
 0x249   :  { %1462 = vst [vmem:[%s2271_s2 + $0x2] sm:$0x1] %v623_v59  ;;  %636 = vmatmul.bf16.vlgmr.msrb.gmra.mxu0 %v623_v59  ;;  %649 = vmatmul.bf16.vlgmr.msrb.gmra.mxu1 %v623_v59 }
 0x24a   :  { %662 = vmatmul.bf16.vlgmr.msrb.gmra.mxu2 %v623_v59  ;;  %684 = vmatmul.bf16.vlgmr.msrb.gmra.mxu3 %v623_v59 }
 0x24b   :  { %904 = vmatpush.bf16.msrb.mxu0 %v1674_v3  ;;  %917 = vmatpush.bf16.msrb.mxu1 %v1685_v7 }
 0x24c   :  { %930 = vmatpush.bf16.msrb.mxu2 %v1687_v8  ;;  %952 = vmatpush.bf16.msrb.mxu3 %v1699_v12 }
 0x24f   :  { %905 = vmatpush.bf16.msrb.mxu0 %v1712_v16  ;;  %918 = vmatpush.bf16.msrb.mxu1 %v1714_v17 }
 0x250   :  { %931 = vmatpush.bf16.msrb.mxu2 %v1726_v21  ;;  %953 = vmatpush.bf16.msrb.mxu3 %v1737_v25 }
 0x253   :  { %906 = vmatpush.bf16.msrb.mxu0 %v1749_v29  ;;  %919 = vmatpush.bf16.msrb.mxu1 %v1762_v33 }
 0x254   :  { %932 = vmatpush.bf16.msrb.mxu2 %v1764_v34  ;;  %954 = vmatpush.bf16.msrb.mxu3 %v1776_v38 }
 0x257   :  { %907 = vmatpush.bf16.msrb.mxu0 %v1794_v44  ;;  %920 = vmatpush.bf16.msrb.mxu1 %v1798_v45 }
 0x258   :  { %933 = vmatpush.bf16.msrb.mxu2 %v1800_v46  ;;  %955 = vmatpush.bf16.msrb.mxu3 %v1812_v50 }
 0x25b   :  { %908 = vmatpush.bf16.msrb.mxu0 %v1830_v56  ;;  %921 = vmatpush.bf16.msrb.mxu1 %v1834_v57 }
 0x25c   :  { %934 = vmatpush.bf16.msrb.mxu2 %v1836_v58  ;;  %956 = vmatpush.bf16.msrb.mxu3 %v1848_v62 }
 0x25f   :  { %909 = vmatpush.bf16.msrb.mxu0 %v1866_v5  ;;  %922 = vmatpush.bf16.msrb.mxu1 %v1876_v10 }
 0x260   :  { %935 = vmatpush.bf16.msrb.mxu2 %v1878_v11  ;;  %957 = vmatpush.bf16.msrb.mxu3 %v1887_v18 }
 0x263   :  { %910 = vmatpush.bf16.msrb.mxu0 %v1902_v24  ;;  %923 = vmatpush.bf16.msrb.mxu1 %v1906_v26 }
 0x264   :  { %936 = vmatpush.bf16.msrb.mxu2 %v1908_v27  ;;  %958 = vmatpush.bf16.msrb.mxu3 %v1920_v32 }
 0x267   :  { %911 = vmatpush.bf16.msrb.mxu0 %v1938_v41  ;;  %924 = vmatpush.bf16.msrb.mxu1 %v1942_v43 }
 0x268   :  { %937 = vmatpush.bf16.msrb.mxu2 %v1944_v47  ;;  %959 = vmatpush.bf16.msrb.mxu3 %v1947_v48 }
 0x2c6   :  { %v637_v42 = vpop.f32.mrf.mxu0  ;;  %v650_v40 = vpop.f32.mrf.mxu1 }
 0x2c7   :  { %v670_v61 = vrot.slane %v650_v40, 6 }
 0x2c9   :  { %v672_v9 = vsel %vm225_vm0, %v637_v42, %v670_v61 }
 0x2cd   :  { %v663_v63 = vpop.f32.mrf.mxu2  ;;  %v685_v0 = vpop.f32.mrf.mxu3 }
 0x2ce   :  { %v671_v1 = vrot.slane %v663_v63, 4  ;;  %v692_v2 = vadd.f32 %v690_v60, %v685_v0  ;;  %v639_v4 = vpop.f32.mrf.mxu0  ;;  %v652_v6 = vpop.f32.mrf.mxu1 }
 0x2d0   :  { %v673_v13 = vsel %vm227_vm1, %v672_v9, %v671_v1  ;;  %v1466_v14 = vmul.f32 -1.442695, %v692_v2 }
 0x2d1   :  { %v675_v15 = vadd.f32 %v1463_v39, %v673_v13 }
 0x2d2   :  { %1569 = vpow2.f32 %v1466_v14 }
 0x2d3   :  { %v1464_v19 = vmul.f32 -1.442695, %v675_v15  ;;  %v713_v20 = vrot.slane %v675_v15, 2  ;;  %v734_v42 = vrot.slane %v675_v15, 4 }
 0x2d5   :  { %1571 = vpow2.f32 %v1464_v19  ;;  %v1465_v22 = vmul.f32 -1.442695, %v713_v20  ;;  %v665_v23 = vpop.f32.mrf.mxu2  ;;  %v687_v28 = vpop.f32.mrf.mxu3 }
 0x2d7   :  { %1573 = vpow2.f32 %v1465_v22 }
 0x2d8   :  { %v1570_v36 = vpop.eup %1569 }
 0x2d9   :  { %v743_v52 = vadd.f32 1.0, %v1570_v36 }
 0x2db   :  { %v1572_v49 = vpop.eup %1571  ;;  %vm749_vm5 = vweird.f32 %v743_v52 }
 0x2dc   :  { %v696_v30 = vadd.f32 1.0, %v1572_v49 }
 0x2dd   :  { %v1574_v53 = vpop.eup %1573 }
 0x2de   :  { %1575 = vrcp.f32 %v696_v30  ;;  %v718_v55 = vadd.f32 1.0, %v1574_v53  ;;  %v708_v60 = vand.u32 2147483648, %v696_v30  ;;  %v706_v63 = vand.u32 2147483647, %v696_v30 }
 0x2df   :  { %1577 = vrcp.f32 %v743_v52  ;;  %vm702_vm11 = vweird.f32 %v696_v30 }
 0x2e0   :  { %1579 = vrcp.f32 %v718_v55  ;;  %v730_v2 = vand.u32 2147483648, %v718_v55  ;;  %v728_v6 = vand.u32 2147483647, %v718_v55  ;;  %v709_v13 = vor.u32 1.1754944e-38, %v708_v60 }
 0x2e1   :  { %1581 = vtanh.f32 %v734_v42  ;;  %vm707_vm14 = vcmp.eq.f32.partialorder %v706_v63, 8.507059e+37  ;;  %vm724_vm15 = vweird.f32 %v718_v55 }
 0x2e2   :  { %v731_v20 = vor.u32 1.1754944e-38, %v730_v2  ;;  %vm729_vm3 = vcmp.eq.f32.partialorder %v728_v6, 8.507059e+37 }
 0x2e4   :  { %v1576_v31 = vpop.eup %1575 }
 0x2e5   :  { %v698_v54 = vmul.f32 %v1576_v31, %v696_v30  ;;  %v1578_v37 = vpop.eup %1577  ;;  %vm703_vm10 = vweird.f32 %v1576_v31 }
 0x2e6   :  { %v1580_v51 = vpop.eup %1579  ;;  %v745_v61 = vmul.f32 %v1578_v37, %v743_v52  ;;  %vm704_vm12 = vmor %vm702_vm11, %vm703_vm10  ;;  %vm750_vm4 = vweird.f32 %v1578_v37 }
 0x2e7   :  { %v699_v59 = vsub.f32 1.0, %v698_v54  ;;  %v720_v40 = vmul.f32 %v1580_v51, %v718_v55  ;;  %vm725_vm13 = vweird.f32 %v1580_v51  ;;  %v1582_v23 = vpop.eup %1581  ;;  %v755_v54 = vand.u32 2147483648, %v743_v52  ;;  %vm751_vm6 = vmor %vm749_vm5, %vm750_vm4 }
 0x2e8   :  { %v746_v14 = vsub.f32 1.0, %v745_v61  ;;  %vm726_vm2 = vmor %vm724_vm15, %vm725_vm13  ;;  %v753_v55 = vand.u32 2147483647, %v743_v52 }
 0x2e9   :  { %v700_v39 = vmul.f32 %v1576_v31, %v699_v59  ;;  %v721_v0 = vsub.f32 1.0, %v720_v40  ;;  %v756_v42 = vor.u32 1.1754944e-38, %v755_v54 }
 0x2ea   :  { %v747_v36 = vmul.f32 %v1578_v37, %v746_v14  ;;  %vm754_vm7 = vcmp.eq.f32.partialorder %v753_v55, 8.507059e+37 }
 0x2eb   :  { %v701_v1 = vadd.f32 %v1576_v31, %v700_v39  ;;  %v722_v4 = vmul.f32 %v1580_v51, %v721_v0 }
 0x2ed   :  { %v705_v9 = vsel %vm704_vm12, %v1576_v31, %v701_v1  ;;  %v723_v15 = vadd.f32 %v1580_v51, %v722_v4  ;;  %v748_v31 = vadd.f32 %v1578_v37, %v747_v36 }
 0x2ee   :  { %v710_v19 = vsel %vm707_vm14, %v709_v13, %v705_v9 }
 0x2ef   :  { %v727_v22 = vsel %vm726_vm2, %v1580_v51, %v723_v15  ;;  %v738_v30 = vmul.f32 %v1582_v23, %v710_v19  ;;  %v752_v59 = vsel %vm751_vm6, %v1578_v37, %v748_v31  ;;  %v1468_v37 = vld [vmem:[%s2270_s0 + $0x20] sm:$0xff] }
 0x2f0   :  { %v732_v28 = vsel %vm729_vm3, %v731_v20, %v727_v22  ;;  %v757_v40 = vsel %vm754_vm7, %v756_v42, %v752_v59  ;;  %v828_v61 = vrot.slane %v1468_v37, 6 }
 0x2f1   :  { %v737_v49 = vmul.f32 %v732_v28, %v2110_v35 }
 0x2f3   :  { %v2154_v53 = vadd.f32 %v738_v30, %v737_v49 }
 0x2f5   :  { %1583 = vtanh.f32 %v2154_v53 }
 0x2fb   :  { %v1584_v51 = vpop.eup %1583 }
 0x2fc   :  { %v760_v39 = vmul.f32 %v1584_v51, %v757_v40 }
 0x2fe   :  { %v761_v60 = vpack.c.bf16 %v760_v39, %v760_v39 }
 0x300   :  { %1467 = vst [vmem:[%s2271_s2 + $0x3] sm:$0x1] %v761_v60  ;;  %774 = vmatmul.bf16.vlgmr.msra.gmra.mxu0 %v761_v60  ;;  %787 = vmatmul.bf16.vlgmr.msra.gmra.mxu1 %v761_v60 }
 0x301   :  { %800 = vmatmul.bf16.vlgmr.msra.gmra.mxu2 %v761_v60  ;;  %822 = vmatmul.bf16.vlgmr.msra.gmra.mxu3 %v761_v60 }
 0x302   :  { %1042 = vmatpush.bf16.msra.mxu0 %v1674_v3  ;;  %1055 = vmatpush.bf16.msra.mxu1 %v1685_v7 }
 0x303   :  { %1068 = vmatpush.bf16.msra.mxu2 %v1687_v8  ;;  %1090 = vmatpush.bf16.msra.mxu3 %v1699_v12 }
 0x306   :  { %1043 = vmatpush.bf16.msra.mxu0 %v1712_v16  ;;  %1056 = vmatpush.bf16.msra.mxu1 %v1714_v17 }
 0x307   :  { %1069 = vmatpush.bf16.msra.mxu2 %v1726_v21  ;;  %1091 = vmatpush.bf16.msra.mxu3 %v1737_v25 }
 0x30a   :  { %1044 = vmatpush.bf16.msra.mxu0 %v1749_v29  ;;  %1057 = vmatpush.bf16.msra.mxu1 %v1762_v33 }
 0x30b   :  { %1070 = vmatpush.bf16.msra.mxu2 %v1764_v34  ;;  %1092 = vmatpush.bf16.msra.mxu3 %v1776_v38 }
 0x30e   :  { %1045 = vmatpush.bf16.msra.mxu0 %v1794_v44  ;;  %1058 = vmatpush.bf16.msra.mxu1 %v1798_v45 }
 0x30f   :  { %1071 = vmatpush.bf16.msra.mxu2 %v1800_v46  ;;  %1093 = vmatpush.bf16.msra.mxu3 %v1812_v50 }
 0x312   :  { %1046 = vmatpush.bf16.msra.mxu0 %v1830_v56  ;;  %1059 = vmatpush.bf16.msra.mxu1 %v1834_v57 }
 0x313   :  { %1072 = vmatpush.bf16.msra.mxu2 %v1836_v58  ;;  %1094 = vmatpush.bf16.msra.mxu3 %v1848_v62 }
 0x316   :  { %1047 = vmatpush.bf16.msra.mxu0 %v1866_v5  ;;  %1060 = vmatpush.bf16.msra.mxu1 %v1876_v10 }
 0x317   :  { %1073 = vmatpush.bf16.msra.mxu2 %v1878_v11  ;;  %1095 = vmatpush.bf16.msra.mxu3 %v1887_v18 }
 0x31a   :  { %1048 = vmatpush.bf16.msra.mxu0 %v1902_v24  ;;  %1061 = vmatpush.bf16.msra.mxu1 %v1906_v26 }
 0x31b   :  { %1074 = vmatpush.bf16.msra.mxu2 %v1908_v27  ;;  %1096 = vmatpush.bf16.msra.mxu3 %v1920_v32 }
 0x31e   :  { %1049 = vmatpush.bf16.msra.mxu0 %v1938_v41  ;;  %1062 = vmatpush.bf16.msra.mxu1 %v1942_v43 }
 0x31f   :  { %1075 = vmatpush.bf16.msra.mxu2 %v1944_v47  ;;  %1097 = vmatpush.bf16.msra.mxu3 %v1947_v48 }
 0x37d   :  { %v775_v35 = vpop.f32.mrf.mxu0  ;;  %v788_v52 = vpop.f32.mrf.mxu1 }
 0x37e   :  { %v808_v63 = vrot.slane %v788_v52, 6 }
 0x380   :  { %v810_v13 = vsel %vm225_vm0, %v775_v35, %v808_v63 }
 0x384   :  { %v801_v0 = vpop.f32.mrf.mxu2  ;;  %v823_v1 = vpop.f32.mrf.mxu3 }
 0x385   :  { %v809_v2 = vrot.slane %v801_v0, 4  ;;  %v830_v4 = vadd.f32 %v828_v61, %v823_v1  ;;  %v777_v6 = vpop.f32.mrf.mxu0  ;;  %v790_v9 = vpop.f32.mrf.mxu1 }
 0x387   :  { %v811_v14 = vsel %vm227_vm1, %v810_v13, %v809_v2  ;;  %v1471_v15 = vmul.f32 -1.442695, %v830_v4 }
 0x388   :  { %v813_v19 = vadd.f32 %v1468_v37, %v811_v14 }
 0x389   :  { %1585 = vpow2.f32 %v1471_v15 }
 0x38a   :  { %v1469_v20 = vmul.f32 -1.442695, %v813_v19  ;;  %v851_v22 = vrot.slane %v813_v19, 2  ;;  %v872_v35 = vrot.slane %v813_v19, 4 }
 0x38c   :  { %1587 = vpow2.f32 %v1469_v20  ;;  %v1470_v23 = vmul.f32 -1.442695, %v851_v22  ;;  %v803_v28 = vpop.f32.mrf.mxu2  ;;  %v825_v36 = vpop.f32.mrf.mxu3 }
 0x38e   :  { %1589 = vpow2.f32 %v1470_v23 }
 0x38f   :  { %v1586_v49 = vpop.eup %1585 }
 0x390   :  { %v881_v54 = vadd.f32 1.0, %v1586_v49 }
 0x392   :  { %v1588_v30 = vpop.eup %1587  ;;  %vm887_vm3 = vweird.f32 %v881_v54 }
 0x393   :  { %v834_v31 = vadd.f32 1.0, %v1588_v30 }
 0x394   :  { %v1590_v55 = vpop.eup %1589 }
 0x395   :  { %1591 = vrcp.f32 %v834_v31  ;;  %v856_v59 = vadd.f32 1.0, %v1590_v55  ;;  %v846_v61 = vand.u32 2147483648, %v834_v31  ;;  %v844_v0 = vand.u32 2147483647, %v834_v31 }
 0x396   :  { %1593 = vrcp.f32 %v881_v54  ;;  %vm840_vm9 = vweird.f32 %v834_v31 }
 0x397   :  { %1595 = vrcp.f32 %v856_v59  ;;  %v868_v4 = vand.u32 2147483648, %v856_v59  ;;  %v866_v9 = vand.u32 2147483647, %v856_v59  ;;  %v847_v14 = vor.u32 1.1754944e-38, %v846_v61 }
 0x398   :  { %1597 = vtanh.f32 %v872_v35  ;;  %vm845_vm12 = vcmp.eq.f32.partialorder %v844_v0, 8.507059e+37  ;;  %vm862_vm13 = vweird.f32 %v856_v59 }
 0x399   :  { %v869_v22 = vor.u32 1.1754944e-38, %v868_v4  ;;  %vm867_vm15 = vcmp.eq.f32.partialorder %v866_v9, 8.507059e+37 }
 0x39b   :  { %v1592_v42 = vpop.eup %1591 }
 0x39c   :  { %v836_v51 = vmul.f32 %v1592_v42, %v834_v31  ;;  %v1594_v40 = vpop.eup %1593  ;;  %vm841_vm8 = vweird.f32 %v1592_v42 }
 0x39d   :  { %v1596_v39 = vpop.eup %1595  ;;  %v883_v63 = vmul.f32 %v1594_v40, %v881_v54  ;;  %vm842_vm10 = vmor %vm840_vm9, %vm841_vm8  ;;  %vm888_vm2 = vweird.f32 %v1594_v40 }
 0x39e   :  { %v837_v60 = vsub.f32 1.0, %v836_v51  ;;  %v858_v52 = vmul.f32 %v1596_v39, %v856_v59  ;;  %vm863_vm11 = vweird.f32 %v1596_v39  ;;  %v1598_v28 = vpop.eup %1597  ;;  %v893_v51 = vand.u32 2147483648, %v881_v54  ;;  %vm889_vm4 = vmor %vm887_vm3, %vm888_vm2 }
 0x39f   :  { %v884_v15 = vsub.f32 1.0, %v883_v63  ;;  %vm864_vm14 = vmor %vm862_vm13, %vm863_vm11  ;;  %v891_v59 = vand.u32 2147483647, %v881_v54 }
 0x3a0   :  { %v838_v37 = vmul.f32 %v1592_v42, %v837_v60  ;;  %v859_v1 = vsub.f32 1.0, %v858_v52  ;;  %v894_v35 = vor.u32 1.1754944e-38, %v893_v51 }
 0x3a1   :  { %v885_v49 = vmul.f32 %v1594_v40, %v884_v15  ;;  %vm892_vm5 = vcmp.eq.f32.partialorder %v891_v59, 8.507059e+37 }
 0x3a2   :  { %v839_v2 = vadd.f32 %v1592_v42, %v838_v37  ;;  %v860_v6 = vmul.f32 %v1596_v39, %v859_v1 }
 0x3a4   :  { %v843_v13 = vsel %vm842_vm10, %v1592_v42, %v839_v2  ;;  %v861_v19 = vadd.f32 %v1596_v39, %v860_v6  ;;  %v886_v42 = vadd.f32 %v1594_v40, %v885_v49 }
 0x3a5   :  { %v848_v20 = vsel %vm845_vm12, %v847_v14, %v843_v13 }
 0x3a6   :  { %v865_v23 = vsel %vm864_vm14, %v1596_v39, %v861_v19  ;;  %v876_v31 = vmul.f32 %v1598_v28, %v848_v20  ;;  %v890_v60 = vsel %vm889_vm4, %v1594_v40, %v886_v42 }
 0x3a7   :  { %v870_v36 = vsel %vm867_vm15, %v869_v22, %v865_v23  ;;  %v895_v52 = vsel %vm892_vm5, %v894_v35, %v890_v60 }
 0x3a8   :  { %v875_v30 = vmul.f32 %v870_v36, %v2154_v53 }
 0x3aa   :  { %v2198_v55 = vadd.f32 %v876_v31, %v875_v30 }
 0x3ac   :  { %1599 = vtanh.f32 %v2198_v55 }
 0x3b2   :  { %v1600_v39 = vpop.eup %1599 }
 0x3b3   :  { %v898_v37 = vmul.f32 %v1600_v39, %v895_v52 }
 0x3b5   :  { %v899_v61 = vpack.c.bf16 %v898_v37, %v898_v37 }
 0x3b7   :  { %1472 = vst [vmem:[%s2271_s2 + $0x4] sm:$0x1] %v899_v61  ;;  %912 = vmatmul.bf16.vlgmr.msrb.gmra.mxu0 %v899_v61  ;;  %925 = vmatmul.bf16.vlgmr.msrb.gmra.mxu1 %v899_v61 }
 0x3b8   :  { %938 = vmatmul.bf16.vlgmr.msrb.gmra.mxu2 %v899_v61  ;;  %960 = vmatmul.bf16.vlgmr.msrb.gmra.mxu3 %v899_v61 }
 0x3b9   :  { %1180 = vmatpush.bf16.msrb.mxu0 %v1674_v3  ;;  %1193 = vmatpush.bf16.msrb.mxu1 %v1685_v7 }
 0x3ba   :  { %1206 = vmatpush.bf16.msrb.mxu2 %v1687_v8  ;;  %1228 = vmatpush.bf16.msrb.mxu3 %v1699_v12  ;;  %v1473_v8 = vld [vmem:[%s2270_s0 + $0x28] sm:$0xff] }
 0x3bb   :  { %v966_v12 = vrot.slane %v1473_v8, 6 }
 0x3bd   :  { %1181 = vmatpush.bf16.msrb.mxu0 %v1712_v16  ;;  %1194 = vmatpush.bf16.msrb.mxu1 %v1714_v17 }
 0x3be   :  { %1207 = vmatpush.bf16.msrb.mxu2 %v1726_v21  ;;  %1229 = vmatpush.bf16.msrb.mxu3 %v1737_v25 }
 0x3c1   :  { %1182 = vmatpush.bf16.msrb.mxu0 %v1749_v29  ;;  %1195 = vmatpush.bf16.msrb.mxu1 %v1762_v33 }
 0x3c2   :  { %1208 = vmatpush.bf16.msrb.mxu2 %v1764_v34  ;;  %1230 = vmatpush.bf16.msrb.mxu3 %v1776_v38 }
 0x3c5   :  { %1183 = vmatpush.bf16.msrb.mxu0 %v1794_v44  ;;  %1196 = vmatpush.bf16.msrb.mxu1 %v1798_v45 }
 0x3c6   :  { %1209 = vmatpush.bf16.msrb.mxu2 %v1800_v46  ;;  %1231 = vmatpush.bf16.msrb.mxu3 %v1812_v50 }
 0x3c9   :  { %1184 = vmatpush.bf16.msrb.mxu0 %v1830_v56  ;;  %1197 = vmatpush.bf16.msrb.mxu1 %v1834_v57 }
 0x3ca   :  { %1210 = vmatpush.bf16.msrb.mxu2 %v1836_v58  ;;  %1232 = vmatpush.bf16.msrb.mxu3 %v1848_v62 }
 0x3cd   :  { %1185 = vmatpush.bf16.msrb.mxu0 %v1866_v5  ;;  %1198 = vmatpush.bf16.msrb.mxu1 %v1876_v10 }
 0x3ce   :  { %1211 = vmatpush.bf16.msrb.mxu2 %v1878_v11  ;;  %1233 = vmatpush.bf16.msrb.mxu3 %v1887_v18 }
 0x3d1   :  { %1186 = vmatpush.bf16.msrb.mxu0 %v1902_v24  ;;  %1199 = vmatpush.bf16.msrb.mxu1 %v1906_v26 }
 0x3d2   :  { %1212 = vmatpush.bf16.msrb.mxu2 %v1908_v27  ;;  %1234 = vmatpush.bf16.msrb.mxu3 %v1920_v32 }
 0x3d5   :  { %1187 = vmatpush.bf16.msrb.mxu0 %v1938_v41  ;;  %1200 = vmatpush.bf16.msrb.mxu1 %v1942_v43 }
 0x3d6   :  { %1213 = vmatpush.bf16.msrb.mxu2 %v1944_v47  ;;  %1235 = vmatpush.bf16.msrb.mxu3 %v1947_v48 }
 0x434   :  { %v913_v3 = vpop.f32.mrf.mxu0  ;;  %v926_v7 = vpop.f32.mrf.mxu1 }
 0x435   :  { %v946_v16 = vrot.slane %v926_v7, 6 }
 0x437   :  { %v948_v38 = vsel %vm225_vm0, %v913_v3, %v946_v16 }
 0x43b   :  { %v939_v17 = vpop.f32.mrf.mxu2  ;;  %v961_v21 = vpop.f32.mrf.mxu3 }
 0x43c   :  { %v947_v25 = vrot.slane %v939_v17, 4  ;;  %v968_v29 = vadd.f32 %v966_v12, %v961_v21  ;;  %v915_v33 = vpop.f32.mrf.mxu0  ;;  %v928_v34 = vpop.f32.mrf.mxu1 }
 0x43e   :  { %v949_v44 = vsel %vm227_vm1, %v948_v38, %v947_v25  ;;  %v1476_v45 = vmul.f32 -1.442695, %v968_v29 }
 0x43f   :  { %v951_v46 = vadd.f32 %v1473_v8, %v949_v44  ;;  %v1478_v8 = vld [vmem:[%s2270_s0 + $0x30] sm:$0xff] }
 0x440   :  { %1601 = vpow2.f32 %v1476_v45  ;;  %v1104_v12 = vrot.slane %v1478_v8, 6 }
 0x441   :  { %v1474_v50 = vmul.f32 -1.442695, %v951_v46  ;;  %v989_v56 = vrot.slane %v951_v46, 2  ;;  %v1010_v48 = vrot.slane %v951_v46, 4 }
 0x443   :  { %1603 = vpow2.f32 %v1474_v50  ;;  %v1475_v57 = vmul.f32 -1.442695, %v989_v56  ;;  %v941_v58 = vpop.f32.mrf.mxu2  ;;  %v963_v62 = vpop.f32.mrf.mxu3 }
 0x445   :  { %1605 = vpow2.f32 %v1475_v57 }
 0x446   :  { %v1602_v5 = vpop.eup %1601 }
 0x447   :  { %v1019_v18 = vadd.f32 1.0, %v1602_v5 }
 0x449   :  { %v1604_v10 = vpop.eup %1603  ;;  %v1031_v59 = vand.u32 2147483648, %v1019_v18  ;;  %vm1025_vm15 = vweird.f32 %v1019_v18  ;;  %v1029_v60 = vand.u32 2147483647, %v1019_v18 }
 0x44a   :  { %v972_v11 = vadd.f32 1.0, %v1604_v10 }
 0x44b   :  { %v1606_v24 = vpop.eup %1605  ;;  %v1032_v39 = vor.u32 1.1754944e-38, %v1031_v59  ;;  %vm1030_vm3 = vcmp.eq.f32.partialorder %v1029_v60, 8.507059e+37 }
 0x44c   :  { %1607 = vrcp.f32 %v972_v11  ;;  %v994_v26 = vadd.f32 1.0, %v1606_v24  ;;  %v984_v40 = vand.u32 2147483648, %v972_v11  ;;  %v982_v0 = vand.u32 2147483647, %v972_v11 }
 0x44d   :  { %1609 = vrcp.f32 %v1019_v18  ;;  %vm978_vm7 = vweird.f32 %v972_v11 }
 0x44e   :  { %1611 = vrcp.f32 %v994_v26  ;;  %v1006_v4 = vand.u32 2147483648, %v994_v26  ;;  %v1004_v9 = vand.u32 2147483647, %v994_v26  ;;  %v985_v14 = vor.u32 1.1754944e-38, %v984_v40 }
 0x44f   :  { %1613 = vtanh.f32 %v1010_v48  ;;  %vm983_vm10 = vcmp.eq.f32.partialorder %v982_v0, 8.507059e+37  ;;  %vm1000_vm11 = vweird.f32 %v994_v26 }
 0x450   :  { %v1007_v22 = vor.u32 1.1754944e-38, %v1006_v4  ;;  %vm1005_vm13 = vcmp.eq.f32.partialorder %v1004_v9, 8.507059e+37 }
 0x452   :  { %v1608_v27 = vpop.eup %1607 }
 0x453   :  { %v974_v32 = vmul.f32 %v1608_v27, %v972_v11  ;;  %v1610_v41 = vpop.eup %1609  ;;  %vm979_vm6 = vweird.f32 %v1608_v27 }
 0x454   :  { %v1612_v43 = vpop.eup %1611  ;;  %v1021_v63 = vmul.f32 %v1610_v41, %v1019_v18  ;;  %vm980_vm8 = vmor %vm978_vm7, %vm979_vm6  ;;  %vm1026_vm14 = vweird.f32 %v1610_v41 }
 0x455   :  { %v975_v47 = vsub.f32 1.0, %v974_v32  ;;  %v996_v53 = vmul.f32 %v1612_v43, %v994_v26  ;;  %vm1001_vm9 = vweird.f32 %v1612_v43  ;;  %v1614_v28 = vpop.eup %1613  ;;  %vm1027_vm2 = vmor %vm1025_vm15, %vm1026_vm14 }
 0x456   :  { %v1022_v15 = vsub.f32 1.0, %v1021_v63  ;;  %vm1002_vm12 = vmor %vm1000_vm11, %vm1001_vm9 }
 0x457   :  { %v976_v54 = vmul.f32 %v1608_v27, %v975_v47  ;;  %v997_v1 = vsub.f32 1.0, %v996_v53 }
 0x458   :  { %v1023_v49 = vmul.f32 %v1610_v41, %v1022_v15 }
 0x459   :  { %v977_v2 = vadd.f32 %v1608_v27, %v976_v54  ;;  %v998_v6 = vmul.f32 %v1612_v43, %v997_v1 }
 0x45a   :  { %v1024_v51 = vadd.f32 %v1610_v41, %v1023_v49 }
 0x45b   :  { %v981_v13 = vsel %vm980_vm8, %v1608_v27, %v977_v2  ;;  %v999_v19 = vadd.f32 %v1612_v43, %v998_v6 }
 0x45c   :  { %v986_v20 = vsel %vm983_vm10, %v985_v14, %v981_v13  ;;  %v1028_v35 = vsel %vm1027_vm2, %v1610_v41, %v1024_v51 }
 0x45d   :  { %v1003_v23 = vsel %vm1002_vm12, %v1612_v43, %v999_v19  ;;  %v1014_v31 = vmul.f32 %v1614_v28, %v986_v20  ;;  %v1033_v37 = vsel %vm1030_vm3, %v1032_v39, %v1028_v35 }
 0x45e   :  { %v1008_v36 = vsel %vm1005_vm13, %v1007_v22, %v1003_v23 }
 0x45f   :  { %v1013_v30 = vmul.f32 %v1008_v36, %v2198_v55 }
 0x461   :  { %v2242_v42 = vadd.f32 %v1014_v31, %v1013_v30 }
 0x463   :  { %1615 = vtanh.f32 %v2242_v42 }
 0x469   :  { %v1616_v52 = vpop.eup %1615 }
 0x46a   :  { %v1036_v61 = vmul.f32 %v1616_v52, %v1033_v37 }
 0x46c   :  { %v1037_v3 = vpack.c.bf16 %v1036_v61, %v1036_v61 }
 0x46e   :  { %1477 = vst [vmem:[%s2271_s2 + $0x5] sm:$0x1] %v1037_v3  ;;  %1050 = vmatmul.bf16.vlgmr.msra.gmra.mxu0 %v1037_v3  ;;  %1063 = vmatmul.bf16.vlgmr.msra.gmra.mxu1 %v1037_v3 }
 0x46f   :  { %1076 = vmatmul.bf16.vlgmr.msra.gmra.mxu2 %v1037_v3  ;;  %1098 = vmatmul.bf16.vlgmr.msra.gmra.mxu3 %v1037_v3 }
 0x4eb   :  { %v1051_v55 = vpop.f32.mrf.mxu0  ;;  %v1064_v7 = vpop.f32.mrf.mxu1 }
 0x4ec   :  { %v1084_v16 = vrot.slane %v1064_v7, 6 }
 0x4ee   :  { %v1086_v38 = vsel %vm225_vm0, %v1051_v55, %v1084_v16 }
 0x4f2   :  { %v1077_v17 = vpop.f32.mrf.mxu2  ;;  %v1099_v21 = vpop.f32.mrf.mxu3 }
 0x4f3   :  { %v1085_v25 = vrot.slane %v1077_v17, 4  ;;  %v1106_v29 = vadd.f32 %v1104_v12, %v1099_v21  ;;  %v1053_v33 = vpop.f32.mrf.mxu0  ;;  %v1066_v34 = vpop.f32.mrf.mxu1 }
 0x4f5   :  { %v1087_v44 = vsel %vm227_vm1, %v1086_v38, %v1085_v25  ;;  %v1481_v45 = vmul.f32 -1.442695, %v1106_v29 }
 0x4f6   :  { %v1089_v46 = vadd.f32 %v1478_v8, %v1087_v44  ;;  %v1483_v8 = vld [vmem:[%s2270_s0 + $0x38] sm:$0xff] }
 0x4f7   :  { %1617 = vpow2.f32 %v1481_v45  ;;  %v1242_v12 = vrot.slane %v1483_v8, 6 }
 0x4f8   :  { %v1479_v50 = vmul.f32 -1.442695, %v1089_v46  ;;  %v1127_v56 = vrot.slane %v1089_v46, 2  ;;  %v1148_v48 = vrot.slane %v1089_v46, 4 }
 0x4fa   :  { %1619 = vpow2.f32 %v1479_v50  ;;  %v1480_v57 = vmul.f32 -1.442695, %v1127_v56  ;;  %v1079_v58 = vpop.f32.mrf.mxu2  ;;  %v1101_v62 = vpop.f32.mrf.mxu3 }
 0x4fc   :  { %1621 = vpow2.f32 %v1480_v57 }
 0x4fd   :  { %v1618_v5 = vpop.eup %1617 }
 0x4fe   :  { %v1157_v18 = vadd.f32 1.0, %v1618_v5 }
 0x500   :  { %v1620_v10 = vpop.eup %1619  ;;  %v1169_v60 = vand.u32 2147483648, %v1157_v18  ;;  %vm1163_vm13 = vweird.f32 %v1157_v18  ;;  %v1167_v35 = vand.u32 2147483647, %v1157_v18 }
 0x501   :  { %v1110_v11 = vadd.f32 1.0, %v1620_v10 }
 0x502   :  { %v1622_v24 = vpop.eup %1621  ;;  %v1170_v52 = vor.u32 1.1754944e-38, %v1169_v60  ;;  %vm1168_vm15 = vcmp.eq.f32.partialorder %v1167_v35, 8.507059e+37 }
 0x503   :  { %1623 = vrcp.f32 %v1110_v11  ;;  %v1132_v26 = vadd.f32 1.0, %v1622_v24  ;;  %v1122_v40 = vand.u32 2147483648, %v1110_v11  ;;  %v1120_v0 = vand.u32 2147483647, %v1110_v11 }
 0x504   :  { %1625 = vrcp.f32 %v1157_v18  ;;  %vm1116_vm5 = vweird.f32 %v1110_v11 }
 0x505   :  { %1627 = vrcp.f32 %v1132_v26  ;;  %v1144_v4 = vand.u32 2147483648, %v1132_v26  ;;  %v1142_v9 = vand.u32 2147483647, %v1132_v26  ;;  %v1123_v14 = vor.u32 1.1754944e-38, %v1122_v40 }
 0x506   :  { %1629 = vtanh.f32 %v1148_v48  ;;  %vm1121_vm8 = vcmp.eq.f32.partialorder %v1120_v0, 8.507059e+37  ;;  %vm1138_vm9 = vweird.f32 %v1132_v26 }
 0x507   :  { %v1145_v22 = vor.u32 1.1754944e-38, %v1144_v4  ;;  %vm1143_vm11 = vcmp.eq.f32.partialorder %v1142_v9, 8.507059e+37 }
 0x509   :  { %v1624_v27 = vpop.eup %1623 }
 0x50a   :  { %v1112_v32 = vmul.f32 %v1624_v27, %v1110_v11  ;;  %v1626_v41 = vpop.eup %1625  ;;  %vm1117_vm4 = vweird.f32 %v1624_v27 }
 0x50b   :  { %v1628_v43 = vpop.eup %1627  ;;  %v1159_v63 = vmul.f32 %v1626_v41, %v1157_v18  ;;  %vm1118_vm6 = vmor %vm1116_vm5, %vm1117_vm4  ;;  %vm1164_vm12 = vweird.f32 %v1626_v41 }
 0x50c   :  { %v1113_v47 = vsub.f32 1.0, %v1112_v32  ;;  %v1134_v53 = vmul.f32 %v1628_v43, %v1132_v26  ;;  %vm1139_vm7 = vweird.f32 %v1628_v43  ;;  %v1630_v28 = vpop.eup %1629  ;;  %vm1165_vm14 = vmor %vm1163_vm13, %vm1164_vm12 }
 0x50d   :  { %v1160_v15 = vsub.f32 1.0, %v1159_v63  ;;  %vm1140_vm10 = vmor %vm1138_vm9, %vm1139_vm7 }
 0x50e   :  { %v1114_v54 = vmul.f32 %v1624_v27, %v1113_v47  ;;  %v1135_v1 = vsub.f32 1.0, %v1134_v53 }
 0x50f   :  { %v1161_v49 = vmul.f32 %v1626_v41, %v1160_v15 }
 0x510   :  { %v1115_v2 = vadd.f32 %v1624_v27, %v1114_v54  ;;  %v1136_v6 = vmul.f32 %v1628_v43, %v1135_v1 }
 0x511   :  { %v1162_v59 = vadd.f32 %v1626_v41, %v1161_v49 }
 0x512   :  { %v1119_v13 = vsel %vm1118_vm6, %v1624_v27, %v1115_v2  ;;  %v1137_v19 = vadd.f32 %v1628_v43, %v1136_v6 }
 0x513   :  { %v1124_v20 = vsel %vm1121_vm8, %v1123_v14, %v1119_v13  ;;  %v1166_v39 = vsel %vm1165_vm14, %v1626_v41, %v1162_v59 }
 0x514   :  { %v1141_v23 = vsel %vm1140_vm10, %v1628_v43, %v1137_v19  ;;  %v1152_v31 = vmul.f32 %v1630_v28, %v1124_v20  ;;  %v1171_v61 = vsel %vm1168_vm15, %v1170_v52, %v1166_v39 }
 0x515   :  { %v1146_v36 = vsel %vm1143_vm11, %v1145_v22, %v1141_v23 }
 0x516   :  { %v1151_v30 = vmul.f32 %v1146_v36, %v2242_v42 }
 0x518   :  { %v2254_v51 = vadd.f32 %v1152_v31, %v1151_v30 }
 0x51a   :  { %1631 = vtanh.f32 %v2254_v51 }
 0x520   :  { %v1632_v37 = vpop.eup %1631 }
 0x521   :  { %v1174_v3 = vmul.f32 %v1632_v37, %v1171_v61 }
 0x523   :  { %v1175_v55 = vpack.c.bf16 %v1174_v3, %v1174_v3 }
 0x525   :  { %1482 = vst [vmem:[%s2271_s2 + $0x6] sm:$0x1] %v1175_v55  ;;  %1188 = vmatmul.bf16.vlgmr.msrb.gmra.mxu0 %v1175_v55  ;;  %1201 = vmatmul.bf16.vlgmr.msrb.gmra.mxu1 %v1175_v55 }
 0x526   :  { %1214 = vmatmul.bf16.vlgmr.msrb.gmra.mxu2 %v1175_v55  ;;  %1236 = vmatmul.bf16.vlgmr.msrb.gmra.mxu3 %v1175_v55 }
 0x5a2   :  { %v1189_v42 = vpop.f32.mrf.mxu0  ;;  %v1202_v7 = vpop.f32.mrf.mxu1 }
 0x5a3   :  { %v1222_v16 = vrot.slane %v1202_v7, 6 }
 0x5a5   :  { %v1224_v38 = vsel %vm225_vm0, %v1189_v42, %v1222_v16 }
 0x5a9   :  { %v1215_v17 = vpop.f32.mrf.mxu2  ;;  %v1237_v21 = vpop.f32.mrf.mxu3 }
 0x5aa   :  { %v1223_v25 = vrot.slane %v1215_v17, 4  ;;  %v1244_v29 = vadd.f32 %v1242_v12, %v1237_v21  ;;  %v1191_v33 = vpop.f32.mrf.mxu0  ;;  %v1204_v34 = vpop.f32.mrf.mxu1 }
 0x5ac   :  { %v1225_v44 = vsel %vm227_vm1, %v1224_v38, %v1223_v25  ;;  %v1486_v45 = vmul.f32 -1.442695, %v1244_v29 }
 0x5ad   :  { %v1227_v46 = vadd.f32 %v1483_v8, %v1225_v44 }
 0x5ae   :  { %1633 = vpow2.f32 %v1486_v45 }
 0x5af   :  { %v1484_v50 = vmul.f32 -1.442695, %v1227_v46  ;;  %v1265_v56 = vrot.slane %v1227_v46, 2  ;;  %v1286_v48 = vrot.slane %v1227_v46, 4 }
 0x5b1   :  { %1635 = vpow2.f32 %v1484_v50  ;;  %v1485_v57 = vmul.f32 -1.442695, %v1265_v56  ;;  %v1217_v58 = vpop.f32.mrf.mxu2  ;;  %v1239_v62 = vpop.f32.mrf.mxu3 }
 0x5b3   :  { %1637 = vpow2.f32 %v1485_v57 }
 0x5b4   :  { %v1634_v5 = vpop.eup %1633 }
 0x5b5   :  { %v1295_v18 = vadd.f32 1.0, %v1634_v5 }
 0x5b7   :  { %v1636_v10 = vpop.eup %1635  ;;  %v1307_v35 = vand.u32 2147483648, %v1295_v18  ;;  %vm1301_vm9 = vweird.f32 %v1295_v18  ;;  %v1305_v39 = vand.u32 2147483647, %v1295_v18 }
 0x5b8   :  { %v1248_v11 = vadd.f32 1.0, %v1636_v10 }
 0x5b9   :  { %v1638_v24 = vpop.eup %1637  ;;  %v1308_v37 = vor.u32 1.1754944e-38, %v1307_v35  ;;  %vm1306_vm11 = vcmp.eq.f32.partialorder %v1305_v39, 8.507059e+37 }
 0x5ba   :  { %1639 = vrcp.f32 %v1248_v11  ;;  %v1270_v26 = vadd.f32 1.0, %v1638_v24  ;;  %v1260_v40 = vand.u32 2147483648, %v1248_v11  ;;  %v1258_v0 = vand.u32 2147483647, %v1248_v11 }
 0x5bb   :  { %1641 = vrcp.f32 %v1295_v18  ;;  %vm1254_vm1 = vweird.f32 %v1248_v11 }
 0x5bc   :  { %1643 = vrcp.f32 %v1270_v26  ;;  %v1282_v4 = vand.u32 2147483648, %v1270_v26  ;;  %v1280_v9 = vand.u32 2147483647, %v1270_v26  ;;  %v1261_v14 = vor.u32 1.1754944e-38, %v1260_v40 }
 0x5bd   :  { %1645 = vtanh.f32 %v1286_v48  ;;  %vm1259_vm4 = vcmp.eq.f32.partialorder %v1258_v0, 8.507059e+37  ;;  %vm1276_vm5 = vweird.f32 %v1270_v26 }
 0x5be   :  { %v1283_v22 = vor.u32 1.1754944e-38, %v1282_v4  ;;  %vm1281_vm7 = vcmp.eq.f32.partialorder %v1280_v9, 8.507059e+37 }
 0x5c0   :  { %v1640_v27 = vpop.eup %1639 }
 0x5c1   :  { %v1250_v32 = vmul.f32 %v1640_v27, %v1248_v11  ;;  %v1642_v41 = vpop.eup %1641  ;;  %vm1255_vm0 = vweird.f32 %v1640_v27 }
 0x5c2   :  { %v1644_v43 = vpop.eup %1643  ;;  %v1297_v63 = vmul.f32 %v1642_v41, %v1295_v18  ;;  %vm1256_vm2 = vmor %vm1254_vm1, %vm1255_vm0  ;;  %vm1302_vm8 = vweird.f32 %v1642_v41 }
 0x5c3   :  { %v1251_v47 = vsub.f32 1.0, %v1250_v32  ;;  %v1272_v53 = vmul.f32 %v1644_v43, %v1270_v26  ;;  %vm1277_vm3 = vweird.f32 %v1644_v43  ;;  %v1646_v28 = vpop.eup %1645  ;;  %vm1303_vm10 = vmor %vm1301_vm9, %vm1302_vm8 }
 0x5c4   :  { %v1298_v15 = vsub.f32 1.0, %v1297_v63  ;;  %vm1278_vm6 = vmor %vm1276_vm5, %vm1277_vm3 }
 0x5c5   :  { %v1252_v54 = vmul.f32 %v1640_v27, %v1251_v47  ;;  %v1273_v1 = vsub.f32 1.0, %v1272_v53 }
 0x5c6   :  { %v1299_v49 = vmul.f32 %v1642_v41, %v1298_v15 }
 0x5c7   :  { %v1253_v2 = vadd.f32 %v1640_v27, %v1252_v54  ;;  %v1274_v6 = vmul.f32 %v1644_v43, %v1273_v1 }
 0x5c8   :  { %v1300_v60 = vadd.f32 %v1642_v41, %v1299_v49 }
 0x5c9   :  { %v1257_v13 = vsel %vm1256_vm2, %v1640_v27, %v1253_v2  ;;  %v1275_v19 = vadd.f32 %v1644_v43, %v1274_v6 }
 0x5ca   :  { %v1262_v20 = vsel %vm1259_vm4, %v1261_v14, %v1257_v13  ;;  %v1304_v52 = vsel %vm1303_vm10, %v1642_v41, %v1300_v60 }
 0x5cb   :  { %v1279_v23 = vsel %vm1278_vm6, %v1644_v43, %v1275_v19  ;;  %v1290_v31 = vmul.f32 %v1646_v28, %v1262_v20  ;;  %v1309_v3 = vsel %vm1306_vm11, %v1308_v37, %v1304_v52 }
 0x5cc   :  { %v1284_v36 = vsel %vm1281_vm7, %v1283_v22, %v1279_v23 }
 0x5cd   :  { %v1289_v30 = vmul.f32 %v1284_v36, %v2254_v51 }
 0x5cf   :  { %v1291_v59 = vadd.f32 %v1290_v31, %v1289_v30 }
 0x5d1   :  { %1647 = vtanh.f32 %v1291_v59  ;;  %1317 = vst [vmem:[#allocation3] sm:$0x3] %v1291_v59 }
 0x5d7   :  { %v1648_v61 = vpop.eup %1647 }
 0x5d8   :  { %v1312_v55 = vmul.f32 %v1648_v61, %v1309_v3 }
 0x5da   :  { %v1313_v42 = vpack.c.bf16 %v1312_v55, %v1312_v55  ;;  %1316 = vst [vmem:[#allocation2] sm:$0x3] %v1312_v55 }
 0x5dc   :  { %1487 = vst [vmem:[%s2271_s2 + $0x7] sm:$0x1] %v1313_v42 }

// kernel: lstm_forward.2
= control target key start
LH: loop header
LB: loop body
LE: loop exit
PB: predicated region body
PF: predicated region fallthrough
CT: control target
= control target key end

     0   :  { %7 = vsyncpa [#allocation5], 0  ;;  %s1695_s12 = smov [#allocation4]   ;;  %s1696_s14 = smov 256   ;;  %s2129_s0 = inlined_call_operand.vmem [shape: f32[8,2,512], index: 0, kind: input, shape index: {}]   ;;  %s2130_s1 = inlined_call_operand.hbm [shape: bf16[128,512], index: 1, kind: input, shape index: {}]   ;;  %s2131_s2 = inlined_call_operand.vmem [shape: bf16[8,2,128], index: 2, kind: output, shape index: {}]  }
   0x1   :  { %s14_s11 = sshll.u32 %s2130_s1, 4  ;;  %s16_s13 = sshll.u32 %s1695_s12, 4  ;;  %s15_s11 = int_to_ptr.hbm [resolvable:$true] %s14_s11  ;;  %s17_s13 = int_to_ptr.vmem [resolvable:$true] %s16_s13 }
   0x2   :  { %s1697_s15 = smov 16  }
   0x3   :  { %22 = dma.hbm_to_vmem [thread:$0]  %s15_s11, 4096, %s17_s13, [#allocation5], %s1696_s14, %s1696_s14, %s1697_s15  }
   0x4   :  { %1693 = dma.done.wait [#allocation5], 4096  }
   0x5   :  { %1694 = vsyncadd [#allocation5], 4294963200  ;;  %v1698_v0 = vmov 0.0   ;;  %v1425_v1 = vld [vmem:[#allocation4 + $0xe0] sm:$0xf]  ;;  %vm241_vm0 = vcmask 1041408  }
   0x6   :  { %31 = vst [vmem:[#allocation2] sm:$0x3] %v1698_v0  ;;  %v1535_v2 = vld [vmem:[#allocation4 + $0xec] sm:$0xf0]  ;;  %v1533_v3 = vld [vmem:[#allocation4 + $0xe4] sm:$0xf] }
   0x7   :  { %32 = vst [vmem:[#allocation3] sm:$0x3] %v1698_v0  ;;  %v1717_v4 = vor.u32 %v1535_v2, %v1425_v1  ;;  %v1427_v5 = vld [vmem:[#allocation4 + $0xf0] sm:$0xf0]  ;;  %v1433_v6 = vld [vmem:[#allocation4 + $0xe8] sm:$0xf] }
   0x8   :  { %v1536_v7 = vld [vmem:[#allocation4 + $0xf4] sm:$0xf0]  ;;  %v1719_v8 = vor.u32 %v1533_v3, %v1427_v5  ;;  %v1534_v10 = vld [vmem:[#allocation4 + $0xec] sm:$0xf]  ;;  %v1463_v11 = vld [vmem:[#allocation4 + $0xf8] sm:$0xf0] }
   0x9   :  { %v1721_v9 = vor.u32 %v1536_v7, %v1433_v6  ;;  %v1413_v12 = vld [vmem:[#allocation4 + $0xc0] sm:$0xf]  ;;  %197 = vmatpush.bf16.msra.mxu0 %v1717_v4  ;;  %v1724_v13 = vor.u32 %v1534_v10, %v1463_v11  ;;  %v1531_v14 = vld [vmem:[#allocation4 + $0xcc] sm:$0xf0]  ;;  %v1529_v15 = vld [vmem:[#allocation4 + $0xc4] sm:$0xf] }
   0xa   :  { %v1415_v16 = vld [vmem:[#allocation4 + $0xd0] sm:$0xf0]  ;;  %210 = vmatpush.bf16.msra.mxu1 %v1719_v8  ;;  %v1728_v17 = vor.u32 %v1531_v14, %v1413_v12  ;;  %v1421_v19 = vld [vmem:[#allocation4 + $0xc8] sm:$0xf]  ;;  %v1532_v20 = vld [vmem:[#allocation4 + $0xd4] sm:$0xf0] }
   0xb   :  { %223 = vmatpush.bf16.msra.mxu2 %v1721_v9  ;;  %v1730_v18 = vor.u32 %v1529_v15, %v1415_v16  ;;  %v1530_v21 = vld [vmem:[#allocation4 + $0xcc] sm:$0xf]  ;;  %279 = vmatpush.bf16.msra.mxu3 %v1724_v13  ;;  %v1733_v22 = vor.u32 %v1532_v20, %v1421_v19  ;;  %v1459_v23 = vld [vmem:[#allocation4 + $0xd8] sm:$0xf0]  ;;  %v1401_v24 = vld [vmem:[#allocation4 + $0xa0] sm:$0xf] }
   0xc   :  { %v1527_v25 = vld [vmem:[#allocation4 + $0xac] sm:$0xf0]  ;;  %v1735_v26 = vor.u32 %v1530_v21, %v1459_v23  ;;  %v1525_v27 = vld [vmem:[#allocation4 + $0xa4] sm:$0xf]  ;;  %v1403_v28 = vld [vmem:[#allocation4 + $0xb0] sm:$0xf0] }
   0xd   :  { %v1409_v29 = vld [vmem:[#allocation4 + $0xa8] sm:$0xf]  ;;  %198 = vmatpush.bf16.msra.mxu0 %v1728_v17  ;;  %v1738_v30 = vor.u32 %v1527_v25, %v1401_v24  ;;  %v1528_v31 = vld [vmem:[#allocation4 + $0xb4] sm:$0xf0]  ;;  %v1526_v32 = vld [vmem:[#allocation4 + $0xac] sm:$0xf]  ;;  %v1742_v34 = vor.u32 %v1525_v27, %v1403_v28 }
   0xe   :  { %v1455_v33 = vld [vmem:[#allocation4 + $0xb8] sm:$0xf0]  ;;  %211 = vmatpush.bf16.msra.mxu1 %v1730_v18  ;;  %v1744_v35 = vor.u32 %v1528_v31, %v1409_v29  ;;  %v1389_v36 = vld [vmem:[#allocation4 + $0x80] sm:$0xf]  ;;  %v1523_v37 = vld [vmem:[#allocation4 + $0x8c] sm:$0xf0] }
   0xf   :  { %224 = vmatpush.bf16.msra.mxu2 %v1733_v22  ;;  %v1521_v38 = vld [vmem:[#allocation4 + $0x84] sm:$0xf]  ;;  %280 = vmatpush.bf16.msra.mxu3 %v1735_v26  ;;  %v1747_v39 = vor.u32 %v1526_v32, %v1455_v33  ;;  %v1391_v40 = vld [vmem:[#allocation4 + $0x90] sm:$0xf0]  ;;  %v1397_v41 = vld [vmem:[#allocation4 + $0x88] sm:$0xf]  ;;  %v1750_v45 = vor.u32 %v1523_v37, %v1389_v36 }
  0x10   :  { %v1524_v42 = vld [vmem:[#allocation4 + $0x94] sm:$0xf0]  ;;  %v1522_v43 = vld [vmem:[#allocation4 + $0x8c] sm:$0xf]  ;;  %v1451_v44 = vld [vmem:[#allocation4 + $0x98] sm:$0xf0]  ;;  %v1754_v46 = vor.u32 %v1521_v38, %v1391_v40 }
  0x11   :  { %199 = vmatpush.bf16.msra.mxu0 %v1738_v30  ;;  %v1756_v47 = vor.u32 %v1524_v42, %v1397_v41  ;;  %v1377_v48 = vld [vmem:[#allocation4 + $0x60] sm:$0xf]  ;;  %v1519_v49 = vld [vmem:[#allocation4 + $0x6c] sm:$0xf0]  ;;  %v1517_v50 = vld [vmem:[#allocation4 + $0x64] sm:$0xf]  ;;  %v1759_v51 = vor.u32 %v1522_v43, %v1451_v44 }
  0x12   :  { %212 = vmatpush.bf16.msra.mxu1 %v1742_v34  ;;  %v1379_v52 = vld [vmem:[#allocation4 + $0x70] sm:$0xf0]  ;;  %v1385_v53 = vld [vmem:[#allocation4 + $0x68] sm:$0xf]  ;;  %v1520_v54 = vld [vmem:[#allocation4 + $0x74] sm:$0xf0]  ;;  %v1762_v57 = vor.u32 %v1519_v49, %v1377_v48 }
  0x13   :  { %225 = vmatpush.bf16.msra.mxu2 %v1744_v35  ;;  %281 = vmatpush.bf16.msra.mxu3 %v1747_v39  ;;  %v1518_v55 = vld [vmem:[#allocation4 + $0x6c] sm:$0xf]  ;;  %v1447_v56 = vld [vmem:[#allocation4 + $0x78] sm:$0xf0]  ;;  %v1766_v58 = vor.u32 %v1517_v50, %v1379_v52  ;;  %v1768_v59 = vor.u32 %v1520_v54, %v1385_v53  ;;  %v1365_v60 = vld [vmem:[#allocation4 + $0x40] sm:$0xf] }
  0x14   :  { %v1515_v61 = vld [vmem:[#allocation4 + $0x4c] sm:$0xf0]  ;;  %v1513_v62 = vld [vmem:[#allocation4 + $0x44] sm:$0xf]  ;;  %v1771_v63 = vor.u32 %v1518_v55, %v1447_v56  ;;  %v1367_v0 = vld [vmem:[#allocation4 + $0x50] sm:$0xf0] }
  0x15   :  { %200 = vmatpush.bf16.msra.mxu0 %v1750_v45  ;;  %v1373_v1 = vld [vmem:[#allocation4 + $0x48] sm:$0xf]  ;;  %v1516_v2 = vld [vmem:[#allocation4 + $0x54] sm:$0xf0]  ;;  %v1514_v3 = vld [vmem:[#allocation4 + $0x4c] sm:$0xf]  ;;  %v1774_v6 = vor.u32 %v1515_v61, %v1365_v60  ;;  %v1778_v7 = vor.u32 %v1513_v62, %v1367_v0 }
  0x16   :  { %213 = vmatpush.bf16.msra.mxu1 %v1754_v46  ;;  %v1443_v5 = vld [vmem:[#allocation4 + $0x58] sm:$0xf0]  ;;  %v1780_v10 = vor.u32 %v1516_v2, %v1373_v1  ;;  %v1353_v11 = vld [vmem:[#allocation4 + $0x20] sm:$0xf]  ;;  %v1511_v12 = vld [vmem:[#allocation4 + $0x2c] sm:$0xf0] }
  0x17   :  { %226 = vmatpush.bf16.msra.mxu2 %v1756_v47  ;;  %282 = vmatpush.bf16.msra.mxu3 %v1759_v51  ;;  %v1509_v14 = vld [vmem:[#allocation4 + $0x24] sm:$0xf]  ;;  %v1783_v15 = vor.u32 %v1514_v3, %v1443_v5  ;;  %v1355_v16 = vld [vmem:[#allocation4 + $0x30] sm:$0xf0]  ;;  %v1361_v19 = vld [vmem:[#allocation4 + $0x28] sm:$0xf]  ;;  %v1786_v24 = vor.u32 %v1511_v12, %v1353_v11 }
  0x18   :  { %v1512_v20 = vld [vmem:[#allocation4 + $0x34] sm:$0xf0]  ;;  %v1510_v21 = vld [vmem:[#allocation4 + $0x2c] sm:$0xf]  ;;  %v1439_v23 = vld [vmem:[#allocation4 + $0x38] sm:$0xf0]  ;;  %v1790_v25 = vor.u32 %v1509_v14, %v1355_v16 }
  0x19   :  { %201 = vmatpush.bf16.msra.mxu0 %v1762_v57  ;;  %v1792_v27 = vor.u32 %v1512_v20, %v1361_v19  ;;  %v1341_v28 = vld [vmem:[#allocation4] sm:$0xf]  ;;  %v1507_v29 = vld [vmem:[#allocation4 + $0xc] sm:$0xf0]  ;;  %v1505_v31 = vld [vmem:[#allocation4 + $0x4] sm:$0xf]  ;;  %v1795_v32 = vor.u32 %v1510_v21, %v1439_v23 }
  0x1a   :  { %214 = vmatpush.bf16.msra.mxu1 %v1766_v58  ;;  %v1343_v33 = vld [vmem:[#allocation4 + $0x10] sm:$0xf0]  ;;  %v1349_v36 = vld [vmem:[#allocation4 + $0x8] sm:$0xf]  ;;  %v1508_v37 = vld [vmem:[#allocation4 + $0x14] sm:$0xf0]  ;;  %v1798_v41 = vor.u32 %v1507_v29, %v1341_v28 }
  0x1b   :  { %227 = vmatpush.bf16.msra.mxu2 %v1768_v59  ;;  %283 = vmatpush.bf16.msra.mxu3 %v1771_v63  ;;  %v1506_v38 = vld [vmem:[#allocation4 + $0xc] sm:$0xf]  ;;  %v1435_v40 = vld [vmem:[#allocation4 + $0x18] sm:$0xf0]  ;;  %v1802_v43 = vor.u32 %v1505_v31, %v1343_v33  ;;  %v1804_v44 = vor.u32 %v1508_v37, %v1349_v36  ;;  %vm243_vm1 = vcmask 1043456  }
  0x1c   :  { %v65_v42 = vld [vmem:[#allocation2] sm:$0x3]  ;;  %v1807_v48 = vor.u32 %v1506_v38, %v1435_v40 }
  0x1d   :  { %202 = vmatpush.bf16.msra.mxu0 %v1774_v6  ;;  %v67_v49 = vpack.c.bf16 %v65_v42, %v65_v42  ;;  %v68_v53 = vld [vmem:[%s2129_s0] sm:$0xff] }
  0x1e   :  { %215 = vmatpush.bf16.msra.mxu1 %v1778_v7  ;;  %v293_v55 = vrot.slane %v68_v53, 6 }
  0x1f   :  { %228 = vmatpush.bf16.msra.mxu2 %v1780_v10  ;;  %284 = vmatpush.bf16.msra.mxu3 %v1783_v15 }
  0x21   :  { %203 = vmatpush.bf16.msra.mxu0 %v1786_v24 }
  0x22   :  { %216 = vmatpush.bf16.msra.mxu1 %v1790_v25 }
  0x23   :  { %229 = vmatpush.bf16.msra.mxu2 %v1792_v27  ;;  %285 = vmatpush.bf16.msra.mxu3 %v1795_v32 }
  0x25   :  { %204 = vmatpush.bf16.msra.mxu0 %v1798_v41 }
  0x26   :  { %217 = vmatpush.bf16.msra.mxu1 %v1802_v43 }
  0x27   :  { %230 = vmatpush.bf16.msra.mxu2 %v1804_v44  ;;  %286 = vmatpush.bf16.msra.mxu3 %v1807_v48 }
  0x28   :  { %205 = vmatmul.bf16.vlgmr.msra.gmra.mxu0 %v67_v49 }
  0x29   :  { %368 = vmatpush.bf16.msrb.mxu0 %v1717_v4  ;;  %218 = vmatmul.bf16.vlgmr.msra.gmra.mxu1 %v67_v49 }
  0x2a   :  { %381 = vmatpush.bf16.msrb.mxu1 %v1719_v8  ;;  %231 = vmatmul.bf16.vlgmr.msra.gmra.mxu2 %v67_v49 }
  0x2b   :  { %287 = vmatmul.bf16.vlgmr.msra.gmra.mxu3 %v67_v49  ;;  %394 = vmatpush.bf16.msrb.mxu2 %v1721_v9 }
  0x2c   :  { %416 = vmatpush.bf16.msrb.mxu3 %v1724_v13 }
  0x2d   :  { %369 = vmatpush.bf16.msrb.mxu0 %v1728_v17 }
  0x2e   :  { %382 = vmatpush.bf16.msrb.mxu1 %v1730_v18 }
  0x2f   :  { %395 = vmatpush.bf16.msrb.mxu2 %v1733_v22 }
  0x30   :  { %417 = vmatpush.bf16.msrb.mxu3 %v1735_v26 }
  0x31   :  { %370 = vmatpush.bf16.msrb.mxu0 %v1738_v30 }
  0x32   :  { %383 = vmatpush.bf16.msrb.mxu1 %v1742_v34 }
  0x33   :  { %396 = vmatpush.bf16.msrb.mxu2 %v1744_v35 }
  0x34   :  { %418 = vmatpush.bf16.msrb.mxu3 %v1747_v39 }
  0x35   :  { %371 = vmatpush.bf16.msrb.mxu0 %v1750_v45 }
  0x36   :  { %384 = vmatpush.bf16.msrb.mxu1 %v1754_v46 }
  0x37   :  { %397 = vmatpush.bf16.msrb.mxu2 %v1756_v47 }
  0x38   :  { %419 = vmatpush.bf16.msrb.mxu3 %v1759_v51 }
  0x39   :  { %372 = vmatpush.bf16.msrb.mxu0 %v1762_v57 }
  0x3a   :  { %385 = vmatpush.bf16.msrb.mxu1 %v1766_v58 }
  0x3b   :  { %398 = vmatpush.bf16.msrb.mxu2 %v1768_v59 }
  0x3c   :  { %420 = vmatpush.bf16.msrb.mxu3 %v1771_v63 }
  0x3d   :  { %373 = vmatpush.bf16.msrb.mxu0 %v1774_v6 }
  0x3e   :  { %386 = vmatpush.bf16.msrb.mxu1 %v1778_v7 }
  0x3f   :  { %399 = vmatpush.bf16.msrb.mxu2 %v1780_v10 }
  0x40   :  { %421 = vmatpush.bf16.msrb.mxu3 %v1783_v15 }
  0x41   :  { %374 = vmatpush.bf16.msrb.mxu0 %v1786_v24 }
  0x42   :  { %387 = vmatpush.bf16.msrb.mxu1 %v1790_v25 }
  0x43   :  { %400 = vmatpush.bf16.msrb.mxu2 %v1792_v27 }
  0x44   :  { %422 = vmatpush.bf16.msrb.mxu3 %v1795_v32 }
  0x45   :  { %375 = vmatpush.bf16.msrb.mxu0 %v1798_v41 }
  0x46   :  { %388 = vmatpush.bf16.msrb.mxu1 %v1802_v43 }
  0x47   :  { %401 = vmatpush.bf16.msrb.mxu2 %v1804_v44 }
  0x48   :  { %423 = vmatpush.bf16.msrb.mxu3 %v1807_v48 }
  0x49   :  { %506 = vmatpush.bf16.msra.mxu0 %v1717_v4 }
  0x4a   :  { %519 = vmatpush.bf16.msra.mxu1 %v1719_v8 }
  0x4b   :  { %532 = vmatpush.bf16.msra.mxu2 %v1721_v9 }
  0x4c   :  { %554 = vmatpush.bf16.msra.mxu3 %v1724_v13 }
  0x4d   :  { %507 = vmatpush.bf16.msra.mxu0 %v1728_v17 }
  0x4e   :  { %520 = vmatpush.bf16.msra.mxu1 %v1730_v18 }
  0x4f   :  { %533 = vmatpush.bf16.msra.mxu2 %v1733_v22 }
  0x50   :  { %555 = vmatpush.bf16.msra.mxu3 %v1735_v26 }
  0x51   :  { %508 = vmatpush.bf16.msra.mxu0 %v1738_v30 }
  0x52   :  { %521 = vmatpush.bf16.msra.mxu1 %v1742_v34 }
  0x53   :  { %534 = vmatpush.bf16.msra.mxu2 %v1744_v35 }
  0x54   :  { %556 = vmatpush.bf16.msra.mxu3 %v1747_v39 }
  0x55   :  { %509 = vmatpush.bf16.msra.mxu0 %v1750_v45 }
  0x56   :  { %522 = vmatpush.bf16.msra.mxu1 %v1754_v46 }
  0x57   :  { %535 = vmatpush.bf16.msra.mxu2 %v1756_v47 }
  0x58   :  { %557 = vmatpush.bf16.msra.mxu3 %v1759_v51 }
  0x59   :  { %510 = vmatpush.bf16.msra.mxu0 %v1762_v57 }
  0x5a   :  { %523 = vmatpush.bf16.msra.mxu1 %v1766_v58 }
  0x5b   :  { %536 = vmatpush.bf16.msra.mxu2 %v1768_v59 }
  0x5c   :  { %558 = vmatpush.bf16.msra.mxu3 %v1771_v63 }
  0x5d   :  { %511 = vmatpush.bf16.msra.mxu0 %v1774_v6 }
  0x5e   :  { %524 = vmatpush.bf16.msra.mxu1 %v1778_v7 }
  0x5f   :  { %537 = vmatpush.bf16.msra.mxu2 %v1780_v10 }
  0x60   :  { %559 = vmatpush.bf16.msra.mxu3 %v1783_v15 }
  0x61   :  { %512 = vmatpush.bf16.msra.mxu0 %v1786_v24 }
  0x62   :  { %525 = vmatpush.bf16.msra.mxu1 %v1790_v25 }
  0x63   :  { %538 = vmatpush.bf16.msra.mxu2 %v1792_v27 }
  0x64   :  { %560 = vmatpush.bf16.msra.mxu3 %v1795_v32 }
  0x65   :  { %513 = vmatpush.bf16.msra.mxu0 %v1798_v41 }
  0x66   :  { %526 = vmatpush.bf16.msra.mxu1 %v1802_v43 }
  0x67   :  { %539 = vmatpush.bf16.msra.mxu2 %v1804_v44 }
  0x68   :  { %561 = vmatpush.bf16.msra.mxu3 %v1807_v48 }
  0xa5   :  { %v206_v50 = vpop.f32.mrf.mxu0 }
  0xa6   :  { %v219_v52 = vpop.f32.mrf.mxu1 }
  0xa7   :  { %v239_v54 = vrot.slane %v219_v52, 6 }
  0xa9   :  { %v242_v56 = vsel %vm241_vm0, %v206_v50, %v239_v54 }
  0xad   :  { %v232_v60 = vpop.f32.mrf.mxu2  ;;  %v208_v62 = vpop.f32.mrf.mxu0 }
  0xae   :  { %v240_v61 = vrot.slane %v232_v60, 4  ;;  %v288_v0 = vpop.f32.mrf.mxu3  ;;  %v221_v1 = vpop.f32.mrf.mxu1 }
  0xaf   :  { %v295_v2 = vadd.f32 %v293_v55, %v288_v0 }
  0xb0   :  { %v244_v3 = vsel %vm243_vm1, %v242_v56, %v240_v61 }
  0xb1   :  { %v246_v5 = vadd.f32 %v244_v3, %v68_v53  ;;  %v1469_v11 = vmul.f32 -1.442695, %v295_v2 }
  0xb3   :  { %v1467_v12 = vmul.f32 -1.442695, %v246_v5  ;;  %v316_v14 = vrot.slane %v246_v5, 2  ;;  %1541 = vpow2.f32 %v1469_v11  ;;  %v337_v49 = vrot.slane %v246_v5, 4  ;;  %v66_v11 = vld [vmem:[#allocation3] sm:$0x3] }
  0xb5   :  { %1543 = vpow2.f32 %v1467_v12  ;;  %v1468_v16 = vmul.f32 -1.442695, %v316_v14  ;;  %v234_v19 = vpop.f32.mrf.mxu2 }
  0xb6   :  { %v290_v20 = vpop.f32.mrf.mxu3 }
  0xb7   :  { %1545 = vpow2.f32 %v1468_v16 }
  0xb9   :  { %v1542_v21 = vpop.eup %1541 }
  0xba   :  { %v346_v29 = vadd.f32 1.0, %v1542_v21 }
  0xbb   :  { %v1544_v23 = vpop.eup %1543 }
  0xbc   :  { %v299_v28 = vadd.f32 1.0, %v1544_v23  ;;  %vm352_vm10 = vweird.f32 %v346_v29 }
  0xbd   :  { %v1546_v31 = vpop.eup %1545 }
  0xbe   :  { %1547 = vrcp.f32 %v299_v28  ;;  %v321_v33 = vadd.f32 1.0, %v1546_v31  ;;  %v311_v53 = vand.u32 2147483648, %v299_v28  ;;  %v309_v55 = vand.u32 2147483647, %v299_v28 }
  0xbf   :  { %1549 = vrcp.f32 %v346_v29  ;;  %vm305_vm3 = vweird.f32 %v299_v28 }
  0xc0   :  { %1551 = vrcp.f32 %v321_v33  ;;  %v333_v61 = vand.u32 2147483648, %v321_v33  ;;  %v331_v0 = vand.u32 2147483647, %v321_v33  ;;  %v312_v2 = vor.u32 1.1754944e-38, %v311_v53 }
  0xc1   :  { %1553 = vtanh.f32 %v337_v49  ;;  %vm310_vm6 = vcmp.eq.f32.partialorder %v309_v55, 8.507059e+37  ;;  %vm327_vm7 = vweird.f32 %v321_v33 }
  0xc2   :  { %v334_v14 = vor.u32 1.1754944e-38, %v333_v61  ;;  %vm332_vm9 = vcmp.eq.f32.partialorder %v331_v0, 8.507059e+37 }
  0xc4   :  { %v1548_v36 = vpop.eup %1547 }
  0xc5   :  { %v301_v37 = vmul.f32 %v1548_v36, %v299_v28  ;;  %v1550_v38 = vpop.eup %1549  ;;  %vm306_vm2 = vweird.f32 %v1548_v36 }
  0xc6   :  { %v1552_v40 = vpop.eup %1551  ;;  %v348_v54 = vmul.f32 %v1550_v38, %v346_v29  ;;  %vm307_vm4 = vmor %vm305_vm3, %vm306_vm2  ;;  %vm353_vm11 = vweird.f32 %v1550_v38 }
  0xc7   :  { %v302_v42 = vsub.f32 1.0, %v301_v37  ;;  %v323_v50 = vmul.f32 %v1552_v40, %v321_v33  ;;  %vm328_vm5 = vweird.f32 %v1552_v40  ;;  %v1554_v19 = vpop.eup %1553  ;;  %v356_v37 = vand.u32 2147483647, %v346_v29  ;;  %vm354_vm12 = vmor %vm352_vm10, %vm353_vm11 }
  0xc8   :  { %v349_v3 = vsub.f32 1.0, %v348_v54  ;;  %vm329_vm8 = vmor %vm327_vm7, %vm328_vm5  ;;  %v1470_v54 = vld [vmem:[%s2129_s0 + $0x8] sm:$0xff] }
  0xc9   :  { %v303_v52 = vmul.f32 %v1548_v36, %v302_v42  ;;  %v324_v56 = vsub.f32 1.0, %v323_v50  ;;  %vm357_vm13 = vcmp.eq.f32.partialorder %v356_v37, 8.507059e+37  ;;  %v430_v55 = vrot.slane %v1470_v54, 6 }
  0xca   :  { %v350_v21 = vmul.f32 %v1550_v38, %v349_v3 }
  0xcb   :  { %v304_v60 = vadd.f32 %v1548_v36, %v303_v52  ;;  %v325_v62 = vmul.f32 %v1552_v40, %v324_v56 }
  0xcc   :  { %v351_v42 = vadd.f32 %v1550_v38, %v350_v21 }
  0xcd   :  { %v308_v1 = vsel %vm307_vm4, %v1548_v36, %v304_v60  ;;  %v326_v5 = vadd.f32 %v1552_v40, %v325_v62  ;;  %v358_v36 = vand.u32 2147483648, %v346_v29 }
  0xce   :  { %v313_v12 = vsel %vm310_vm6, %v312_v2, %v308_v1  ;;  %v355_v49 = vsel %vm354_vm12, %v1550_v38, %v351_v42 }
  0xcf   :  { %v330_v16 = vsel %vm329_vm8, %v1552_v40, %v326_v5  ;;  %v341_v28 = vmul.f32 %v1554_v19, %v313_v12  ;;  %v359_v33 = vor.u32 1.1754944e-38, %v358_v36 }
  0xd0   :  { %v335_v20 = vsel %vm332_vm9, %v334_v14, %v330_v16 }
  0xd1   :  { %v340_v23 = vmul.f32 %v335_v20, %v66_v11  ;;  %v360_v50 = vsel %vm357_vm13, %v359_v33, %v355_v49 }
  0xd3   :  { %v1882_v31 = vadd.f32 %v341_v28, %v340_v23 }
  0xd5   :  { %1555 = vtanh.f32 %v1882_v31 }
  0xdb   :  { %v1556_v40 = vpop.eup %1555 }
  0xdc   :  { %v363_v52 = vmul.f32 %v1556_v40, %v360_v50 }
  0xde   :  { %v364_v53 = vpack.c.bf16 %v363_v52, %v363_v52 }
  0xe0   :  { %365 = vst [vmem:[%s2131_s2] sm:$0x1] %v364_v53  ;;  %376 = vmatmul.bf16.vlgmr.msrb.gmra.mxu0 %v364_v53  ;;  %389 = vmatmul.bf16.vlgmr.msrb.gmra.mxu1 %v364_v53 }
  0xe1   :  { %402 = vmatmul.bf16.vlgmr.msrb.gmra.mxu2 %v364_v53  ;;  %424 = vmatmul.bf16.vlgmr.msrb.gmra.mxu3 %v364_v53 }
  0xe2   :  { %644 = vmatpush.bf16.msrb.mxu0 %v1717_v4  ;;  %657 = vmatpush.bf16.msrb.mxu1 %v1719_v8 }
  0xe3   :  { %670 = vmatpush.bf16.msrb.mxu2 %v1721_v9  ;;  %692 = vmatpush.bf16.msrb.mxu3 %v1724_v13 }
  0xe6   :  { %645 = vmatpush.bf16.msrb.mxu0 %v1728_v17  ;;  %658 = vmatpush.bf16.msrb.mxu1 %v1730_v18 }
  0xe7   :  { %671 = vmatpush.bf16.msrb.mxu2 %v1733_v22  ;;  %693 = vmatpush.bf16.msrb.mxu3 %v1735_v26 }
  0xea   :  { %646 = vmatpush.bf16.msrb.mxu0 %v1738_v30  ;;  %659 = vmatpush.bf16.msrb.mxu1 %v1742_v34 }
  0xeb   :  { %672 = vmatpush.bf16.msrb.mxu2 %v1744_v35  ;;  %694 = vmatpush.bf16.msrb.mxu3 %v1747_v39 }
  0xee   :  { %647 = vmatpush.bf16.msrb.mxu0 %v1750_v45  ;;  %660 = vmatpush.bf16.msrb.mxu1 %v1754_v46 }
  0xef   :  { %673 = vmatpush.bf16.msrb.mxu2 %v1756_v47  ;;  %695 = vmatpush.bf16.msrb.mxu3 %v1759_v51 }
  0xf2   :  { %648 = vmatpush.bf16.msrb.mxu0 %v1762_v57  ;;  %661 = vmatpush.bf16.msrb.mxu1 %v1766_v58 }
  0xf3   :  { %674 = vmatpush.bf16.msrb.mxu2 %v1768_v59  ;;  %696 = vmatpush.bf16.msrb.mxu3 %v1771_v63 }
  0xf6   :  { %649 = vmatpush.bf16.msrb.mxu0 %v1774_v6  ;;  %662 = vmatpush.bf16.msrb.mxu1 %v1778_v7 }
  0xf7   :  { %675 = vmatpush.bf16.msrb.mxu2 %v1780_v10  ;;  %697 = vmatpush.bf16.msrb.mxu3 %v1783_v15 }
  0xfa   :  { %650 = vmatpush.bf16.msrb.mxu0 %v1786_v24  ;;  %663 = vmatpush.bf16.msrb.mxu1 %v1790_v25 }
  0xfb   :  { %676 = vmatpush.bf16.msrb.mxu2 %v1792_v27  ;;  %698 = vmatpush.bf16.msrb.mxu3 %v1795_v32 }
  0xfe   :  { %651 = vmatpush.bf16.msrb.mxu0 %v1798_v41  ;;  %664 = vmatpush.bf16.msrb.mxu1 %v1802_v43 }
  0xff   :  { %677 = vmatpush.bf16.msrb.mxu2 %v1804_v44  ;;  %699 = vmatpush.bf16.msrb.mxu3 %v1807_v48 }
 0x15d   :  { %v377_v29 = vpop.f32.mrf.mxu0  ;;  %v390_v38 = vpop.f32.mrf.mxu1 }
 0x15e   :  { %v410_v56 = vrot.slane %v390_v38, 6 }
 0x160   :  { %v412_v3 = vsel %vm241_vm0, %v377_v29, %v410_v56 }
 0x164   :  { %v403_v60 = vpop.f32.mrf.mxu2  ;;  %v425_v61 = vpop.f32.mrf.mxu3 }
 0x165   :  { %v411_v62 = vrot.slane %v403_v60, 4  ;;  %v432_v0 = vadd.f32 %v430_v55, %v425_v61  ;;  %v379_v1 = vpop.f32.mrf.mxu0  ;;  %v392_v2 = vpop.f32.mrf.mxu1 }
 0x167   :  { %v413_v5 = vsel %vm243_vm1, %v412_v3, %v411_v62  ;;  %v1473_v11 = vmul.f32 -1.442695, %v432_v0 }
 0x168   :  { %v415_v12 = vadd.f32 %v1470_v54, %v413_v5 }
 0x169   :  { %1557 = vpow2.f32 %v1473_v11 }
 0x16a   :  { %v1471_v14 = vmul.f32 -1.442695, %v415_v12  ;;  %v453_v16 = vrot.slane %v415_v12, 2  ;;  %v474_v29 = vrot.slane %v415_v12, 4 }
 0x16c   :  { %1559 = vpow2.f32 %v1471_v14  ;;  %v1472_v19 = vmul.f32 -1.442695, %v453_v16  ;;  %v405_v20 = vpop.f32.mrf.mxu2  ;;  %v427_v21 = vpop.f32.mrf.mxu3 }
 0x16e   :  { %1561 = vpow2.f32 %v1472_v19 }
 0x16f   :  { %v1558_v23 = vpop.eup %1557 }
 0x170   :  { %v483_v37 = vadd.f32 1.0, %v1558_v23 }
 0x172   :  { %v1560_v28 = vpop.eup %1559  ;;  %vm489_vm9 = vweird.f32 %v483_v37 }
 0x173   :  { %v436_v36 = vadd.f32 1.0, %v1560_v28 }
 0x174   :  { %v1562_v42 = vpop.eup %1561 }
 0x175   :  { %1563 = vrcp.f32 %v436_v36  ;;  %v458_v33 = vadd.f32 1.0, %v1562_v42  ;;  %v448_v55 = vand.u32 2147483648, %v436_v36  ;;  %v446_v60 = vand.u32 2147483647, %v436_v36 }
 0x176   :  { %1565 = vrcp.f32 %v483_v37  ;;  %vm442_vm15 = vweird.f32 %v436_v36 }
 0x177   :  { %1567 = vrcp.f32 %v458_v33  ;;  %v470_v0 = vand.u32 2147483648, %v458_v33  ;;  %v468_v2 = vand.u32 2147483647, %v458_v33  ;;  %v449_v5 = vor.u32 1.1754944e-38, %v448_v55 }
 0x178   :  { %1569 = vtanh.f32 %v474_v29  ;;  %vm447_vm4 = vcmp.eq.f32.partialorder %v446_v60, 8.507059e+37  ;;  %vm464_vm5 = vweird.f32 %v458_v33 }
 0x179   :  { %v471_v16 = vor.u32 1.1754944e-38, %v470_v0  ;;  %vm469_vm7 = vcmp.eq.f32.partialorder %v468_v2, 8.507059e+37 }
 0x17b   :  { %v1564_v49 = vpop.eup %1563 }
 0x17c   :  { %v438_v40 = vmul.f32 %v1564_v49, %v436_v36  ;;  %v1566_v50 = vpop.eup %1565  ;;  %vm443_vm14 = vweird.f32 %v1564_v49 }
 0x17d   :  { %v1568_v52 = vpop.eup %1567  ;;  %v485_v56 = vmul.f32 %v1566_v50, %v483_v37  ;;  %vm444_vm2 = vmor %vm442_vm15, %vm443_vm14  ;;  %vm490_vm8 = vweird.f32 %v1566_v50 }
 0x17e   :  { %v439_v53 = vsub.f32 1.0, %v438_v40  ;;  %v460_v38 = vmul.f32 %v1568_v52, %v458_v33  ;;  %vm465_vm3 = vweird.f32 %v1568_v52  ;;  %v1570_v20 = vpop.eup %1569  ;;  %v495_v40 = vand.u32 2147483648, %v483_v37  ;;  %vm491_vm10 = vmor %vm489_vm9, %vm490_vm8 }
 0x17f   :  { %v486_v11 = vsub.f32 1.0, %v485_v56  ;;  %vm466_vm6 = vmor %vm464_vm5, %vm465_vm3  ;;  %v493_v33 = vand.u32 2147483647, %v483_v37 }
 0x180   :  { %v440_v54 = vmul.f32 %v1564_v49, %v439_v53  ;;  %v461_v61 = vsub.f32 1.0, %v460_v38  ;;  %v496_v29 = vor.u32 1.1754944e-38, %v495_v40 }
 0x181   :  { %v487_v23 = vmul.f32 %v1566_v50, %v486_v11  ;;  %vm494_vm11 = vcmp.eq.f32.partialorder %v493_v33, 8.507059e+37 }
 0x182   :  { %v441_v62 = vadd.f32 %v1564_v49, %v440_v54  ;;  %v462_v1 = vmul.f32 %v1568_v52, %v461_v61 }
 0x184   :  { %v445_v3 = vsel %vm444_vm2, %v1564_v49, %v441_v62  ;;  %v463_v12 = vadd.f32 %v1568_v52, %v462_v1  ;;  %v488_v49 = vadd.f32 %v1566_v50, %v487_v23 }
 0x185   :  { %v450_v14 = vsel %vm447_vm4, %v449_v5, %v445_v3 }
 0x186   :  { %v467_v19 = vsel %vm466_vm6, %v1568_v52, %v463_v12  ;;  %v478_v36 = vmul.f32 %v1570_v20, %v450_v14  ;;  %v492_v53 = vsel %vm491_vm10, %v1566_v50, %v488_v49  ;;  %v1475_v50 = vld [vmem:[%s2129_s0 + $0x10] sm:$0xff] }
 0x187   :  { %v472_v21 = vsel %vm469_vm7, %v471_v16, %v467_v19  ;;  %v497_v38 = vsel %vm494_vm11, %v496_v29, %v492_v53  ;;  %v568_v56 = vrot.slane %v1475_v50, 6 }
 0x188   :  { %v477_v28 = vmul.f32 %v472_v21, %v1882_v31 }
 0x18a   :  { %v1926_v42 = vadd.f32 %v478_v36, %v477_v28 }
 0x18c   :  { %1571 = vtanh.f32 %v1926_v42 }
 0x192   :  { %v1572_v52 = vpop.eup %1571 }
 0x193   :  { %v500_v54 = vmul.f32 %v1572_v52, %v497_v38 }
 0x195   :  { %v501_v55 = vpack.c.bf16 %v500_v54, %v500_v54 }
 0x197   :  { %1474 = vst [vmem:[%s2131_s2 + $0x1] sm:$0x1] %v501_v55  ;;  %514 = vmatmul.bf16.vlgmr.msra.gmra.mxu0 %v501_v55  ;;  %527 = vmatmul.bf16.vlgmr.msra.gmra.mxu1 %v501_v55 }
 0x198   :  { %540 = vmatmul.bf16.vlgmr.msra.gmra.mxu2 %v501_v55  ;;  %562 = vmatmul.bf16.vlgmr.msra.gmra.mxu3 %v501_v55 }
 0x199   :  { %782 = vmatpush.bf16.msra.mxu0 %v1717_v4  ;;  %795 = vmatpush.bf16.msra.mxu1 %v1719_v8 }
 0x19a   :  { %808 = vmatpush.bf16.msra.mxu2 %v1721_v9  ;;  %830 = vmatpush.bf16.msra.mxu3 %v1724_v13 }
 0x19d   :  { %783 = vmatpush.bf16.msra.mxu0 %v1728_v17  ;;  %796 = vmatpush.bf16.msra.mxu1 %v1730_v18 }
 0x19e   :  { %809 = vmatpush.bf16.msra.mxu2 %v1733_v22  ;;  %831 = vmatpush.bf16.msra.mxu3 %v1735_v26 }
 0x1a1   :  { %784 = vmatpush.bf16.msra.mxu0 %v1738_v30  ;;  %797 = vmatpush.bf16.msra.mxu1 %v1742_v34 }
 0x1a2   :  { %810 = vmatpush.bf16.msra.mxu2 %v1744_v35  ;;  %832 = vmatpush.bf16.msra.mxu3 %v1747_v39 }
 0x1a5   :  { %785 = vmatpush.bf16.msra.mxu0 %v1750_v45  ;;  %798 = vmatpush.bf16.msra.mxu1 %v1754_v46 }
 0x1a6   :  { %811 = vmatpush.bf16.msra.mxu2 %v1756_v47  ;;  %833 = vmatpush.bf16.msra.mxu3 %v1759_v51 }
 0x1a9   :  { %786 = vmatpush.bf16.msra.mxu0 %v1762_v57  ;;  %799 = vmatpush.bf16.msra.mxu1 %v1766_v58 }
 0x1aa   :  { %812 = vmatpush.bf16.msra.mxu2 %v1768_v59  ;;  %834 = vmatpush.bf16.msra.mxu3 %v1771_v63 }
 0x1ad   :  { %787 = vmatpush.bf16.msra.mxu0 %v1774_v6  ;;  %800 = vmatpush.bf16.msra.mxu1 %v1778_v7 }
 0x1ae   :  { %813 = vmatpush.bf16.msra.mxu2 %v1780_v10  ;;  %835 = vmatpush.bf16.msra.mxu3 %v1783_v15 }
 0x1b1   :  { %788 = vmatpush.bf16.msra.mxu0 %v1786_v24  ;;  %801 = vmatpush.bf16.msra.mxu1 %v1790_v25 }
 0x1b2   :  { %814 = vmatpush.bf16.msra.mxu2 %v1792_v27  ;;  %836 = vmatpush.bf16.msra.mxu3 %v1795_v32 }
 0x1b5   :  { %789 = vmatpush.bf16.msra.mxu0 %v1798_v41  ;;  %802 = vmatpush.bf16.msra.mxu1 %v1802_v43 }
 0x1b6   :  { %815 = vmatpush.bf16.msra.mxu2 %v1804_v44  ;;  %837 = vmatpush.bf16.msra.mxu3 %v1807_v48 }
 0x214   :  { %v515_v31 = vpop.f32.mrf.mxu0  ;;  %v528_v37 = vpop.f32.mrf.mxu1 }
 0x215   :  { %v548_v60 = vrot.slane %v528_v37, 6 }
 0x217   :  { %v550_v5 = vsel %vm241_vm0, %v515_v31, %v548_v60 }
 0x21b   :  { %v541_v61 = vpop.f32.mrf.mxu2  ;;  %v563_v62 = vpop.f32.mrf.mxu3 }
 0x21c   :  { %v549_v0 = vrot.slane %v541_v61, 4  ;;  %v570_v1 = vadd.f32 %v568_v56, %v563_v62  ;;  %v517_v2 = vpop.f32.mrf.mxu0  ;;  %v530_v3 = vpop.f32.mrf.mxu1 }
 0x21e   :  { %v551_v11 = vsel %vm243_vm1, %v550_v5, %v549_v0  ;;  %v1478_v12 = vmul.f32 -1.442695, %v570_v1 }
 0x21f   :  { %v553_v14 = vadd.f32 %v1475_v50, %v551_v11 }
 0x220   :  { %1573 = vpow2.f32 %v1478_v12 }
 0x221   :  { %v1476_v16 = vmul.f32 -1.442695, %v553_v14  ;;  %v591_v19 = vrot.slane %v553_v14, 2  ;;  %v612_v31 = vrot.slane %v553_v14, 4 }
 0x223   :  { %1575 = vpow2.f32 %v1476_v16  ;;  %v1477_v20 = vmul.f32 -1.442695, %v591_v19  ;;  %v543_v21 = vpop.f32.mrf.mxu2  ;;  %v565_v23 = vpop.f32.mrf.mxu3 }
 0x225   :  { %1577 = vpow2.f32 %v1477_v20 }
 0x226   :  { %v1574_v28 = vpop.eup %1573 }
 0x227   :  { %v621_v40 = vadd.f32 1.0, %v1574_v28 }
 0x229   :  { %v1576_v36 = vpop.eup %1575  ;;  %vm627_vm7 = vweird.f32 %v621_v40 }
 0x22a   :  { %v574_v49 = vadd.f32 1.0, %v1576_v36 }
 0x22b   :  { %v1578_v33 = vpop.eup %1577 }
 0x22c   :  { %1579 = vrcp.f32 %v574_v49  ;;  %v596_v53 = vadd.f32 1.0, %v1578_v33  ;;  %v586_v56 = vand.u32 2147483648, %v574_v49  ;;  %v584_v61 = vand.u32 2147483647, %v574_v49 }
 0x22d   :  { %1581 = vrcp.f32 %v621_v40  ;;  %vm580_vm13 = vweird.f32 %v574_v49 }
 0x22e   :  { %1583 = vrcp.f32 %v596_v53  ;;  %v608_v1 = vand.u32 2147483648, %v596_v53  ;;  %v606_v3 = vand.u32 2147483647, %v596_v53  ;;  %v587_v11 = vor.u32 1.1754944e-38, %v586_v56 }
 0x22f   :  { %1585 = vtanh.f32 %v612_v31  ;;  %vm585_vm2 = vcmp.eq.f32.partialorder %v584_v61, 8.507059e+37  ;;  %vm602_vm3 = vweird.f32 %v596_v53 }
 0x230   :  { %v609_v19 = vor.u32 1.1754944e-38, %v608_v1  ;;  %vm607_vm5 = vcmp.eq.f32.partialorder %v606_v3, 8.507059e+37 }
 0x232   :  { %v1580_v29 = vpop.eup %1579 }
 0x233   :  { %v576_v52 = vmul.f32 %v1580_v29, %v574_v49  ;;  %v1582_v38 = vpop.eup %1581  ;;  %vm581_vm12 = vweird.f32 %v1580_v29 }
 0x234   :  { %v1584_v54 = vpop.eup %1583  ;;  %v623_v60 = vmul.f32 %v1582_v38, %v621_v40  ;;  %vm582_vm14 = vmor %vm580_vm13, %vm581_vm12  ;;  %vm628_vm6 = vweird.f32 %v1582_v38 }
 0x235   :  { %v577_v55 = vsub.f32 1.0, %v576_v52  ;;  %v598_v37 = vmul.f32 %v1584_v54, %v596_v53  ;;  %vm603_vm15 = vweird.f32 %v1584_v54  ;;  %v1586_v21 = vpop.eup %1585  ;;  %v633_v52 = vand.u32 2147483648, %v621_v40  ;;  %vm629_vm8 = vmor %vm627_vm7, %vm628_vm6 }
 0x236   :  { %v624_v12 = vsub.f32 1.0, %v623_v60  ;;  %vm604_vm4 = vmor %vm602_vm3, %vm603_vm15  ;;  %v631_v53 = vand.u32 2147483647, %v621_v40 }
 0x237   :  { %v578_v50 = vmul.f32 %v1580_v29, %v577_v55  ;;  %v599_v62 = vsub.f32 1.0, %v598_v37  ;;  %v634_v31 = vor.u32 1.1754944e-38, %v633_v52 }
 0x238   :  { %v625_v28 = vmul.f32 %v1582_v38, %v624_v12  ;;  %vm632_vm9 = vcmp.eq.f32.partialorder %v631_v53, 8.507059e+37 }
 0x239   :  { %v579_v0 = vadd.f32 %v1580_v29, %v578_v50  ;;  %v600_v2 = vmul.f32 %v1584_v54, %v599_v62 }
 0x23b   :  { %v583_v5 = vsel %vm582_vm14, %v1580_v29, %v579_v0  ;;  %v601_v14 = vadd.f32 %v1584_v54, %v600_v2  ;;  %v626_v29 = vadd.f32 %v1582_v38, %v625_v28 }
 0x23c   :  { %v588_v16 = vsel %vm585_vm2, %v587_v11, %v583_v5 }
 0x23d   :  { %v605_v20 = vsel %vm604_vm4, %v1584_v54, %v601_v14  ;;  %v616_v49 = vmul.f32 %v1586_v21, %v588_v16  ;;  %v630_v55 = vsel %vm629_vm8, %v1582_v38, %v626_v29  ;;  %v1480_v38 = vld [vmem:[%s2129_s0 + $0x18] sm:$0xff] }
 0x23e   :  { %v610_v23 = vsel %vm607_vm5, %v609_v19, %v605_v20  ;;  %v635_v37 = vsel %vm632_vm9, %v634_v31, %v630_v55  ;;  %v706_v60 = vrot.slane %v1480_v38, 6 }
 0x23f   :  { %v615_v36 = vmul.f32 %v610_v23, %v1926_v42 }
 0x241   :  { %v1970_v33 = vadd.f32 %v616_v49, %v615_v36 }
 0x243   :  { %1587 = vtanh.f32 %v1970_v33 }
 0x249   :  { %v1588_v54 = vpop.eup %1587 }
 0x24a   :  { %v638_v50 = vmul.f32 %v1588_v54, %v635_v37 }
 0x24c   :  { %v639_v56 = vpack.c.bf16 %v638_v50, %v638_v50 }
 0x24e   :  { %1479 = vst [vmem:[%s2131_s2 + $0x2] sm:$0x1] %v639_v56  ;;  %652 = vmatmul.bf16.vlgmr.msrb.gmra.mxu0 %v639_v56  ;;  %665 = vmatmul.bf16.vlgmr.msrb.gmra.mxu1 %v639_v56 }
 0x24f   :  { %678 = vmatmul.bf16.vlgmr.msrb.gmra.mxu2 %v639_v56  ;;  %700 = vmatmul.bf16.vlgmr.msrb.gmra.mxu3 %v639_v56 }
 0x250   :  { %920 = vmatpush.bf16.msrb.mxu0 %v1717_v4  ;;  %933 = vmatpush.bf16.msrb.mxu1 %v1719_v8 }
 0x251   :  { %946 = vmatpush.bf16.msrb.mxu2 %v1721_v9  ;;  %968 = vmatpush.bf16.msrb.mxu3 %v1724_v13 }
 0x254   :  { %921 = vmatpush.bf16.msrb.mxu0 %v1728_v17  ;;  %934 = vmatpush.bf16.msrb.mxu1 %v1730_v18 }
 0x255   :  { %947 = vmatpush.bf16.msrb.mxu2 %v1733_v22  ;;  %969 = vmatpush.bf16.msrb.mxu3 %v1735_v26 }
 0x258   :  { %922 = vmatpush.bf16.msrb.mxu0 %v1738_v30  ;;  %935 = vmatpush.bf16.msrb.mxu1 %v1742_v34 }
 0x259   :  { %948 = vmatpush.bf16.msrb.mxu2 %v1744_v35  ;;  %970 = vmatpush.bf16.msrb.mxu3 %v1747_v39 }
 0x25c   :  { %923 = vmatpush.bf16.msrb.mxu0 %v1750_v45  ;;  %936 = vmatpush.bf16.msrb.mxu1 %v1754_v46 }
 0x25d   :  { %949 = vmatpush.bf16.msrb.mxu2 %v1756_v47  ;;  %971 = vmatpush.bf16.msrb.mxu3 %v1759_v51 }
 0x260   :  { %924 = vmatpush.bf16.msrb.mxu0 %v1762_v57  ;;  %937 = vmatpush.bf16.msrb.mxu1 %v1766_v58 }
 0x261   :  { %950 = vmatpush.bf16.msrb.mxu2 %v1768_v59  ;;  %972 = vmatpush.bf16.msrb.mxu3 %v1771_v63 }
 0x264   :  { %925 = vmatpush.bf16.msrb.mxu0 %v1774_v6  ;;  %938 = vmatpush.bf16.msrb.mxu1 %v1778_v7 }
 0x265   :  { %951 = vmatpush.bf16.msrb.mxu2 %v1780_v10  ;;  %973 = vmatpush.bf16.msrb.mxu3 %v1783_v15 }
 0x268   :  { %926 = vmatpush.bf16.msrb.mxu0 %v1786_v24  ;;  %939 = vmatpush.bf16.msrb.mxu1 %v1790_v25 }
 0x269   :  { %952 = vmatpush.bf16.msrb.mxu2 %v1792_v27  ;;  %974 = vmatpush.bf16.msrb.mxu3 %v1795_v32 }
 0x26c   :  { %927 = vmatpush.bf16.msrb.mxu0 %v1798_v41  ;;  %940 = vmatpush.bf16.msrb.mxu1 %v1802_v43 }
 0x26d   :  { %953 = vmatpush.bf16.msrb.mxu2 %v1804_v44  ;;  %975 = vmatpush.bf16.msrb.mxu3 %v1807_v48 }
 0x2cb   :  { %v653_v42 = vpop.f32.mrf.mxu0  ;;  %v666_v40 = vpop.f32.mrf.mxu1 }
 0x2cc   :  { %v686_v61 = vrot.slane %v666_v40, 6 }
 0x2ce   :  { %v688_v11 = vsel %vm241_vm0, %v653_v42, %v686_v61 }
 0x2d2   :  { %v679_v62 = vpop.f32.mrf.mxu2  ;;  %v701_v0 = vpop.f32.mrf.mxu3 }
 0x2d3   :  { %v687_v1 = vrot.slane %v679_v62, 4  ;;  %v708_v2 = vadd.f32 %v706_v60, %v701_v0  ;;  %v655_v3 = vpop.f32.mrf.mxu0  ;;  %v668_v5 = vpop.f32.mrf.mxu1 }
 0x2d5   :  { %v689_v12 = vsel %vm243_vm1, %v688_v11, %v687_v1  ;;  %v1483_v14 = vmul.f32 -1.442695, %v708_v2 }
 0x2d6   :  { %v691_v16 = vadd.f32 %v1480_v38, %v689_v12 }
 0x2d7   :  { %1589 = vpow2.f32 %v1483_v14 }
 0x2d8   :  { %v1481_v19 = vmul.f32 -1.442695, %v691_v16  ;;  %v729_v20 = vrot.slane %v691_v16, 2  ;;  %v750_v42 = vrot.slane %v691_v16, 4 }
 0x2da   :  { %1591 = vpow2.f32 %v1481_v19  ;;  %v1482_v21 = vmul.f32 -1.442695, %v729_v20  ;;  %v681_v23 = vpop.f32.mrf.mxu2  ;;  %v703_v28 = vpop.f32.mrf.mxu3 }
 0x2dc   :  { %1593 = vpow2.f32 %v1482_v21 }
 0x2dd   :  { %v1590_v36 = vpop.eup %1589 }
 0x2de   :  { %v759_v52 = vadd.f32 1.0, %v1590_v36 }
 0x2e0   :  { %v1592_v49 = vpop.eup %1591  ;;  %vm765_vm5 = vweird.f32 %v759_v52 }
 0x2e1   :  { %v712_v29 = vadd.f32 1.0, %v1592_v49 }
 0x2e2   :  { %v1594_v53 = vpop.eup %1593 }
 0x2e3   :  { %1595 = vrcp.f32 %v712_v29  ;;  %v734_v55 = vadd.f32 1.0, %v1594_v53  ;;  %v724_v60 = vand.u32 2147483648, %v712_v29  ;;  %v722_v62 = vand.u32 2147483647, %v712_v29 }
 0x2e4   :  { %1597 = vrcp.f32 %v759_v52  ;;  %vm718_vm11 = vweird.f32 %v712_v29 }
 0x2e5   :  { %1599 = vrcp.f32 %v734_v55  ;;  %v746_v2 = vand.u32 2147483648, %v734_v55  ;;  %v744_v5 = vand.u32 2147483647, %v734_v55  ;;  %v725_v12 = vor.u32 1.1754944e-38, %v724_v60 }
 0x2e6   :  { %1601 = vtanh.f32 %v750_v42  ;;  %vm723_vm14 = vcmp.eq.f32.partialorder %v722_v62, 8.507059e+37  ;;  %vm740_vm15 = vweird.f32 %v734_v55 }
 0x2e7   :  { %v747_v20 = vor.u32 1.1754944e-38, %v746_v2  ;;  %vm745_vm3 = vcmp.eq.f32.partialorder %v744_v5, 8.507059e+37 }
 0x2e9   :  { %v1596_v31 = vpop.eup %1595 }
 0x2ea   :  { %v714_v54 = vmul.f32 %v1596_v31, %v712_v29  ;;  %v1598_v37 = vpop.eup %1597  ;;  %vm719_vm10 = vweird.f32 %v1596_v31 }
 0x2eb   :  { %v1600_v50 = vpop.eup %1599  ;;  %v761_v61 = vmul.f32 %v1598_v37, %v759_v52  ;;  %vm720_vm12 = vmor %vm718_vm11, %vm719_vm10  ;;  %vm766_vm4 = vweird.f32 %v1598_v37 }
 0x2ec   :  { %v715_v56 = vsub.f32 1.0, %v714_v54  ;;  %v736_v40 = vmul.f32 %v1600_v50, %v734_v55  ;;  %vm741_vm13 = vweird.f32 %v1600_v50  ;;  %v1602_v23 = vpop.eup %1601  ;;  %v771_v54 = vand.u32 2147483648, %v759_v52  ;;  %vm767_vm6 = vmor %vm765_vm5, %vm766_vm4 }
 0x2ed   :  { %v762_v14 = vsub.f32 1.0, %v761_v61  ;;  %vm742_vm2 = vmor %vm740_vm15, %vm741_vm13  ;;  %v769_v55 = vand.u32 2147483647, %v759_v52 }
 0x2ee   :  { %v716_v38 = vmul.f32 %v1596_v31, %v715_v56  ;;  %v737_v0 = vsub.f32 1.0, %v736_v40  ;;  %v772_v42 = vor.u32 1.1754944e-38, %v771_v54 }
 0x2ef   :  { %v763_v36 = vmul.f32 %v1598_v37, %v762_v14  ;;  %vm770_vm7 = vcmp.eq.f32.partialorder %v769_v55, 8.507059e+37 }
 0x2f0   :  { %v717_v1 = vadd.f32 %v1596_v31, %v716_v38  ;;  %v738_v3 = vmul.f32 %v1600_v50, %v737_v0 }
 0x2f2   :  { %v721_v11 = vsel %vm720_vm12, %v1596_v31, %v717_v1  ;;  %v739_v16 = vadd.f32 %v1600_v50, %v738_v3  ;;  %v764_v31 = vadd.f32 %v1598_v37, %v763_v36 }
 0x2f3   :  { %v726_v19 = vsel %vm723_vm14, %v725_v12, %v721_v11 }
 0x2f4   :  { %v743_v21 = vsel %vm742_vm2, %v1600_v50, %v739_v16  ;;  %v754_v29 = vmul.f32 %v1602_v23, %v726_v19  ;;  %v768_v56 = vsel %vm767_vm6, %v1598_v37, %v764_v31  ;;  %v1485_v37 = vld [vmem:[%s2129_s0 + $0x20] sm:$0xff] }
 0x2f5   :  { %v748_v28 = vsel %vm745_vm3, %v747_v20, %v743_v21  ;;  %v773_v40 = vsel %vm770_vm7, %v772_v42, %v768_v56  ;;  %v844_v61 = vrot.slane %v1485_v37, 6 }
 0x2f6   :  { %v753_v49 = vmul.f32 %v748_v28, %v1970_v33 }
 0x2f8   :  { %v2014_v53 = vadd.f32 %v754_v29, %v753_v49 }
 0x2fa   :  { %1603 = vtanh.f32 %v2014_v53 }
 0x300   :  { %v1604_v50 = vpop.eup %1603 }
 0x301   :  { %v776_v38 = vmul.f32 %v1604_v50, %v773_v40 }
 0x303   :  { %v777_v60 = vpack.c.bf16 %v776_v38, %v776_v38 }
 0x305   :  { %1484 = vst [vmem:[%s2131_s2 + $0x3] sm:$0x1] %v777_v60  ;;  %790 = vmatmul.bf16.vlgmr.msra.gmra.mxu0 %v777_v60  ;;  %803 = vmatmul.bf16.vlgmr.msra.gmra.mxu1 %v777_v60 }
 0x306   :  { %816 = vmatmul.bf16.vlgmr.msra.gmra.mxu2 %v777_v60  ;;  %838 = vmatmul.bf16.vlgmr.msra.gmra.mxu3 %v777_v60 }
 0x307   :  { %1058 = vmatpush.bf16.msra.mxu0 %v1717_v4  ;;  %1071 = vmatpush.bf16.msra.mxu1 %v1719_v8 }
 0x308   :  { %1084 = vmatpush.bf16.msra.mxu2 %v1721_v9  ;;  %1106 = vmatpush.bf16.msra.mxu3 %v1724_v13 }
 0x30b   :  { %1059 = vmatpush.bf16.msra.mxu0 %v1728_v17  ;;  %1072 = vmatpush.bf16.msra.mxu1 %v1730_v18 }
 0x30c   :  { %1085 = vmatpush.bf16.msra.mxu2 %v1733_v22  ;;  %1107 = vmatpush.bf16.msra.mxu3 %v1735_v26 }
 0x30f   :  { %1060 = vmatpush.bf16.msra.mxu0 %v1738_v30  ;;  %1073 = vmatpush.bf16.msra.mxu1 %v1742_v34 }
 0x310   :  { %1086 = vmatpush.bf16.msra.mxu2 %v1744_v35  ;;  %1108 = vmatpush.bf16.msra.mxu3 %v1747_v39 }
 0x313   :  { %1061 = vmatpush.bf16.msra.mxu0 %v1750_v45  ;;  %1074 = vmatpush.bf16.msra.mxu1 %v1754_v46 }
 0x314   :  { %1087 = vmatpush.bf16.msra.mxu2 %v1756_v47  ;;  %1109 = vmatpush.bf16.msra.mxu3 %v1759_v51 }
 0x317   :  { %1062 = vmatpush.bf16.msra.mxu0 %v1762_v57  ;;  %1075 = vmatpush.bf16.msra.mxu1 %v1766_v58 }
 0x318   :  { %1088 = vmatpush.bf16.msra.mxu2 %v1768_v59  ;;  %1110 = vmatpush.bf16.msra.mxu3 %v1771_v63 }
 0x31b   :  { %1063 = vmatpush.bf16.msra.mxu0 %v1774_v6  ;;  %1076 = vmatpush.bf16.msra.mxu1 %v1778_v7 }
 0x31c   :  { %1089 = vmatpush.bf16.msra.mxu2 %v1780_v10  ;;  %1111 = vmatpush.bf16.msra.mxu3 %v1783_v15 }
 0x31f   :  { %1064 = vmatpush.bf16.msra.mxu0 %v1786_v24  ;;  %1077 = vmatpush.bf16.msra.mxu1 %v1790_v25 }
 0x320   :  { %1090 = vmatpush.bf16.msra.mxu2 %v1792_v27  ;;  %1112 = vmatpush.bf16.msra.mxu3 %v1795_v32 }
 0x323   :  { %1065 = vmatpush.bf16.msra.mxu0 %v1798_v41  ;;  %1078 = vmatpush.bf16.msra.mxu1 %v1802_v43 }
 0x324   :  { %1091 = vmatpush.bf16.msra.mxu2 %v1804_v44  ;;  %1113 = vmatpush.bf16.msra.mxu3 %v1807_v48 }
 0x382   :  { %v791_v33 = vpop.f32.mrf.mxu0  ;;  %v804_v52 = vpop.f32.mrf.mxu1 }
 0x383   :  { %v824_v62 = vrot.slane %v804_v52, 6 }
 0x385   :  { %v826_v12 = vsel %vm241_vm0, %v791_v33, %v824_v62 }
 0x389   :  { %v817_v0 = vpop.f32.mrf.mxu2  ;;  %v839_v1 = vpop.f32.mrf.mxu3 }
 0x38a   :  { %v825_v2 = vrot.slane %v817_v0, 4  ;;  %v846_v3 = vadd.f32 %v844_v61, %v839_v1  ;;  %v793_v5 = vpop.f32.mrf.mxu0  ;;  %v806_v11 = vpop.f32.mrf.mxu1 }
 0x38c   :  { %v827_v14 = vsel %vm243_vm1, %v826_v12, %v825_v2  ;;  %v1488_v16 = vmul.f32 -1.442695, %v846_v3 }
 0x38d   :  { %v829_v19 = vadd.f32 %v1485_v37, %v827_v14 }
 0x38e   :  { %1605 = vpow2.f32 %v1488_v16 }
 0x38f   :  { %v1486_v20 = vmul.f32 -1.442695, %v829_v19  ;;  %v867_v21 = vrot.slane %v829_v19, 2  ;;  %v888_v33 = vrot.slane %v829_v19, 4 }
 0x391   :  { %1607 = vpow2.f32 %v1486_v20  ;;  %v1487_v23 = vmul.f32 -1.442695, %v867_v21  ;;  %v819_v28 = vpop.f32.mrf.mxu2  ;;  %v841_v36 = vpop.f32.mrf.mxu3 }
 0x393   :  { %1609 = vpow2.f32 %v1487_v23 }
 0x394   :  { %v1606_v49 = vpop.eup %1605 }
 0x395   :  { %v897_v54 = vadd.f32 1.0, %v1606_v49 }
 0x397   :  { %v1608_v29 = vpop.eup %1607  ;;  %vm903_vm3 = vweird.f32 %v897_v54 }
 0x398   :  { %v850_v31 = vadd.f32 1.0, %v1608_v29 }
 0x399   :  { %v1610_v55 = vpop.eup %1609 }
 0x39a   :  { %1611 = vrcp.f32 %v850_v31  ;;  %v872_v56 = vadd.f32 1.0, %v1610_v55  ;;  %v862_v61 = vand.u32 2147483648, %v850_v31  ;;  %v860_v0 = vand.u32 2147483647, %v850_v31 }
 0x39b   :  { %1613 = vrcp.f32 %v897_v54  ;;  %vm856_vm9 = vweird.f32 %v850_v31 }
 0x39c   :  { %1615 = vrcp.f32 %v872_v56  ;;  %v884_v3 = vand.u32 2147483648, %v872_v56  ;;  %v882_v11 = vand.u32 2147483647, %v872_v56  ;;  %v863_v14 = vor.u32 1.1754944e-38, %v862_v61 }
 0x39d   :  { %1617 = vtanh.f32 %v888_v33  ;;  %vm861_vm12 = vcmp.eq.f32.partialorder %v860_v0, 8.507059e+37  ;;  %vm878_vm13 = vweird.f32 %v872_v56 }
 0x39e   :  { %v885_v21 = vor.u32 1.1754944e-38, %v884_v3  ;;  %vm883_vm15 = vcmp.eq.f32.partialorder %v882_v11, 8.507059e+37 }
 0x3a0   :  { %v1612_v42 = vpop.eup %1611 }
 0x3a1   :  { %v852_v50 = vmul.f32 %v1612_v42, %v850_v31  ;;  %v1614_v40 = vpop.eup %1613  ;;  %vm857_vm8 = vweird.f32 %v1612_v42 }
 0x3a2   :  { %v1616_v38 = vpop.eup %1615  ;;  %v899_v62 = vmul.f32 %v1614_v40, %v897_v54  ;;  %vm858_vm10 = vmor %vm856_vm9, %vm857_vm8  ;;  %vm904_vm2 = vweird.f32 %v1614_v40 }
 0x3a3   :  { %v853_v60 = vsub.f32 1.0, %v852_v50  ;;  %v874_v52 = vmul.f32 %v1616_v38, %v872_v56  ;;  %vm879_vm11 = vweird.f32 %v1616_v38  ;;  %v1618_v28 = vpop.eup %1617  ;;  %v909_v50 = vand.u32 2147483648, %v897_v54  ;;  %vm905_vm4 = vmor %vm903_vm3, %vm904_vm2 }
 0x3a4   :  { %v900_v16 = vsub.f32 1.0, %v899_v62  ;;  %vm880_vm14 = vmor %vm878_vm13, %vm879_vm11  ;;  %v907_v56 = vand.u32 2147483647, %v897_v54 }
 0x3a5   :  { %v854_v37 = vmul.f32 %v1612_v42, %v853_v60  ;;  %v875_v1 = vsub.f32 1.0, %v874_v52  ;;  %v910_v33 = vor.u32 1.1754944e-38, %v909_v50 }
 0x3a6   :  { %v901_v49 = vmul.f32 %v1614_v40, %v900_v16  ;;  %vm908_vm5 = vcmp.eq.f32.partialorder %v907_v56, 8.507059e+37 }
 0x3a7   :  { %v855_v2 = vadd.f32 %v1612_v42, %v854_v37  ;;  %v876_v5 = vmul.f32 %v1616_v38, %v875_v1 }
 0x3a9   :  { %v859_v12 = vsel %vm858_vm10, %v1612_v42, %v855_v2  ;;  %v877_v19 = vadd.f32 %v1616_v38, %v876_v5  ;;  %v902_v42 = vadd.f32 %v1614_v40, %v901_v49 }
 0x3aa   :  { %v864_v20 = vsel %vm861_vm12, %v863_v14, %v859_v12 }
 0x3ab   :  { %v881_v23 = vsel %vm880_vm14, %v1616_v38, %v877_v19  ;;  %v892_v31 = vmul.f32 %v1618_v28, %v864_v20  ;;  %v906_v60 = vsel %vm905_vm4, %v1614_v40, %v902_v42 }
 0x3ac   :  { %v886_v36 = vsel %vm883_vm15, %v885_v21, %v881_v23  ;;  %v911_v52 = vsel %vm908_vm5, %v910_v33, %v906_v60 }
 0x3ad   :  { %v891_v29 = vmul.f32 %v886_v36, %v2014_v53 }
 0x3af   :  { %v2058_v55 = vadd.f32 %v892_v31, %v891_v29 }
 0x3b1   :  { %1619 = vtanh.f32 %v2058_v55 }
 0x3b7   :  { %v1620_v38 = vpop.eup %1619 }
 0x3b8   :  { %v914_v37 = vmul.f32 %v1620_v38, %v911_v52 }
 0x3ba   :  { %v915_v61 = vpack.c.bf16 %v914_v37, %v914_v37 }
 0x3bc   :  { %1489 = vst [vmem:[%s2131_s2 + $0x4] sm:$0x1] %v915_v61  ;;  %928 = vmatmul.bf16.vlgmr.msrb.gmra.mxu0 %v915_v61  ;;  %941 = vmatmul.bf16.vlgmr.msrb.gmra.mxu1 %v915_v61 }
 0x3bd   :  { %954 = vmatmul.bf16.vlgmr.msrb.gmra.mxu2 %v915_v61  ;;  %976 = vmatmul.bf16.vlgmr.msrb.gmra.mxu3 %v915_v61 }
 0x3be   :  { %1196 = vmatpush.bf16.msrb.mxu0 %v1717_v4  ;;  %1209 = vmatpush.bf16.msrb.mxu1 %v1719_v8 }
 0x3bf   :  { %1222 = vmatpush.bf16.msrb.mxu2 %v1721_v9  ;;  %1244 = vmatpush.bf16.msrb.mxu3 %v1724_v13  ;;  %v1490_v9 = vld [vmem:[%s2129_s0 + $0x28] sm:$0xff] }
 0x3c0   :  { %v982_v13 = vrot.slane %v1490_v9, 6 }
 0x3c2   :  { %1197 = vmatpush.bf16.msrb.mxu0 %v1728_v17  ;;  %1210 = vmatpush.bf16.msrb.mxu1 %v1730_v18 }
 0x3c3   :  { %1223 = vmatpush.bf16.msrb.mxu2 %v1733_v22  ;;  %1245 = vmatpush.bf16.msrb.mxu3 %v1735_v26 }
 0x3c6   :  { %1198 = vmatpush.bf16.msrb.mxu0 %v1738_v30  ;;  %1211 = vmatpush.bf16.msrb.mxu1 %v1742_v34 }
 0x3c7   :  { %1224 = vmatpush.bf16.msrb.mxu2 %v1744_v35  ;;  %1246 = vmatpush.bf16.msrb.mxu3 %v1747_v39 }
 0x3ca   :  { %1199 = vmatpush.bf16.msrb.mxu0 %v1750_v45  ;;  %1212 = vmatpush.bf16.msrb.mxu1 %v1754_v46 }
 0x3cb   :  { %1225 = vmatpush.bf16.msrb.mxu2 %v1756_v47  ;;  %1247 = vmatpush.bf16.msrb.mxu3 %v1759_v51 }
 0x3ce   :  { %1200 = vmatpush.bf16.msrb.mxu0 %v1762_v57  ;;  %1213 = vmatpush.bf16.msrb.mxu1 %v1766_v58 }
 0x3cf   :  { %1226 = vmatpush.bf16.msrb.mxu2 %v1768_v59  ;;  %1248 = vmatpush.bf16.msrb.mxu3 %v1771_v63 }
 0x3d2   :  { %1201 = vmatpush.bf16.msrb.mxu0 %v1774_v6  ;;  %1214 = vmatpush.bf16.msrb.mxu1 %v1778_v7 }
 0x3d3   :  { %1227 = vmatpush.bf16.msrb.mxu2 %v1780_v10  ;;  %1249 = vmatpush.bf16.msrb.mxu3 %v1783_v15 }
 0x3d6   :  { %1202 = vmatpush.bf16.msrb.mxu0 %v1786_v24  ;;  %1215 = vmatpush.bf16.msrb.mxu1 %v1790_v25 }
 0x3d7   :  { %1228 = vmatpush.bf16.msrb.mxu2 %v1792_v27  ;;  %1250 = vmatpush.bf16.msrb.mxu3 %v1795_v32 }
 0x3da   :  { %1203 = vmatpush.bf16.msrb.mxu0 %v1798_v41  ;;  %1216 = vmatpush.bf16.msrb.mxu1 %v1802_v43 }
 0x3db   :  { %1229 = vmatpush.bf16.msrb.mxu2 %v1804_v44  ;;  %1251 = vmatpush.bf16.msrb.mxu3 %v1807_v48 }
 0x439   :  { %v929_v4 = vpop.f32.mrf.mxu0  ;;  %v942_v8 = vpop.f32.mrf.mxu1 }
 0x43a   :  { %v962_v17 = vrot.slane %v942_v8, 6 }
 0x43c   :  { %v964_v39 = vsel %vm241_vm0, %v929_v4, %v962_v17 }
 0x440   :  { %v955_v18 = vpop.f32.mrf.mxu2  ;;  %v977_v22 = vpop.f32.mrf.mxu3 }
 0x441   :  { %v963_v26 = vrot.slane %v955_v18, 4  ;;  %v984_v30 = vadd.f32 %v982_v13, %v977_v22  ;;  %v931_v34 = vpop.f32.mrf.mxu0  ;;  %v944_v35 = vpop.f32.mrf.mxu1 }
 0x443   :  { %v965_v45 = vsel %vm243_vm1, %v964_v39, %v963_v26  ;;  %v1493_v46 = vmul.f32 -1.442695, %v984_v30 }
 0x444   :  { %v967_v47 = vadd.f32 %v1490_v9, %v965_v45  ;;  %v1495_v9 = vld [vmem:[%s2129_s0 + $0x30] sm:$0xff] }
 0x445   :  { %1621 = vpow2.f32 %v1493_v46  ;;  %v1120_v13 = vrot.slane %v1495_v9, 6 }
 0x446   :  { %v1491_v51 = vmul.f32 -1.442695, %v967_v47  ;;  %v1005_v57 = vrot.slane %v967_v47, 2  ;;  %v1026_v48 = vrot.slane %v967_v47, 4 }
 0x448   :  { %1623 = vpow2.f32 %v1491_v51  ;;  %v1492_v58 = vmul.f32 -1.442695, %v1005_v57  ;;  %v957_v59 = vpop.f32.mrf.mxu2  ;;  %v979_v63 = vpop.f32.mrf.mxu3 }
 0x44a   :  { %1625 = vpow2.f32 %v1492_v58 }
 0x44b   :  { %v1622_v6 = vpop.eup %1621 }
 0x44c   :  { %v1035_v15 = vadd.f32 1.0, %v1622_v6 }
 0x44e   :  { %v1624_v7 = vpop.eup %1623  ;;  %v1047_v56 = vand.u32 2147483648, %v1035_v15  ;;  %vm1041_vm15 = vweird.f32 %v1035_v15  ;;  %v1045_v60 = vand.u32 2147483647, %v1035_v15 }
 0x44f   :  { %v988_v10 = vadd.f32 1.0, %v1624_v7 }
 0x450   :  { %v1626_v24 = vpop.eup %1625  ;;  %v1048_v38 = vor.u32 1.1754944e-38, %v1047_v56  ;;  %vm1046_vm3 = vcmp.eq.f32.partialorder %v1045_v60, 8.507059e+37 }
 0x451   :  { %1627 = vrcp.f32 %v988_v10  ;;  %v1010_v25 = vadd.f32 1.0, %v1626_v24  ;;  %v1000_v40 = vand.u32 2147483648, %v988_v10  ;;  %v998_v0 = vand.u32 2147483647, %v988_v10 }
 0x452   :  { %1629 = vrcp.f32 %v1035_v15  ;;  %vm994_vm7 = vweird.f32 %v988_v10 }
 0x453   :  { %1631 = vrcp.f32 %v1010_v25  ;;  %v1022_v3 = vand.u32 2147483648, %v1010_v25  ;;  %v1020_v11 = vand.u32 2147483647, %v1010_v25  ;;  %v1001_v14 = vor.u32 1.1754944e-38, %v1000_v40 }
 0x454   :  { %1633 = vtanh.f32 %v1026_v48  ;;  %vm999_vm10 = vcmp.eq.f32.partialorder %v998_v0, 8.507059e+37  ;;  %vm1016_vm11 = vweird.f32 %v1010_v25 }
 0x455   :  { %v1023_v21 = vor.u32 1.1754944e-38, %v1022_v3  ;;  %vm1021_vm13 = vcmp.eq.f32.partialorder %v1020_v11, 8.507059e+37 }
 0x457   :  { %v1628_v27 = vpop.eup %1627 }
 0x458   :  { %v990_v32 = vmul.f32 %v1628_v27, %v988_v10  ;;  %v1630_v41 = vpop.eup %1629  ;;  %vm995_vm6 = vweird.f32 %v1628_v27 }
 0x459   :  { %v1632_v43 = vpop.eup %1631  ;;  %v1037_v62 = vmul.f32 %v1630_v41, %v1035_v15  ;;  %vm996_vm8 = vmor %vm994_vm7, %vm995_vm6  ;;  %vm1042_vm14 = vweird.f32 %v1630_v41 }
 0x45a   :  { %v991_v44 = vsub.f32 1.0, %v990_v32  ;;  %v1012_v53 = vmul.f32 %v1632_v43, %v1010_v25  ;;  %vm1017_vm9 = vweird.f32 %v1632_v43  ;;  %v1634_v28 = vpop.eup %1633  ;;  %vm1043_vm2 = vmor %vm1041_vm15, %vm1042_vm14 }
 0x45b   :  { %v1038_v16 = vsub.f32 1.0, %v1037_v62  ;;  %vm1018_vm12 = vmor %vm1016_vm11, %vm1017_vm9 }
 0x45c   :  { %v992_v54 = vmul.f32 %v1628_v27, %v991_v44  ;;  %v1013_v1 = vsub.f32 1.0, %v1012_v53 }
 0x45d   :  { %v1039_v49 = vmul.f32 %v1630_v41, %v1038_v16 }
 0x45e   :  { %v993_v2 = vadd.f32 %v1628_v27, %v992_v54  ;;  %v1014_v5 = vmul.f32 %v1632_v43, %v1013_v1 }
 0x45f   :  { %v1040_v50 = vadd.f32 %v1630_v41, %v1039_v49 }
 0x460   :  { %v997_v12 = vsel %vm996_vm8, %v1628_v27, %v993_v2  ;;  %v1015_v19 = vadd.f32 %v1632_v43, %v1014_v5 }
 0x461   :  { %v1002_v20 = vsel %vm999_vm10, %v1001_v14, %v997_v12  ;;  %v1044_v33 = vsel %vm1043_vm2, %v1630_v41, %v1040_v50 }
 0x462   :  { %v1019_v23 = vsel %vm1018_vm12, %v1632_v43, %v1015_v19  ;;  %v1030_v31 = vmul.f32 %v1634_v28, %v1002_v20  ;;  %v1049_v37 = vsel %vm1046_vm3, %v1048_v38, %v1044_v33 }
 0x463   :  { %v1024_v36 = vsel %vm1021_vm13, %v1023_v21, %v1019_v23 }
 0x464   :  { %v1029_v29 = vmul.f32 %v1024_v36, %v2058_v55 }
 0x466   :  { %v2102_v42 = vadd.f32 %v1030_v31, %v1029_v29 }
 0x468   :  { %1635 = vtanh.f32 %v2102_v42 }
 0x46e   :  { %v1636_v52 = vpop.eup %1635 }
 0x46f   :  { %v1052_v61 = vmul.f32 %v1636_v52, %v1049_v37 }
 0x471   :  { %v1053_v4 = vpack.c.bf16 %v1052_v61, %v1052_v61 }
 0x473   :  { %1494 = vst [vmem:[%s2131_s2 + $0x5] sm:$0x1] %v1053_v4  ;;  %1066 = vmatmul.bf16.vlgmr.msra.gmra.mxu0 %v1053_v4  ;;  %1079 = vmatmul.bf16.vlgmr.msra.gmra.mxu1 %v1053_v4 }
 0x474   :  { %1092 = vmatmul.bf16.vlgmr.msra.gmra.mxu2 %v1053_v4  ;;  %1114 = vmatmul.bf16.vlgmr.msra.gmra.mxu3 %v1053_v4 }
 0x4f0   :  { %v1067_v55 = vpop.f32.mrf.mxu0  ;;  %v1080_v8 = vpop.f32.mrf.mxu1 }
 0x4f1   :  { %v1100_v17 = vrot.slane %v1080_v8, 6 }
 0x4f3   :  { %v1102_v39 = vsel %vm241_vm0, %v1067_v55, %v1100_v17 }
 0x4f7   :  { %v1093_v18 = vpop.f32.mrf.mxu2  ;;  %v1115_v22 = vpop.f32.mrf.mxu3 }
 0x4f8   :  { %v1101_v26 = vrot.slane %v1093_v18, 4  ;;  %v1122_v30 = vadd.f32 %v1120_v13, %v1115_v22  ;;  %v1069_v34 = vpop.f32.mrf.mxu0  ;;  %v1082_v35 = vpop.f32.mrf.mxu1 }
 0x4fa   :  { %v1103_v45 = vsel %vm243_vm1, %v1102_v39, %v1101_v26  ;;  %v1498_v46 = vmul.f32 -1.442695, %v1122_v30 }
 0x4fb   :  { %v1105_v47 = vadd.f32 %v1495_v9, %v1103_v45  ;;  %v1500_v9 = vld [vmem:[%s2129_s0 + $0x38] sm:$0xff] }
 0x4fc   :  { %1637 = vpow2.f32 %v1498_v46  ;;  %v1258_v13 = vrot.slane %v1500_v9, 6 }
 0x4fd   :  { %v1496_v51 = vmul.f32 -1.442695, %v1105_v47  ;;  %v1143_v57 = vrot.slane %v1105_v47, 2  ;;  %v1164_v48 = vrot.slane %v1105_v47, 4 }
 0x4ff   :  { %1639 = vpow2.f32 %v1496_v51  ;;  %v1497_v58 = vmul.f32 -1.442695, %v1143_v57  ;;  %v1095_v59 = vpop.f32.mrf.mxu2  ;;  %v1117_v63 = vpop.f32.mrf.mxu3 }
 0x501   :  { %1641 = vpow2.f32 %v1497_v58 }
 0x502   :  { %v1638_v6 = vpop.eup %1637 }
 0x503   :  { %v1173_v15 = vadd.f32 1.0, %v1638_v6 }
 0x505   :  { %v1640_v7 = vpop.eup %1639  ;;  %v1185_v60 = vand.u32 2147483648, %v1173_v15  ;;  %vm1179_vm13 = vweird.f32 %v1173_v15  ;;  %v1183_v33 = vand.u32 2147483647, %v1173_v15 }
 0x506   :  { %v1126_v10 = vadd.f32 1.0, %v1640_v7 }
 0x507   :  { %v1642_v24 = vpop.eup %1641  ;;  %v1186_v52 = vor.u32 1.1754944e-38, %v1185_v60  ;;  %vm1184_vm15 = vcmp.eq.f32.partialorder %v1183_v33, 8.507059e+37 }
 0x508   :  { %1643 = vrcp.f32 %v1126_v10  ;;  %v1148_v25 = vadd.f32 1.0, %v1642_v24  ;;  %v1138_v40 = vand.u32 2147483648, %v1126_v10  ;;  %v1136_v0 = vand.u32 2147483647, %v1126_v10 }
 0x509   :  { %1645 = vrcp.f32 %v1173_v15  ;;  %vm1132_vm5 = vweird.f32 %v1126_v10 }
 0x50a   :  { %1647 = vrcp.f32 %v1148_v25  ;;  %v1160_v3 = vand.u32 2147483648, %v1148_v25  ;;  %v1158_v11 = vand.u32 2147483647, %v1148_v25  ;;  %v1139_v14 = vor.u32 1.1754944e-38, %v1138_v40 }
 0x50b   :  { %1649 = vtanh.f32 %v1164_v48  ;;  %vm1137_vm8 = vcmp.eq.f32.partialorder %v1136_v0, 8.507059e+37  ;;  %vm1154_vm9 = vweird.f32 %v1148_v25 }
 0x50c   :  { %v1161_v21 = vor.u32 1.1754944e-38, %v1160_v3  ;;  %vm1159_vm11 = vcmp.eq.f32.partialorder %v1158_v11, 8.507059e+37 }
 0x50e   :  { %v1644_v27 = vpop.eup %1643 }
 0x50f   :  { %v1128_v32 = vmul.f32 %v1644_v27, %v1126_v10  ;;  %v1646_v41 = vpop.eup %1645  ;;  %vm1133_vm4 = vweird.f32 %v1644_v27 }
 0x510   :  { %v1648_v43 = vpop.eup %1647  ;;  %v1175_v62 = vmul.f32 %v1646_v41, %v1173_v15  ;;  %vm1134_vm6 = vmor %vm1132_vm5, %vm1133_vm4  ;;  %vm1180_vm12 = vweird.f32 %v1646_v41 }
 0x511   :  { %v1129_v44 = vsub.f32 1.0, %v1128_v32  ;;  %v1150_v53 = vmul.f32 %v1648_v43, %v1148_v25  ;;  %vm1155_vm7 = vweird.f32 %v1648_v43  ;;  %v1650_v28 = vpop.eup %1649  ;;  %vm1181_vm14 = vmor %vm1179_vm13, %vm1180_vm12 }
 0x512   :  { %v1176_v16 = vsub.f32 1.0, %v1175_v62  ;;  %vm1156_vm10 = vmor %vm1154_vm9, %vm1155_vm7 }
 0x513   :  { %v1130_v54 = vmul.f32 %v1644_v27, %v1129_v44  ;;  %v1151_v1 = vsub.f32 1.0, %v1150_v53 }
 0x514   :  { %v1177_v49 = vmul.f32 %v1646_v41, %v1176_v16 }
 0x515   :  { %v1131_v2 = vadd.f32 %v1644_v27, %v1130_v54  ;;  %v1152_v5 = vmul.f32 %v1648_v43, %v1151_v1 }
 0x516   :  { %v1178_v56 = vadd.f32 %v1646_v41, %v1177_v49 }
 0x517   :  { %v1135_v12 = vsel %vm1134_vm6, %v1644_v27, %v1131_v2  ;;  %v1153_v19 = vadd.f32 %v1648_v43, %v1152_v5 }
 0x518   :  { %v1140_v20 = vsel %vm1137_vm8, %v1139_v14, %v1135_v12  ;;  %v1182_v38 = vsel %vm1181_vm14, %v1646_v41, %v1178_v56 }
 0x519   :  { %v1157_v23 = vsel %vm1156_vm10, %v1648_v43, %v1153_v19  ;;  %v1168_v31 = vmul.f32 %v1650_v28, %v1140_v20  ;;  %v1187_v61 = vsel %vm1184_vm15, %v1186_v52, %v1182_v38 }
 0x51a   :  { %v1162_v36 = vsel %vm1159_vm11, %v1161_v21, %v1157_v23 }
 0x51b   :  { %v1167_v29 = vmul.f32 %v1162_v36, %v2102_v42 }
 0x51d   :  { %v2114_v50 = vadd.f32 %v1168_v31, %v1167_v29 }
 0x51f   :  { %1651 = vtanh.f32 %v2114_v50 }
 0x525   :  { %v1652_v37 = vpop.eup %1651 }
 0x526   :  { %v1190_v4 = vmul.f32 %v1652_v37, %v1187_v61 }
 0x528   :  { %v1191_v55 = vpack.c.bf16 %v1190_v4, %v1190_v4 }
 0x52a   :  { %1499 = vst [vmem:[%s2131_s2 + $0x6] sm:$0x1] %v1191_v55  ;;  %1204 = vmatmul.bf16.vlgmr.msrb.gmra.mxu0 %v1191_v55  ;;  %1217 = vmatmul.bf16.vlgmr.msrb.gmra.mxu1 %v1191_v55 }
 0x52b   :  { %1230 = vmatmul.bf16.vlgmr.msrb.gmra.mxu2 %v1191_v55  ;;  %1252 = vmatmul.bf16.vlgmr.msrb.gmra.mxu3 %v1191_v55 }
 0x5a7   :  { %v1205_v42 = vpop.f32.mrf.mxu0  ;;  %v1218_v8 = vpop.f32.mrf.mxu1 }
 0x5a8   :  { %v1238_v17 = vrot.slane %v1218_v8, 6 }
 0x5aa   :  { %v1240_v39 = vsel %vm241_vm0, %v1205_v42, %v1238_v17 }
 0x5ae   :  { %v1231_v18 = vpop.f32.mrf.mxu2  ;;  %v1253_v22 = vpop.f32.mrf.mxu3 }
 0x5af   :  { %v1239_v26 = vrot.slane %v1231_v18, 4  ;;  %v1260_v30 = vadd.f32 %v1258_v13, %v1253_v22  ;;  %v1207_v34 = vpop.f32.mrf.mxu0  ;;  %v1220_v35 = vpop.f32.mrf.mxu1 }
 0x5b1   :  { %v1241_v45 = vsel %vm243_vm1, %v1240_v39, %v1239_v26  ;;  %v1503_v46 = vmul.f32 -1.442695, %v1260_v30 }
 0x5b2   :  { %v1243_v47 = vadd.f32 %v1500_v9, %v1241_v45 }
 0x5b3   :  { %1653 = vpow2.f32 %v1503_v46 }
 0x5b4   :  { %v1501_v51 = vmul.f32 -1.442695, %v1243_v47  ;;  %v1281_v57 = vrot.slane %v1243_v47, 2  ;;  %v1302_v48 = vrot.slane %v1243_v47, 4 }
 0x5b6   :  { %1655 = vpow2.f32 %v1501_v51  ;;  %v1502_v58 = vmul.f32 -1.442695, %v1281_v57  ;;  %v1233_v59 = vpop.f32.mrf.mxu2  ;;  %v1255_v63 = vpop.f32.mrf.mxu3 }
 0x5b8   :  { %1657 = vpow2.f32 %v1502_v58 }
 0x5b9   :  { %v1654_v6 = vpop.eup %1653 }
 0x5ba   :  { %v1311_v15 = vadd.f32 1.0, %v1654_v6 }
 0x5bc   :  { %v1656_v7 = vpop.eup %1655  ;;  %v1323_v33 = vand.u32 2147483648, %v1311_v15  ;;  %vm1317_vm9 = vweird.f32 %v1311_v15  ;;  %v1321_v38 = vand.u32 2147483647, %v1311_v15 }
 0x5bd   :  { %v1264_v10 = vadd.f32 1.0, %v1656_v7 }
 0x5be   :  { %v1658_v24 = vpop.eup %1657  ;;  %v1324_v37 = vor.u32 1.1754944e-38, %v1323_v33  ;;  %vm1322_vm11 = vcmp.eq.f32.partialorder %v1321_v38, 8.507059e+37 }
 0x5bf   :  { %1659 = vrcp.f32 %v1264_v10  ;;  %v1286_v25 = vadd.f32 1.0, %v1658_v24  ;;  %v1276_v40 = vand.u32 2147483648, %v1264_v10  ;;  %v1274_v0 = vand.u32 2147483647, %v1264_v10 }
 0x5c0   :  { %1661 = vrcp.f32 %v1311_v15  ;;  %vm1270_vm1 = vweird.f32 %v1264_v10 }
 0x5c1   :  { %1663 = vrcp.f32 %v1286_v25  ;;  %v1298_v3 = vand.u32 2147483648, %v1286_v25  ;;  %v1296_v11 = vand.u32 2147483647, %v1286_v25  ;;  %v1277_v14 = vor.u32 1.1754944e-38, %v1276_v40 }
 0x5c2   :  { %1665 = vtanh.f32 %v1302_v48  ;;  %vm1275_vm4 = vcmp.eq.f32.partialorder %v1274_v0, 8.507059e+37  ;;  %vm1292_vm5 = vweird.f32 %v1286_v25 }
 0x5c3   :  { %v1299_v21 = vor.u32 1.1754944e-38, %v1298_v3  ;;  %vm1297_vm7 = vcmp.eq.f32.partialorder %v1296_v11, 8.507059e+37 }
 0x5c5   :  { %v1660_v27 = vpop.eup %1659 }
 0x5c6   :  { %v1266_v32 = vmul.f32 %v1660_v27, %v1264_v10  ;;  %v1662_v41 = vpop.eup %1661  ;;  %vm1271_vm0 = vweird.f32 %v1660_v27 }
 0x5c7   :  { %v1664_v43 = vpop.eup %1663  ;;  %v1313_v62 = vmul.f32 %v1662_v41, %v1311_v15  ;;  %vm1272_vm2 = vmor %vm1270_vm1, %vm1271_vm0  ;;  %vm1318_vm8 = vweird.f32 %v1662_v41 }
 0x5c8   :  { %v1267_v44 = vsub.f32 1.0, %v1266_v32  ;;  %v1288_v53 = vmul.f32 %v1664_v43, %v1286_v25  ;;  %vm1293_vm3 = vweird.f32 %v1664_v43  ;;  %v1666_v28 = vpop.eup %1665  ;;  %vm1319_vm10 = vmor %vm1317_vm9, %vm1318_vm8 }
 0x5c9   :  { %v1314_v16 = vsub.f32 1.0, %v1313_v62  ;;  %vm1294_vm6 = vmor %vm1292_vm5, %vm1293_vm3 }
 0x5ca   :  { %v1268_v54 = vmul.f32 %v1660_v27, %v1267_v44  ;;  %v1289_v1 = vsub.f32 1.0, %v1288_v53 }
 0x5cb   :  { %v1315_v49 = vmul.f32 %v1662_v41, %v1314_v16 }
 0x5cc   :  { %v1269_v2 = vadd.f32 %v1660_v27, %v1268_v54  ;;  %v1290_v5 = vmul.f32 %v1664_v43, %v1289_v1 }
 0x5cd   :  { %v1316_v60 = vadd.f32 %v1662_v41, %v1315_v49 }
 0x5ce   :  { %v1273_v12 = vsel %vm1272_vm2, %v1660_v27, %v1269_v2  ;;  %v1291_v19 = vadd.f32 %v1664_v43, %v1290_v5 }
 0x5cf   :  { %v1278_v20 = vsel %vm1275_vm4, %v1277_v14, %v1273_v12  ;;  %v1320_v52 = vsel %vm1319_vm10, %v1662_v41, %v1316_v60 }
 0x5d0   :  { %v1295_v23 = vsel %vm1294_vm6, %v1664_v43, %v1291_v19  ;;  %v1306_v31 = vmul.f32 %v1666_v28, %v1278_v20  ;;  %v1325_v4 = vsel %vm1322_vm11, %v1324_v37, %v1320_v52 }
 0x5d1   :  { %v1300_v36 = vsel %vm1297_vm7, %v1299_v21, %v1295_v23 }
 0x5d2   :  { %v1305_v29 = vmul.f32 %v1300_v36, %v2114_v50 }
 0x5d4   :  { %v1307_v56 = vadd.f32 %v1306_v31, %v1305_v29 }
 0x5d6   :  { %1667 = vtanh.f32 %v1307_v56  ;;  %1333 = vst [vmem:[#allocation3] sm:$0x3] %v1307_v56 }
 0x5dc   :  { %v1668_v61 = vpop.eup %1667 }
 0x5dd   :  { %v1328_v55 = vmul.f32 %v1668_v61, %v1325_v4 }
 0x5df   :  { %v1329_v42 = vpack.c.bf16 %v1328_v55, %v1328_v55  ;;  %1332 = vst [vmem:[#allocation2] sm:$0x3] %v1328_v55 }
 0x5e1   :  { %1504 = vst [vmem:[%s2131_s2 + $0x7] sm:$0x1] %v1329_v42 }
 0x5e2   :  { %1338 = vsyncpa [#allocation5], 1 }

</bundles_post_ra>
